<compile_context>
chip_gen: v7x
topology: tpu7x:2x2x1
jax: 0.10.0
libtpu: 0.0.40
codegen_flags: <defaults>
</compile_context>

<pallas_src>
import functools

import jax
import jax.numpy as jnp
from jax import lax
from jax.experimental import pallas as pl
from jax.experimental.pallas import tpu as pltpu


def _vmem_limit_bytes():
    """Generation-aware VMEM budget: ~75% of physical (48 MiB v7x, ~96 MiB v5e/v6e)."""
    cap = 64 * 1024 * 1024
    try:
        cap = int(pltpu.get_tpu_info().vmem_capacity_bytes)
    except Exception:  # pragma: no cover - conservative fallback
        pass
    return max(32 * 1024 * 1024, min(cap * 3 // 4, 112 * 1024 * 1024))


_VMEM_LIMIT = _vmem_limit_bytes()


# ----------------------------------------------------------------------------
# Pallas kernels
# ----------------------------------------------------------------------------
def _conv3x3_bias_relu_kernel(H, W, emit_padded, x_ref, w_ref, b_ref, m_ref, o_ref):
    """Fused 3x3 conv + bias + ReLU (one batch element x one Cout block per step).

    The 9 shifted taps are stacked along the contraction axis so the whole conv
    is a single bf16 MXU matmul with K = 9*Cin and one f32 result pop.

    x_ref: (1, Cin, (H+4)*W) bf16  activation, 2 zero rows padded top+bottom and
                                   rows flattened so each (dy, dx) tap is a
                                   uniform in-bounds shift along the lane axis.
    w_ref: (co_blk, 9*Cin)   bf16  weights, K index = (dy*3+dx)*Cin + cin.
    b_ref: (co_blk, 1)       f32   bias.
    m_ref: (2, H*W)          bf16  column masks: row0 kills x==0 (left tap),
                                   row1 kills x==W-1 (right tap).
    o_ref: (1, co_blk, H*W)        if not emit_padded
           (1, co_blk, (H+4)*W)    if emit_padded: pad rows are zeroed in-kernel
                                   so the next conv reads it with no XLA pad.
    """
    hw = H * W
    x = x_ref[0]                                   # (Cin, (H+4)*W) bf16
    lmask = m_ref[0:1, :]                          # (1, HW) bf16
    rmask = m_ref[1:2, :]

    # Build the stacked-K operand: 9 shifted taps concatenated along sublanes.
    # TODO(synk): the tap slices start at non-128-aligned lane offsets; padding
    # W to a lane multiple + pltpu.roll would remove the realignment cost.
    taps = []
    for dy in range(3):
        for dx in range(3):
            s = (dy + 1) * W + dx - 1              # flat shift of tap (dy, dx)
            t = x[:, s:s + hw]                     # (Cin, HW)
            if dx == 0:
                t = t * lmask                      # wrapped left neighbours -> 0
            elif dx == 2:
                t = t * rmask                      # wrapped right neighbours -> 0
            taps.append(t)
    xs = jnp.concatenate(taps, axis=0)             # (9*Cin, HW) bf16

    acc = jnp.dot(w_ref[...], xs, preferred_element_type=jnp.float32)  # (co_blk, HW)
    acc = acc + b_ref[...]                         # bias broadcast, f32
    y = jnp.maximum(acc, 0.0).astype(o_ref.dtype)

    if emit_padded:
        zpad = jnp.zeros((y.shape[0], 2 * W), dtype=o_ref.dtype)
        o_ref[0] = jnp.concatenate([zpad, y, zpad], axis=1)
    else:
        o_ref[0] = y


def _gram_acc_kernel(scale, a_ref, b_ref, g_ref, acc_ref):
    """G += A_tile @ B_tile^T over the HW reduction axis; scaled writeback at end.

    a_ref: (1, n, T) bf16    b_ref: (1, m, T) bf16
    g_ref: (1, n, m) f32     acc_ref: (n, m) f32 VMEM scratch accumulator
    """
    k = pl.program_id(1)

    @pl.when(k == 0)
    def _():
        acc_ref[...] = jnp.zeros_like(acc_ref)

    acc_ref[...] += lax.dot_general(
        a_ref[0], b_ref[0], (((1,), (1,)), ((), ())),
        preferred_element_type=jnp.float32)

    @pl.when(k == pl.num_programs(1) - 1)
    def _():
        g_ref[0] = (acc_ref[...] * scale).astype(g_ref.dtype)


# ----------------------------------------------------------------------------
# Wrappers (thin glue in plain JAX, hot path in Pallas)
# ----------------------------------------------------------------------------
def conv3x3_relu(x, w, b, *, padded_in=False, spatial=None, emit_padded=False):
    """PyTorch-equivalent Conv2d(kernel=3, stride=1, pad=1) + ReLU.

    x: (B, Cin, H, W)                   if padded_in=False
       (B, Cin, (H+4)*W) bf16 (flat)    if padded_in=True, spatial=(H, W)
    Returns bf16:
       (B, Cout, H, W)                  if emit_padded=False
       (B, Cout, (H+4)*W) (flat)        if emit_padded=True (directly consumable
                                        by the next conv3x3_relu, no XLA pad).
    """
    Cout, Cin = w.shape[0], w.shape[1]
    if padded_in:
        H, W = spatial
        B = x.shape[0]
        assert x.shape == (B, Cin, (H + 4) * W)
        xf = x
    else:
        B, _, H, W = x.shape
        # Pad 2 zero rows top/bottom and flatten rows; only needed for layers
        # whose producer is not one of these conv kernels (conv1, post-pool).
        xp = jnp.pad(x.astype(jnp.bfloat16), ((0, 0), (0, 0), (2, 2), (0, 0)))
        xf = xp.reshape(B, Cin, (H + 4) * W)

    # Pad input channels to a multiple of 8 (zeros contribute nothing) so the
    # stacked-K operand has clean sublane packing. Only triggers for conv1.
    if Cin % 8:
        pad_c = 8 - Cin % 8
        xf = jnp.pad(xf, ((0, 0), (0, pad_c), (0, 0)))
        w = jnp.pad(w, ((0, 0), (0, pad_c), (0, 0), (0, 0)))
        Cin += pad_c

    HW = H * W
    Lp = (H + 4) * W
    Lout = Lp if emit_padded else HW

    # Weights with the 9 taps stacked along K: w9[co, (dy*3+dx)*Cin + ci].
    w9 = jnp.transpose(w, (0, 2, 3, 1)).reshape(Cout, 9 * Cin).astype(jnp.bfloat16)
    b2 = b.reshape(Cout, 1).astype(jnp.float32)

    col = jnp.arange(HW, dtype=jnp.int32) % W
    masks = jnp.stack([col > 0, col < W - 1]).astype(jnp.bfloat16)    # (2, HW)

    # Cout split only when the batch alone cannot feed both v7x TensorCores.
    co_blk = Cout if (B >= 2 or Cout < 16) else Cout // 2
    n_co = Cout // co_blk

    flops = 2 * B * Cout * 9 * Cin * HW
    bytes_accessed = (xf.size * 2 + w9.size * 2 + b2.size * 4
                      + masks.size * 2 + B * Cout * Lout * 2)

    out = pl.pallas_call(
        functools.partial(_conv3x3_bias_relu_kernel, H, W, emit_padded),
        out_shape=jax.ShapeDtypeStruct((B, Cout, Lout), jnp.bfloat16),
        grid=(B, n_co),
        in_specs=[
            pl.BlockSpec((1, Cin, Lp), lambda i, j: (i, 0, 0)),
            pl.BlockSpec((co_blk, 9 * Cin), lambda i, j: (j, 0)),
            pl.BlockSpec((co_blk, 1), lambda i, j: (j, 0)),
            pl.BlockSpec((2, HW), lambda i, j: (0, 0)),
        ],
        out_specs=pl.BlockSpec((1, co_blk, Lout), lambda i, j: (i, j, 0)),
        compiler_params=pltpu.CompilerParams(
            dimension_semantics=("parallel", "parallel"),
            vmem_limit_bytes=_VMEM_LIMIT),
        cost_estimate=pl.CostEstimate(flops=flops, transcendentals=0,
                                      bytes_accessed=bytes_accessed),
    )(xf, w9, b2, masks)
    # TODO(synk): for large H*W, add a row-tiled grid axis with a halo (manual
    # make_async_copy on a pl.ANY input) so the per-step block stays inside
    # v7x's 64 MiB VMEM; at these shapes one batch element fits easily.
    if emit_padded:
        return out
    return out.reshape(B, Cout, H, W)


def maxpool2x2(x):
    # TODO(synk): fusing the 2x2/stride-2 max pool into the conv2 epilogue needs
    # lane-strided compaction; kept as a cheap XLA pass (fuses with conv3's pad).
    B, C, H, W = x.shape
    return x.reshape(B, C, H // 2, 2, W // 2, 2).max(axis=(3, 5))


def _gram_bmm(a, b, scale):
    """G[k] = a[k] @ b[k]^T * scale, tiled over the shared HW (reduction) axis."""
    B, n, hw = a.shape
    m = b.shape[1]

    # Generation-aware reduction tile; zero-pad hw (exact) if it doesn't divide.
    max_tile = 8192 if _VMEM_LIMIT >= 96 * 1024 * 1024 else 4096
    if hw <= max_tile:
        t_hw = hw
    else:
        t_hw = max_tile
        pad = (-hw) % t_hw
        if pad:
            a = jnp.pad(a, ((0, 0), (0, 0), (0, pad)))
            b = jnp.pad(b, ((0, 0), (0, 0), (0, pad)))
            hw += pad
    n_k = hw // t_hw

    flops = 2 * B * n * m * hw
    bytes_accessed = (a.size * a.dtype.itemsize + b.size * b.dtype.itemsize
                      + B * n * m * 4)

    # TODO(synk): when B == 1, split n across a leading parallel axis so both
    # v7x TensorCores stay busy.
    return pl.pallas_call(
        functools.partial(_gram_acc_kernel, scale),
        out_shape=jax.ShapeDtypeStruct((B, n, m), jnp.float32),
        grid=(B, n_k),
        in_specs=[
            pl.BlockSpec((1, n, t_hw), lambda i, k: (i, 0, k)),
            pl.BlockSpec((1, m, t_hw), lambda i, k: (i, 0, k)),
        ],
        out_specs=pl.BlockSpec((1, n, m), lambda i, k: (i, 0, 0)),
        scratch_shapes=[pltpu.VMEM((n, m), jnp.float32)],
        compiler_params=pltpu.CompilerParams(
            dimension_semantics=("parallel", "arbitrary"),
            vmem_limit_bytes=_VMEM_LIMIT),
        cost_estimate=pl.CostEstimate(flops=flops, transcendentals=0,
                                      bytes_accessed=bytes_accessed),
    )(a, b)


def create_gram_mat(f1, f2):
    """Pallas equivalent of create_Gram_mat.

    The reference's nearest-x2 upsample of f2 is never materialized: since
    sum_{y,x} f1[:,y,x]*f2[:,y//2,x//2] == sum_{Y,X} pool2sum(f1)[:,Y,X]*f2[:,Y,X],
    we 2x2-sum-pool f1 and contract at the lower resolution (4x less work).
    """
    B, n, H1, W1 = f1.shape
    m = f2.shape[1]
    # NOTE: mirrors the reference's exact (`and`) gating condition — a mismatch
    # in only one spatial dim intentionally falls through to the equal-shape
    # branch and trips the assert, exactly as the PyTorch code would.
    if f1.shape[2] != f2.shape[2] and f1.shape[3] != f2.shape[3]:
        assert f1.shape[0] == f2.shape[0]
        assert f1.shape[2] == 2 * f2.shape[2] and f1.shape[3] == 2 * f2.shape[3]
        h2, w2 = f2.shape[2], f2.shape[3]
        # 2x2 sum pool of f1 (f32 sums, emitted straight to bf16 in one pass).
        a = (f1.astype(jnp.float32)
               .reshape(B, n, h2, 2, w2, 2).sum(axis=(3, 5))
               .astype(jnp.bfloat16).reshape(B, n, h2 * w2))
    else:
        assert f1.shape[0] == f2.shape[0] and f1.shape[2:] == f2.shape[2:]
        a = f1.reshape(B, n, H1 * W1).astype(jnp.bfloat16)
    hw = f2.shape[2] * f2.shape[3]
    bmat = f2.reshape(B, m, hw).astype(jnp.bfloat16)
    # Divisor is h*w of F1, exactly as in the reference.
    return _gram_bmm(a, bmat, 1.0 / float(H1 * W1))


# ----------------------------------------------------------------------------
# VGG19 (gram_pyramid, stage=1) forward
# ----------------------------------------------------------------------------
def init_params(key):
    """Deterministic synthetic weights with the VGG19 features1/features2 shapes."""
    shapes = {
        "conv1_w": (64, 3, 3, 3),    "conv1_b": (64,),
        "conv2_w": (64, 64, 3, 3),   "conv2_b": (64,),
        "conv3_w": (128, 64, 3, 3),  "conv3_b": (128,),
        "conv4_w": (128, 128, 3, 3), "conv4_b": (128,),
    }
    params = {}
    for name, shape in shapes.items():
        key, sub = jax.random.split(key)
        scale = 0.05 if name.endswith("_w") else 0.01
        params[name] = scale * jax.random.normal(sub, shape, dtype=jnp.float32)
    return params


def vgg19_gram_pyramid_forward(params, x):
    """Forward of VGG19(Train_mode='GRAM_PYRAMID', Stage=1): returns the Gram matrix."""
    B, _, H, W = x.shape
    # features1: Conv(3->64)+ReLU — emitted in row-padded flat layout so conv2
    # consumes it with zero extra HBM passes.
    f1p = conv3x3_relu(x, params["conv1_w"], params["conv1_b"], emit_padded=True)
    # features2: Conv(64->64)+ReLU, MaxPool(2,2), Conv(64->128)+ReLU, Conv(128->128)+ReLU
    h = conv3x3_relu(f1p, params["conv2_w"], params["conv2_b"],
                     padded_in=True, spatial=(H, W))
    h = maxpool2x2(h)
    # TODO(synk): conv1+conv2 could be fused into one kernel keeping the 64-ch
    # intermediate in VMEM once the chain is HBM-bound at large resolutions.
    hp = conv3x3_relu(h, params["conv3_w"], params["conv3_b"], emit_padded=True)
    f2 = conv3x3_relu(hp, params["conv4_w"], params["conv4_b"],
                      padded_in=True, spatial=(H // 2, W // 2))
    # Unpadded view of f1 for the Gram (slice fuses into the Gram pooling pass).
    f1 = f1p[:, :, 2 * W: 2 * W + H * W].reshape(B, 64, H, W)
    # gram = create_Gram_mat(f1, f2)
    return create_gram_mat(f1, f2)


# ----------------------------------------------------------------------------
# Pure-JAX f32 reference (mirrors the PyTorch module) for validation.
# ----------------------------------------------------------------------------
def _reference_forward(params, x):
    def conv(h, w, b):
        y = lax.conv_general_dilated(
            h, w, window_strides=(1, 1), padding=((1, 1), (1, 1)),
            dimension_numbers=("NCHW", "OIHW", "NCHW"))
        return jnp.maximum(y + b[None, :, None, None], 0.0)

    f1 = conv(x, params["conv1_w"], params["conv1_b"])
    h = conv(f1, params["conv2_w"], params["conv2_b"])
    B, C, H, W = h.shape
    h = h.reshape(B, C, H // 2, 2, W // 2, 2).max(axis=(3, 5))
    h = conv(h, params["conv3_w"], params["conv3_b"])
    f2 = conv(h, params["conv4_w"], params["conv4_b"])
    f2u = jnp.repeat(jnp.repeat(f2, 2, axis=2), 2, axis=3)      # nearest x2
    Bq, n, Hq, Wq = f1.shape
    m = f2u.shape[1]
    g = jnp.einsum("bnp,bmp->bnm",
                   f1.reshape(Bq, n, Hq * Wq),
                   f2u.reshape(Bq, m, Hq * Wq))
    return g / (Hq * Wq)


if __name__ == "__main__":
    key = jax.random.PRNGKey(0)
    key, pkey, xkey = jax.random.split(key, 3)

    params = init_params(pkey)
    # Small NCHW input consistent with the module's expectations (RGB input).
    x = jax.random.normal(xkey, (2, 3, 16, 16), dtype=jnp.float32)

    gram = jax.jit(vgg19_gram_pyramid_forward)(params, x)
    gram = jax.block_until_ready(gram)

    assert gram.shape == (2, 64, 128), gram.shape
    assert gram.dtype == jnp.float32
    assert bool(jnp.isfinite(gram).all())

    # Validate against the f32 reference with a tolerance sized for the bf16
    # MXU operands used on the hot path.
    ref = jax.block_until_ready(jax.jit(_reference_forward)(params, x))
    max_err = float(jnp.max(jnp.abs(gram - ref)))
    tol = 0.08 * float(jnp.max(jnp.abs(ref))) + 1e-6
    assert max_err <= tol, (max_err, tol)

    print("KERNEL_OK")
</pallas_src>

<mosaic_0001>
module attributes {stable_mosaic.version = 11 : i64} {
  func.func @_conv3x3_bias_relu_kernel(%arg0: i32, %arg1: i32, %arg2: memref<1x8x320xbf16, #tpu.memory_space<vmem>>, %arg3: memref<64x72xbf16, #tpu.memory_space<vmem>>, %arg4: memref<64x1xf32, #tpu.memory_space<vmem>>, %arg5: memref<2x256xbf16, #tpu.memory_space<vmem>>, %arg6: memref<1x64x320xbf16, #tpu.memory_space<vmem>>) attributes {dimension_semantics = [#tpu.dimension_semantics<parallel>, #tpu.dimension_semantics<parallel>], iteration_bounds = array<i64: 2, 1>, scalar_prefetch = 0 : i64, scratch_operands = 0 : i64, tpu.core_type = #tpu.core_type<tc>, window_params = [{transform_indices = @transform_0, window_bounds = array<i64: 1, 8, 320>}, {transform_indices = @transform_1, window_bounds = array<i64: 64, 72>}, {transform_indices = @transform_2, window_bounds = array<i64: 64, 1>}, {pipeline_mode = #tpu.pipeline_mode<synchronous>, transform_indices = @transform_3, window_bounds = array<i64: 2, 256>}, {transform_indices = @transform_4, window_bounds = array<i64: 1, 64, 320>}]} {
    %c0 = arith.constant 0 : index
    %c0_0 = arith.constant 0 : index
    %c0_1 = arith.constant 0 : index
    %0 = vector.load %arg2[%c0, %c0_0, %c0_1] : memref<1x8x320xbf16, #tpu.memory_space<vmem>>, vector<1x8x320xbf16>
    %1 = vector.shape_cast %0 : vector<1x8x320xbf16> to vector<8x320xbf16>
    %c0_2 = arith.constant 0 : index
    %c0_3 = arith.constant 0 : index
    %2 = vector.load %arg5[%c0_2, %c0_3] : memref<2x256xbf16, #tpu.memory_space<vmem>>, vector<1x256xbf16>
    %c1 = arith.constant 1 : index
    %c0_4 = arith.constant 0 : index
    %3 = vector.load %arg5[%c1, %c0_4] : memref<2x256xbf16, #tpu.memory_space<vmem>>, vector<1x256xbf16>
    %4 = vector.extract_strided_slice %1 {offsets = [0, 15], sizes = [8, 256], strides = [1, 1]} : vector<8x320xbf16> to vector<8x256xbf16>
    %5 = vector.broadcast %2 : vector<1x256xbf16> to vector<8x256xbf16>
    %6 = arith.mulf %4, %5 : vector<8x256xbf16>
    %7 = vector.extract_strided_slice %1 {offsets = [0, 16], sizes = [8, 256], strides = [1, 1]} : vector<8x320xbf16> to vector<8x256xbf16>
    %8 = vector.extract_strided_slice %1 {offsets = [0, 17], sizes = [8, 256], strides = [1, 1]} : vector<8x320xbf16> to vector<8x256xbf16>
    %9 = vector.broadcast %3 : vector<1x256xbf16> to vector<8x256xbf16>
    %10 = arith.mulf %8, %9 : vector<8x256xbf16>
    %11 = vector.extract_strided_slice %1 {offsets = [0, 31], sizes = [8, 256], strides = [1, 1]} : vector<8x320xbf16> to vector<8x256xbf16>
    %12 = vector.broadcast %2 : vector<1x256xbf16> to vector<8x256xbf16>
    %13 = arith.mulf %11, %12 : vector<8x256xbf16>
    %14 = vector.extract_strided_slice %1 {offsets = [0, 32], sizes = [8, 256], strides = [1, 1]} : vector<8x320xbf16> to vector<8x256xbf16>
    %15 = vector.extract_strided_slice %1 {offsets = [0, 33], sizes = [8, 256], strides = [1, 1]} : vector<8x320xbf16> to vector<8x256xbf16>
    %16 = vector.broadcast %3 : vector<1x256xbf16> to vector<8x256xbf16>
    %17 = arith.mulf %15, %16 : vector<8x256xbf16>
    %18 = vector.extract_strided_slice %1 {offsets = [0, 47], sizes = [8, 256], strides = [1, 1]} : vector<8x320xbf16> to vector<8x256xbf16>
    %19 = vector.broadcast %2 : vector<1x256xbf16> to vector<8x256xbf16>
    %20 = arith.mulf %18, %19 : vector<8x256xbf16>
    %21 = vector.extract_strided_slice %1 {offsets = [0, 48], sizes = [8, 256], strides = [1, 1]} : vector<8x320xbf16> to vector<8x256xbf16>
    %22 = vector.extract_strided_slice %1 {offsets = [0, 49], sizes = [8, 256], strides = [1, 1]} : vector<8x320xbf16> to vector<8x256xbf16>
    %23 = vector.broadcast %3 : vector<1x256xbf16> to vector<8x256xbf16>
    %24 = arith.mulf %22, %23 : vector<8x256xbf16>
    %25 = tpu.concatenate %6, %7, %10, %13, %14, %17, %20, %21, %24 in 0 : vector<8x256xbf16>, vector<8x256xbf16>, vector<8x256xbf16>, vector<8x256xbf16>, vector<8x256xbf16>, vector<8x256xbf16>, vector<8x256xbf16>, vector<8x256xbf16>, vector<8x256xbf16> -> vector<72x256xbf16>
    %c0_5 = arith.constant 0 : index
    %c0_6 = arith.constant 0 : index
    %26 = vector.load %arg3[%c0_5, %c0_6] : memref<64x72xbf16, #tpu.memory_space<vmem>>, vector<64x72xbf16>
    %cst = arith.constant dense<0.000000e+00> : vector<64x256xf32>
    %27 = tpu.matmul %26, %25, %cst {dimension_numbers = #tpu.dot_dimension_numbers<[1], [0], [0], [1], [0, 0, 1, 1], [], []>} : vector<64x72xbf16>, vector<72x256xbf16>, vector<64x256xf32> -> vector<64x256xf32>
    %c0_7 = arith.constant 0 : index
    %c0_8 = arith.constant 0 : index
    %28 = vector.load %arg4[%c0_7, %c0_8] : memref<64x1xf32, #tpu.memory_space<vmem>>, vector<64x1xf32>
    %29 = vector.broadcast %28 : vector<64x1xf32> to vector<64x256xf32>
    %30 = arith.addf %27, %29 : vector<64x256xf32>
    %cst_9 = arith.constant 0.000000e+00 : f32
    %31 = vector.broadcast %cst_9 : f32 to vector<64x256xf32>
    %32 = arith.maximumf %30, %31 : vector<64x256xf32>
    %33 = arith.truncf %32 : vector<64x256xf32> to vector<64x256xbf16>
    %cst_10 = arith.constant 0.000000e+00 : bf16
    %34 = vector.broadcast %cst_10 : bf16 to vector<64x32xbf16>
    %35 = tpu.concatenate %34, %33, %34 in 1 : vector<64x32xbf16>, vector<64x256xbf16>, vector<64x32xbf16> -> vector<64x320xbf16>
    %c0_11 = arith.constant 0 : index
    %c0_12 = arith.constant 0 : index
    %c0_13 = arith.constant 0 : index
    %36 = vector.load %arg6[%c0_11, %c0_12, %c0_13] : memref<1x64x320xbf16, #tpu.memory_space<vmem>>, vector<1x64x320xbf16>
    %37 = vector.shape_cast %36 : vector<1x64x320xbf16> to vector<64x320xbf16>
    %38 = vector.shape_cast %35 : vector<64x320xbf16> to vector<1x64x320xbf16>
    tpu.vector_store %arg6[%c0_11, %c0_12, %c0_13], %38 {strides = array<i32>} : memref<1x64x320xbf16, #tpu.memory_space<vmem>>, vector<1x64x320xbf16>,
    return
  }
  func.func @transform_0(%arg0: i32, %arg1: i32) -> (i32, i32, i32) {
    %c0_i32 = arith.constant 0 : i32
    %c0_i32_0 = arith.constant 0 : i32
    %c0_i32_1 = arith.constant 0 : i32
    return %arg0, %c0_i32, %c0_i32_0 : i32, i32, i32
  }
  func.func @transform_1(%arg0: i32, %arg1: i32) -> (i32, i32) {
    %c0_i32 = arith.constant 0 : i32
    %c0_i32_0 = arith.constant 0 : i32
    return %arg1, %c0_i32 : i32, i32
  }
  func.func @transform_2(%arg0: i32, %arg1: i32) -> (i32, i32) {
    %c0_i32 = arith.constant 0 : i32
    %c0_i32_0 = arith.constant 0 : i32
    return %arg1, %c0_i32 : i32, i32
  }
  func.func @transform_3(%arg0: i32, %arg1: i32) -> (i32, i32) {
    %c0_i32 = arith.constant 0 : i32
    %c0_i32_0 = arith.constant 0 : i32
    %c0_i32_1 = arith.constant 0 : i32
    return %c0_i32, %c0_i32_0 : i32, i32
  }
  func.func @transform_4(%arg0: i32, %arg1: i32) -> (i32, i32, i32) {
    %c0_i32 = arith.constant 0 : i32
    %c0_i32_0 = arith.constant 0 : i32
    return %arg0, %arg1, %c0_i32 : i32, i32, i32
  }
}

module attributes {stable_mosaic.version = 11 : i64} {
  func.func @_conv3x3_bias_relu_kernel(%arg0: i32, %arg1: i32, %arg2: memref<1x64x320xbf16, #tpu.memory_space<vmem>>, %arg3: memref<64x576xbf16, #tpu.memory_space<vmem>>, %arg4: memref<64x1xf32, #tpu.memory_space<vmem>>, %arg5: memref<2x256xbf16, #tpu.memory_space<vmem>>, %arg6: memref<1x64x256xbf16, #tpu.memory_space<vmem>>) attributes {dimension_semantics = [#tpu.dimension_semantics<parallel>, #tpu.dimension_semantics<parallel>], iteration_bounds = array<i64: 2, 1>, scalar_prefetch = 0 : i64, scratch_operands = 0 : i64, tpu.core_type = #tpu.core_type<tc>, window_params = [{transform_indices = @transform_0, window_bounds = array<i64: 1, 64, 320>}, {transform_indices = @transform_1, window_bounds = array<i64: 64, 576>}, {transform_indices = @transform_2, window_bounds = array<i64: 64, 1>}, {pipeline_mode = #tpu.pipeline_mode<synchronous>, transform_indices = @transform_3, window_bounds = array<i64: 2, 256>}, {transform_indices = @transform_4, window_bounds = array<i64: 1, 64, 256>}]} {
    %c0 = arith.constant 0 : index
    %c0_0 = arith.constant 0 : index
    %c0_1 = arith.constant 0 : index
    %0 = vector.load %arg2[%c0, %c0_0, %c0_1] : memref<1x64x320xbf16, #tpu.memory_space<vmem>>, vector<1x64x320xbf16>
    %1 = vector.shape_cast %0 : vector<1x64x320xbf16> to vector<64x320xbf16>
    %c0_2 = arith.constant 0 : index
    %c0_3 = arith.constant 0 : index
    %2 = vector.load %arg5[%c0_2, %c0_3] : memref<2x256xbf16, #tpu.memory_space<vmem>>, vector<1x256xbf16>
    %c1 = arith.constant 1 : index
    %c0_4 = arith.constant 0 : index
    %3 = vector.load %arg5[%c1, %c0_4] : memref<2x256xbf16, #tpu.memory_space<vmem>>, vector<1x256xbf16>
    %4 = vector.extract_strided_slice %1 {offsets = [0, 15], sizes = [64, 256], strides = [1, 1]} : vector<64x320xbf16> to vector<64x256xbf16>
    %5 = vector.broadcast %2 : vector<1x256xbf16> to vector<64x256xbf16>
    %6 = arith.mulf %4, %5 : vector<64x256xbf16>
    %7 = vector.extract_strided_slice %1 {offsets = [0, 16], sizes = [64, 256], strides = [1, 1]} : vector<64x320xbf16> to vector<64x256xbf16>
    %8 = vector.extract_strided_slice %1 {offsets = [0, 17], sizes = [64, 256], strides = [1, 1]} : vector<64x320xbf16> to vector<64x256xbf16>
    %9 = vector.broadcast %3 : vector<1x256xbf16> to vector<64x256xbf16>
    %10 = arith.mulf %8, %9 : vector<64x256xbf16>
    %11 = vector.extract_strided_slice %1 {offsets = [0, 31], sizes = [64, 256], strides = [1, 1]} : vector<64x320xbf16> to vector<64x256xbf16>
    %12 = vector.broadcast %2 : vector<1x256xbf16> to vector<64x256xbf16>
    %13 = arith.mulf %11, %12 : vector<64x256xbf16>
    %14 = vector.extract_strided_slice %1 {offsets = [0, 32], sizes = [64, 256], strides = [1, 1]} : vector<64x320xbf16> to vector<64x256xbf16>
    %15 = vector.extract_strided_slice %1 {offsets = [0, 33], sizes = [64, 256], strides = [1, 1]} : vector<64x320xbf16> to vector<64x256xbf16>
    %16 = vector.broadcast %3 : vector<1x256xbf16> to vector<64x256xbf16>
    %17 = arith.mulf %15, %16 : vector<64x256xbf16>
    %18 = vector.extract_strided_slice %1 {offsets = [0, 47], sizes = [64, 256], strides = [1, 1]} : vector<64x320xbf16> to vector<64x256xbf16>
    %19 = vector.broadcast %2 : vector<1x256xbf16> to vector<64x256xbf16>
    %20 = arith.mulf %18, %19 : vector<64x256xbf16>
    %21 = vector.extract_strided_slice %1 {offsets = [0, 48], sizes = [64, 256], strides = [1, 1]} : vector<64x320xbf16> to vector<64x256xbf16>
    %22 = vector.extract_strided_slice %1 {offsets = [0, 49], sizes = [64, 256], strides = [1, 1]} : vector<64x320xbf16> to vector<64x256xbf16>
    %23 = vector.broadcast %3 : vector<1x256xbf16> to vector<64x256xbf16>
    %24 = arith.mulf %22, %23 : vector<64x256xbf16>
    %25 = tpu.concatenate %6, %7, %10, %13, %14, %17, %20, %21, %24 in 0 : vector<64x256xbf16>, vector<64x256xbf16>, vector<64x256xbf16>, vector<64x256xbf16>, vector<64x256xbf16>, vector<64x256xbf16>, vector<64x256xbf16>, vector<64x256xbf16>, vector<64x256xbf16> -> vector<576x256xbf16>
    %c0_5 = arith.constant 0 : index
    %c0_6 = arith.constant 0 : index
    %26 = vector.load %arg3[%c0_5, %c0_6] : memref<64x576xbf16, #tpu.memory_space<vmem>>, vector<64x576xbf16>
    %cst = arith.constant dense<0.000000e+00> : vector<64x256xf32>
    %27 = tpu.matmul %26, %25, %cst {dimension_numbers = #tpu.dot_dimension_numbers<[1], [0], [0], [1], [0, 0, 1, 1], [], []>} : vector<64x576xbf16>, vector<576x256xbf16>, vector<64x256xf32> -> vector<64x256xf32>
    %c0_7 = arith.constant 0 : index
    %c0_8 = arith.constant 0 : index
    %28 = vector.load %arg4[%c0_7, %c0_8] : memref<64x1xf32, #tpu.memory_space<vmem>>, vector<64x1xf32>
    %29 = vector.broadcast %28 : vector<64x1xf32> to vector<64x256xf32>
    %30 = arith.addf %27, %29 : vector<64x256xf32>
    %cst_9 = arith.constant 0.000000e+00 : f32
    %31 = vector.broadcast %cst_9 : f32 to vector<64x256xf32>
    %32 = arith.maximumf %30, %31 : vector<64x256xf32>
    %33 = arith.truncf %32 : vector<64x256xf32> to vector<64x256xbf16>
    %c0_10 = arith.constant 0 : index
    %c0_11 = arith.constant 0 : index
    %c0_12 = arith.constant 0 : index
    %34 = vector.load %arg6[%c0_10, %c0_11, %c0_12] : memref<1x64x256xbf16, #tpu.memory_space<vmem>>, vector<1x64x256xbf16>
    %35 = vector.shape_cast %34 : vector<1x64x256xbf16> to vector<64x256xbf16>
    %36 = vector.shape_cast %33 : vector<64x256xbf16> to vector<1x64x256xbf16>
    tpu.vector_store %arg6[%c0_10, %c0_11, %c0_12], %36 {strides = array<i32>} : memref<1x64x256xbf16, #tpu.memory_space<vmem>>, vector<1x64x256xbf16>,
    return
  }
  func.func @transform_0(%arg0: i32, %arg1: i32) -> (i32, i32, i32) {
    %c0_i32 = arith.constant 0 : i32
    %c0_i32_0 = arith.constant 0 : i32
    %c0_i32_1 = arith.constant 0 : i32
    return %arg0, %c0_i32, %c0_i32_0 : i32, i32, i32
  }
  func.func @transform_1(%arg0: i32, %arg1: i32) -> (i32, i32) {
    %c0_i32 = arith.constant 0 : i32
    %c0_i32_0 = arith.constant 0 : i32
    return %arg1, %c0_i32 : i32, i32
  }
  func.func @transform_2(%arg0: i32, %arg1: i32) -> (i32, i32) {
    %c0_i32 = arith.constant 0 : i32
    %c0_i32_0 = arith.constant 0 : i32
    return %arg1, %c0_i32 : i32, i32
  }
  func.func @transform_3(%arg0: i32, %arg1: i32) -> (i32, i32) {
    %c0_i32 = arith.constant 0 : i32
    %c0_i32_0 = arith.constant 0 : i32
    %c0_i32_1 = arith.constant 0 : i32
    return %c0_i32, %c0_i32_0 : i32, i32
  }
  func.func @transform_4(%arg0: i32, %arg1: i32) -> (i32, i32, i32) {
    %c0_i32 = arith.constant 0 : i32
    %c0_i32_0 = arith.constant 0 : i32
    return %arg0, %arg1, %c0_i32 : i32, i32, i32
  }
}

module attributes {stable_mosaic.version = 11 : i64} {
  func.func @_conv3x3_bias_relu_kernel(%arg0: i32, %arg1: i32, %arg2: memref<1x64x96xbf16, #tpu.memory_space<vmem>>, %arg3: memref<128x576xbf16, #tpu.memory_space<vmem>>, %arg4: memref<128x1xf32, #tpu.memory_space<vmem>>, %arg5: memref<2x64xbf16, #tpu.memory_space<vmem>>, %arg6: memref<1x128x96xbf16, #tpu.memory_space<vmem>>) attributes {dimension_semantics = [#tpu.dimension_semantics<parallel>, #tpu.dimension_semantics<parallel>], iteration_bounds = array<i64: 2, 1>, scalar_prefetch = 0 : i64, scratch_operands = 0 : i64, tpu.core_type = #tpu.core_type<tc>, window_params = [{transform_indices = @transform_0, window_bounds = array<i64: 1, 64, 96>}, {transform_indices = @transform_1, window_bounds = array<i64: 128, 576>}, {transform_indices = @transform_2, window_bounds = array<i64: 128, 1>}, {pipeline_mode = #tpu.pipeline_mode<synchronous>, transform_indices = @transform_3, window_bounds = array<i64: 2, 64>}, {transform_indices = @transform_4, window_bounds = array<i64: 1, 128, 96>}]} {
    %c0 = arith.constant 0 : index
    %c0_0 = arith.constant 0 : index
    %c0_1 = arith.constant 0 : index
    %0 = vector.load %arg2[%c0, %c0_0, %c0_1] : memref<1x64x96xbf16, #tpu.memory_space<vmem>>, vector<1x64x96xbf16>
    %1 = vector.shape_cast %0 : vector<1x64x96xbf16> to vector<64x96xbf16>
    %c0_2 = arith.constant 0 : index
    %c0_3 = arith.constant 0 : index
    %2 = vector.load %arg5[%c0_2, %c0_3] : memref<2x64xbf16, #tpu.memory_space<vmem>>, vector<1x64xbf16>
    %c1 = arith.constant 1 : index
    %c0_4 = arith.constant 0 : index
    %3 = vector.load %arg5[%c1, %c0_4] : memref<2x64xbf16, #tpu.memory_space<vmem>>, vector<1x64xbf16>
    %4 = vector.extract_strided_slice %1 {offsets = [0, 7], sizes = [64, 64], strides = [1, 1]} : vector<64x96xbf16> to vector<64x64xbf16>
    %5 = vector.broadcast %2 : vector<1x64xbf16> to vector<64x64xbf16>
    %6 = arith.mulf %4, %5 : vector<64x64xbf16>
    %7 = vector.extract_strided_slice %1 {offsets = [0, 8], sizes = [64, 64], strides = [1, 1]} : vector<64x96xbf16> to vector<64x64xbf16>
    %8 = vector.extract_strided_slice %1 {offsets = [0, 9], sizes = [64, 64], strides = [1, 1]} : vector<64x96xbf16> to vector<64x64xbf16>
    %9 = vector.broadcast %3 : vector<1x64xbf16> to vector<64x64xbf16>
    %10 = arith.mulf %8, %9 : vector<64x64xbf16>
    %11 = vector.extract_strided_slice %1 {offsets = [0, 15], sizes = [64, 64], strides = [1, 1]} : vector<64x96xbf16> to vector<64x64xbf16>
    %12 = vector.broadcast %2 : vector<1x64xbf16> to vector<64x64xbf16>
    %13 = arith.mulf %11, %12 : vector<64x64xbf16>
    %14 = vector.extract_strided_slice %1 {offsets = [0, 16], sizes = [64, 64], strides = [1, 1]} : vector<64x96xbf16> to vector<64x64xbf16>
    %15 = vector.extract_strided_slice %1 {offsets = [0, 17], sizes = [64, 64], strides = [1, 1]} : vector<64x96xbf16> to vector<64x64xbf16>
    %16 = vector.broadcast %3 : vector<1x64xbf16> to vector<64x64xbf16>
    %17 = arith.mulf %15, %16 : vector<64x64xbf16>
    %18 = vector.extract_strided_slice %1 {offsets = [0, 23], sizes = [64, 64], strides = [1, 1]} : vector<64x96xbf16> to vector<64x64xbf16>
    %19 = vector.broadcast %2 : vector<1x64xbf16> to vector<64x64xbf16>
    %20 = arith.mulf %18, %19 : vector<64x64xbf16>
    %21 = vector.extract_strided_slice %1 {offsets = [0, 24], sizes = [64, 64], strides = [1, 1]} : vector<64x96xbf16> to vector<64x64xbf16>
    %22 = vector.extract_strided_slice %1 {offsets = [0, 25], sizes = [64, 64], strides = [1, 1]} : vector<64x96xbf16> to vector<64x64xbf16>
    %23 = vector.broadcast %3 : vector<1x64xbf16> to vector<64x64xbf16>
    %24 = arith.mulf %22, %23 : vector<64x64xbf16>
    %25 = tpu.concatenate %6, %7, %10, %13, %14, %17, %20, %21, %24 in 0 : vector<64x64xbf16>, vector<64x64xbf16>, vector<64x64xbf16>, vector<64x64xbf16>, vector<64x64xbf16>, vector<64x64xbf16>, vector<64x64xbf16>, vector<64x64xbf16>, vector<64x64xbf16> -> vector<576x64xbf16>
    %c0_5 = arith.constant 0 : index
    %c0_6 = arith.constant 0 : index
    %26 = vector.load %arg3[%c0_5, %c0_6] : memref<128x576xbf16, #tpu.memory_space<vmem>>, vector<128x576xbf16>
    %cst = arith.constant dense<0.000000e+00> : vector<128x64xf32>
    %27 = tpu.matmul %26, %25, %cst {dimension_numbers = #tpu.dot_dimension_numbers<[1], [0], [0], [1], [0, 0, 1, 1], [], []>} : vector<128x576xbf16>, vector<576x64xbf16>, vector<128x64xf32> -> vector<128x64xf32>
    %c0_7 = arith.constant 0 : index
    %c0_8 = arith.constant 0 : index
    %28 = vector.load %arg4[%c0_7, %c0_8] : memref<128x1xf32, #tpu.memory_space<vmem>>, vector<128x1xf32>
    %29 = vector.broadcast %28 : vector<128x1xf32> to vector<128x64xf32>
    %30 = arith.addf %27, %29 : vector<128x64xf32>
    %cst_9 = arith.constant 0.000000e+00 : f32
    %31 = vector.broadcast %cst_9 : f32 to vector<128x64xf32>
    %32 = arith.maximumf %30, %31 : vector<128x64xf32>
    %33 = arith.truncf %32 : vector<128x64xf32> to vector<128x64xbf16>
    %cst_10 = arith.constant 0.000000e+00 : bf16
    %34 = vector.broadcast %cst_10 : bf16 to vector<128x16xbf16>
    %35 = tpu.concatenate %34, %33, %34 in 1 : vector<128x16xbf16>, vector<128x64xbf16>, vector<128x16xbf16> -> vector<128x96xbf16>
    %c0_11 = arith.constant 0 : index
    %c0_12 = arith.constant 0 : index
    %c0_13 = arith.constant 0 : index
    %36 = vector.load %arg6[%c0_11, %c0_12, %c0_13] : memref<1x128x96xbf16, #tpu.memory_space<vmem>>, vector<1x128x96xbf16>
    %37 = vector.shape_cast %36 : vector<1x128x96xbf16> to vector<128x96xbf16>
    %38 = vector.shape_cast %35 : vector<128x96xbf16> to vector<1x128x96xbf16>
    tpu.vector_store %arg6[%c0_11, %c0_12, %c0_13], %38 {strides = array<i32>} : memref<1x128x96xbf16, #tpu.memory_space<vmem>>, vector<1x128x96xbf16>,
    return
  }
  func.func @transform_0(%arg0: i32, %arg1: i32) -> (i32, i32, i32) {
    %c0_i32 = arith.constant 0 : i32
    %c0_i32_0 = arith.constant 0 : i32
    %c0_i32_1 = arith.constant 0 : i32
    return %arg0, %c0_i32, %c0_i32_0 : i32, i32, i32
  }
  func.func @transform_1(%arg0: i32, %arg1: i32) -> (i32, i32) {
    %c0_i32 = arith.constant 0 : i32
    %c0_i32_0 = arith.constant 0 : i32
    return %arg1, %c0_i32 : i32, i32
  }
  func.func @transform_2(%arg0: i32, %arg1: i32) -> (i32, i32) {
    %c0_i32 = arith.constant 0 : i32
    %c0_i32_0 = arith.constant 0 : i32
    return %arg1, %c0_i32 : i32, i32
  }
  func.func @transform_3(%arg0: i32, %arg1: i32) -> (i32, i32) {
    %c0_i32 = arith.constant 0 : i32
    %c0_i32_0 = arith.constant 0 : i32
    %c0_i32_1 = arith.constant 0 : i32
    return %c0_i32, %c0_i32_0 : i32, i32
  }
  func.func @transform_4(%arg0: i32, %arg1: i32) -> (i32, i32, i32) {
    %c0_i32 = arith.constant 0 : i32
    %c0_i32_0 = arith.constant 0 : i32
    return %arg0, %arg1, %c0_i32 : i32, i32, i32
  }
}

module attributes {stable_mosaic.version = 11 : i64} {
  func.func @_conv3x3_bias_relu_kernel(%arg0: i32, %arg1: i32, %arg2: memref<1x128x96xbf16, #tpu.memory_space<vmem>>, %arg3: memref<128x1152xbf16, #tpu.memory_space<vmem>>, %arg4: memref<128x1xf32, #tpu.memory_space<vmem>>, %arg5: memref<2x64xbf16, #tpu.memory_space<vmem>>, %arg6: memref<1x128x64xbf16, #tpu.memory_space<vmem>>) attributes {dimension_semantics = [#tpu.dimension_semantics<parallel>, #tpu.dimension_semantics<parallel>], iteration_bounds = array<i64: 2, 1>, scalar_prefetch = 0 : i64, scratch_operands = 0 : i64, tpu.core_type = #tpu.core_type<tc>, window_params = [{transform_indices = @transform_0, window_bounds = array<i64: 1, 128, 96>}, {transform_indices = @transform_1, window_bounds = array<i64: 128, 1152>}, {transform_indices = @transform_2, window_bounds = array<i64: 128, 1>}, {pipeline_mode = #tpu.pipeline_mode<synchronous>, transform_indices = @transform_3, window_bounds = array<i64: 2, 64>}, {transform_indices = @transform_4, window_bounds = array<i64: 1, 128, 64>}]} {
    %c0 = arith.constant 0 : index
    %c0_0 = arith.constant 0 : index
    %c0_1 = arith.constant 0 : index
    %0 = vector.load %arg2[%c0, %c0_0, %c0_1] : memref<1x128x96xbf16, #tpu.memory_space<vmem>>, vector<1x128x96xbf16>
    %1 = vector.shape_cast %0 : vector<1x128x96xbf16> to vector<128x96xbf16>
    %c0_2 = arith.constant 0 : index
    %c0_3 = arith.constant 0 : index
    %2 = vector.load %arg5[%c0_2, %c0_3] : memref<2x64xbf16, #tpu.memory_space<vmem>>, vector<1x64xbf16>
    %c1 = arith.constant 1 : index
    %c0_4 = arith.constant 0 : index
    %3 = vector.load %arg5[%c1, %c0_4] : memref<2x64xbf16, #tpu.memory_space<vmem>>, vector<1x64xbf16>
    %4 = vector.extract_strided_slice %1 {offsets = [0, 7], sizes = [128, 64], strides = [1, 1]} : vector<128x96xbf16> to vector<128x64xbf16>
    %5 = vector.broadcast %2 : vector<1x64xbf16> to vector<128x64xbf16>
    %6 = arith.mulf %4, %5 : vector<128x64xbf16>
    %7 = vector.extract_strided_slice %1 {offsets = [0, 8], sizes = [128, 64], strides = [1, 1]} : vector<128x96xbf16> to vector<128x64xbf16>
    %8 = vector.extract_strided_slice %1 {offsets = [0, 9], sizes = [128, 64], strides = [1, 1]} : vector<128x96xbf16> to vector<128x64xbf16>
    %9 = vector.broadcast %3 : vector<1x64xbf16> to vector<128x64xbf16>
    %10 = arith.mulf %8, %9 : vector<128x64xbf16>
    %11 = vector.extract_strided_slice %1 {offsets = [0, 15], sizes = [128, 64], strides = [1, 1]} : vector<128x96xbf16> to vector<128x64xbf16>
    %12 = vector.broadcast %2 : vector<1x64xbf16> to vector<128x64xbf16>
    %13 = arith.mulf %11, %12 : vector<128x64xbf16>
    %14 = vector.extract_strided_slice %1 {offsets = [0, 16], sizes = [128, 64], strides = [1, 1]} : vector<128x96xbf16> to vector<128x64xbf16>
    %15 = vector.extract_strided_slice %1 {offsets = [0, 17], sizes = [128, 64], strides = [1, 1]} : vector<128x96xbf16> to vector<128x64xbf16>
    %16 = vector.broadcast %3 : vector<1x64xbf16> to vector<128x64xbf16>
    %17 = arith.mulf %15, %16 : vector<128x64xbf16>
    %18 = vector.extract_strided_slice %1 {offsets = [0, 23], sizes = [128, 64], strides = [1, 1]} : vector<128x96xbf16> to vector<128x64xbf16>
    %19 = vector.broadcast %2 : vector<1x64xbf16> to vector<128x64xbf16>
    %20 = arith.mulf %18, %19 : vector<128x64xbf16>
    %21 = vector.extract_strided_slice %1 {offsets = [0, 24], sizes = [128, 64], strides = [1, 1]} : vector<128x96xbf16> to vector<128x64xbf16>
    %22 = vector.extract_strided_slice %1 {offsets = [0, 25], sizes = [128, 64], strides = [1, 1]} : vector<128x96xbf16> to vector<128x64xbf16>
    %23 = vector.broadcast %3 : vector<1x64xbf16> to vector<128x64xbf16>
    %24 = arith.mulf %22, %23 : vector<128x64xbf16>
    %25 = tpu.concatenate %6, %7, %10, %13, %14, %17, %20, %21, %24 in 0 : vector<128x64xbf16>, vector<128x64xbf16>, vector<128x64xbf16>, vector<128x64xbf16>, vector<128x64xbf16>, vector<128x64xbf16>, vector<128x64xbf16>, vector<128x64xbf16>, vector<128x64xbf16> -> vector<1152x64xbf16>
    %c0_5 = arith.constant 0 : index
    %c0_6 = arith.constant 0 : index
    %26 = vector.load %arg3[%c0_5, %c0_6] : memref<128x1152xbf16, #tpu.memory_space<vmem>>, vector<128x1152xbf16>
    %cst = arith.constant dense<0.000000e+00> : vector<128x64xf32>
    %27 = tpu.matmul %26, %25, %cst {dimension_numbers = #tpu.dot_dimension_numbers<[1], [0], [0], [1], [0, 0, 1, 1], [], []>} : vector<128x1152xbf16>, vector<1152x64xbf16>, vector<128x64xf32> -> vector<128x64xf32>
    %c0_7 = arith.constant 0 : index
    %c0_8 = arith.constant 0 : index
    %28 = vector.load %arg4[%c0_7, %c0_8] : memref<128x1xf32, #tpu.memory_space<vmem>>, vector<128x1xf32>
    %29 = vector.broadcast %28 : vector<128x1xf32> to vector<128x64xf32>
    %30 = arith.addf %27, %29 : vector<128x64xf32>
    %cst_9 = arith.constant 0.000000e+00 : f32
    %31 = vector.broadcast %cst_9 : f32 to vector<128x64xf32>
    %32 = arith.maximumf %30, %31 : vector<128x64xf32>
    %33 = arith.truncf %32 : vector<128x64xf32> to vector<128x64xbf16>
    %c0_10 = arith.constant 0 : index
    %c0_11 = arith.constant 0 : index
    %c0_12 = arith.constant 0 : index
    %34 = vector.load %arg6[%c0_10, %c0_11, %c0_12] : memref<1x128x64xbf16, #tpu.memory_space<vmem>>, vector<1x128x64xbf16>
    %35 = vector.shape_cast %34 : vector<1x128x64xbf16> to vector<128x64xbf16>
    %36 = vector.shape_cast %33 : vector<128x64xbf16> to vector<1x128x64xbf16>
    tpu.vector_store %arg6[%c0_10, %c0_11, %c0_12], %36 {strides = array<i32>} : memref<1x128x64xbf16, #tpu.memory_space<vmem>>, vector<1x128x64xbf16>,
    return
  }
  func.func @transform_0(%arg0: i32, %arg1: i32) -> (i32, i32, i32) {
    %c0_i32 = arith.constant 0 : i32
    %c0_i32_0 = arith.constant 0 : i32
    %c0_i32_1 = arith.constant 0 : i32
    return %arg0, %c0_i32, %c0_i32_0 : i32, i32, i32
  }
  func.func @transform_1(%arg0: i32, %arg1: i32) -> (i32, i32) {
    %c0_i32 = arith.constant 0 : i32
    %c0_i32_0 = arith.constant 0 : i32
    return %arg1, %c0_i32 : i32, i32
  }
  func.func @transform_2(%arg0: i32, %arg1: i32) -> (i32, i32) {
    %c0_i32 = arith.constant 0 : i32
    %c0_i32_0 = arith.constant 0 : i32
    return %arg1, %c0_i32 : i32, i32
  }
  func.func @transform_3(%arg0: i32, %arg1: i32) -> (i32, i32) {
    %c0_i32 = arith.constant 0 : i32
    %c0_i32_0 = arith.constant 0 : i32
    %c0_i32_1 = arith.constant 0 : i32
    return %c0_i32, %c0_i32_0 : i32, i32
  }
  func.func @transform_4(%arg0: i32, %arg1: i32) -> (i32, i32, i32) {
    %c0_i32 = arith.constant 0 : i32
    %c0_i32_0 = arith.constant 0 : i32
    return %arg0, %arg1, %c0_i32 : i32, i32, i32
  }
}

module attributes {stable_mosaic.version = 11 : i64} {
  func.func @_gram_acc_kernel(%arg0: i32, %arg1: i32, %arg2: memref<1x64x64xbf16, #tpu.memory_space<vmem>>, %arg3: memref<1x128x64xbf16, #tpu.memory_space<vmem>>, %arg4: memref<1x64x128xf32, #tpu.memory_space<vmem>>, %arg5: memref<64x128xf32, #tpu.memory_space<vmem>>) attributes {dimension_semantics = [#tpu.dimension_semantics<parallel>, #tpu.dimension_semantics<arbitrary>], iteration_bounds = array<i64: 2, 1>, scalar_prefetch = 0 : i64, scratch_operands = 1 : i64, tpu.core_type = #tpu.core_type<tc>, window_params = [{transform_indices = @transform_0, window_bounds = array<i64: 1, 64, 64>}, {transform_indices = @transform_1, window_bounds = array<i64: 1, 128, 64>}, {transform_indices = @transform_2, window_bounds = array<i64: 1, 64, 128>}]} {
    %c0_i32 = arith.constant 0 : i32
    %0 = arith.cmpi eq, %arg1, %c0_i32 : i32
    %1 = arith.extui %0 : i1 to i32
    %c0_i32_0 = arith.constant 0 : i32
    %2 = arith.cmpi ne, %1, %c0_i32_0 : i32
    scf.if %2 {
      %cst_12 = arith.constant 0.000000e+00 : f32
      %14 = vector.broadcast %cst_12 : f32 to vector<64x128xf32>
      %c0_13 = arith.constant 0 : index
      %c0_14 = arith.constant 0 : index
      %15 = vector.load %arg5[%c0_13, %c0_14] : memref<64x128xf32, #tpu.memory_space<vmem>>, vector<64x128xf32>
      tpu.vector_store %arg5[%c0_13, %c0_14], %14 {strides = array<i32>} : memref<64x128xf32, #tpu.memory_space<vmem>>, vector<64x128xf32>,
    } else {
    }
    %c0 = arith.constant 0 : index
    %c0_1 = arith.constant 0 : index
    %3 = vector.load %arg5[%c0, %c0_1] : memref<64x128xf32, #tpu.memory_space<vmem>>, vector<64x128xf32>
    %c0_2 = arith.constant 0 : index
    %c0_3 = arith.constant 0 : index
    %c0_4 = arith.constant 0 : index
    %4 = vector.load %arg2[%c0_2, %c0_3, %c0_4] : memref<1x64x64xbf16, #tpu.memory_space<vmem>>, vector<1x64x64xbf16>
    %5 = vector.shape_cast %4 : vector<1x64x64xbf16> to vector<64x64xbf16>
    %c0_5 = arith.constant 0 : index
    %c0_6 = arith.constant 0 : index
    %c0_7 = arith.constant 0 : index
    %6 = vector.load %arg3[%c0_5, %c0_6, %c0_7] : memref<1x128x64xbf16, #tpu.memory_space<vmem>>, vector<1x128x64xbf16>
    %7 = vector.shape_cast %6 : vector<1x128x64xbf16> to vector<128x64xbf16>
    %cst = arith.constant dense<0.000000e+00> : vector<64x128xf32>
    %8 = tpu.matmul %5, %7, %cst {dimension_numbers = #tpu.dot_dimension_numbers<[1], [1], [0], [0], [0, 0, 1, 0], [], []>} : vector<64x64xbf16>, vector<128x64xbf16>, vector<64x128xf32> -> vector<64x128xf32>
    %9 = arith.addf %3, %8 : vector<64x128xf32>
    %c0_8 = arith.constant 0 : index
    %c0_9 = arith.constant 0 : index
    %10 = vector.load %arg5[%c0_8, %c0_9] : memref<64x128xf32, #tpu.memory_space<vmem>>, vector<64x128xf32>
    tpu.vector_store %arg5[%c0_8, %c0_9], %9 {strides = array<i32>} : memref<64x128xf32, #tpu.memory_space<vmem>>, vector<64x128xf32>,
    %c0_i32_10 = arith.constant 0 : i32
    %11 = arith.cmpi eq, %arg1, %c0_i32_10 : i32
    %12 = arith.extui %11 : i1 to i32
    %c0_i32_11 = arith.constant 0 : i32
    %13 = arith.cmpi ne, %12, %c0_i32_11 : i32
    scf.if %13 {
      %c0_12 = arith.constant 0 : index
      %c0_13 = arith.constant 0 : index
      %14 = vector.load %arg5[%c0_12, %c0_13] : memref<64x128xf32, #tpu.memory_space<vmem>>, vector<64x128xf32>
      %cst_14 = arith.constant 3.906250e-03 : f32
      %15 = vector.broadcast %cst_14 : f32 to vector<64x128xf32>
      %16 = arith.mulf %14, %15 : vector<64x128xf32>
      %c0_15 = arith.constant 0 : index
      %c0_16 = arith.constant 0 : index
      %c0_17 = arith.constant 0 : index
      %17 = vector.load %arg4[%c0_15, %c0_16, %c0_17] : memref<1x64x128xf32, #tpu.memory_space<vmem>>, vector<1x64x128xf32>
      %18 = vector.shape_cast %17 : vector<1x64x128xf32> to vector<64x128xf32>
      %19 = vector.shape_cast %16 : vector<64x128xf32> to vector<1x64x128xf32>
      tpu.vector_store %arg4[%c0_15, %c0_16, %c0_17], %19 {strides = array<i32>} : memref<1x64x128xf32, #tpu.memory_space<vmem>>, vector<1x64x128xf32>,
    } else {
    }
    return
  }
  func.func @transform_0(%arg0: i32, %arg1: i32) -> (i32, i32, i32) {
    %c0_i32 = arith.constant 0 : i32
    %c0_i32_0 = arith.constant 0 : i32
    return %arg0, %c0_i32, %arg1 : i32, i32, i32
  }
  func.func @transform_1(%arg0: i32, %arg1: i32) -> (i32, i32, i32) {
    %c0_i32 = arith.constant 0 : i32
    %c0_i32_0 = arith.constant 0 : i32
    return %arg0, %c0_i32, %arg1 : i32, i32, i32
  }
  func.func @transform_2(%arg0: i32, %arg1: i32) -> (i32, i32, i32) {
    %c0_i32 = arith.constant 0 : i32
    %c0_i32_0 = arith.constant 0 : i32
    %c0_i32_1 = arith.constant 0 : i32
    return %arg0, %c0_i32, %c0_i32_0 : i32, i32, i32
  }
}

</mosaic_0001>

<bundles_post_ra>
// kernel: vgg19_gram_pyramid_forward.5
= control target key start
LH: loop header
LB: loop body
LE: loop exit
PB: predicated region body
PF: predicated region fallthrough
CT: control target
= control target key end

     0   :  { %s1239_s15 = smov 0   ;;  %s1241_s16 = smov 0   ;;  %s1446_s0 = inlined_call_operand.vmem [shape: bf16[2,8,320], index: 0, kind: input, shape index: {}]   ;;  %s1447_s1 = inlined_call_operand.vmem [shape: bf16[64,72], index: 1, kind: input, shape index: {}]   ;;  %s1448_s2 = inlined_call_operand.vmem [shape: f32[64,1], index: 2, kind: input, shape index: {}]   ;;  %s1449_s3 = inlined_call_operand.vmem [shape: bf16[2,256], index: 3, kind: input, shape index: {}]   ;;  %s1450_s4 = inlined_call_operand.vmem [shape: bf16[2,64,320], index: 4, kind: output, shape index: {}]  }
   0x1   :  { %s1243_s17 = smov 0  }
   0x2 LB: > { %s26_s18 = sadd.s32 1, %s1190_s16  ;;  %p1055_p0 = scmp.ge.s32.totalorder %s1194_s17, 1  ;;  %s1194_s17 = sphi %s1243_s17, %s14_s17   ;;  %s1190_s16 = sphi %s1241_s16, %s1452_s16   ;;  %s1186_s15 = sphi %s1239_s15, %s1451_s15  }
   0x3   : > { %p28_p1 = scmp.ge.s32.totalorder %s26_s18, 2  ;;  %p198_p2 = scmp.lt.s32.totalorder %s1194_s17, 3 }
   0x5   : > { %s1454_s18 = smov (%p28_p1, %s26_s18), 0  ;;  %p199_p3 = pnand %p1055_p0, %p198_p2 }
   0x6   : > { %v1058_v0 = vld.sshfl [vmem:[%s1449_s3] sm:$0x11 pattern:$0x75316420] (!%p199_p3)  ;;  %v283_v1 = vlaneseq (!%p199_p3)  ;;  %v1196_v2 = vmov (!%p199_p3), 1966171168  }
   0x7   : > { %202 = sbr.rel (%p199_p3) target bundleno = 773 (0x305), region = 36  ;;  %v281_v3 = vunpack.c.l.s4 (!%p199_p3), %v1196_v2  ;;  %v279_v5 = vcombine.high (!%p199_p3), %v1058_v0, %v1058_v0  ;;  %p239_p4 = scmp.lt.s32.totalorder (!%p199_p3), %s1186_s15, 1  ;;  %vm353_vm0 = vcmask (!%p199_p3), 252928   ;;  %vm371_vm1 = vcmask (!%p199_p3), 384000  }
   0x8   : > { %v284_v4 = vshrl.u32 (!%p199_p3), %v283_v1, 7  ;;  %s1197_s22 = smov (!%p199_p3), 17   ;;  %s1198_s23 = smov (!%p199_p3), 33   ;;  %vm344_vm2 = vcmask (!%p199_p3), 138240   ;;  %vm362_vm3 = vcmask (!%p199_p3), 269312   ;;  %vm380_vm4 = vcmask (!%p199_p3), 400384  }
   0x9   : > { %v282_v6 = vunpack.c.0.s8 (!%p199_p3), %v281_v3  ;;  %s1199_s27 = smov (!%p199_p3), 31   ;;  %s1200_s28 = smov (!%p199_p3), 47   ;;  %vm316_vm5 = vcmask (!%p199_p3), 121856   ;;  %vm408_vm6 = vcmask (!%p199_p3), 1039360   ;;  %vm514_vm7 = vcmask (!%p199_p3), 1043456  }
   0xa   : > { %v299_v10 = vsub.s32 (!%p199_p3), 0, %v284_v4  ;;  %s1201_s29 = smov (!%p199_p3), 49   ;;  %s1202_s30 = smov (!%p199_p3), 15   ;;  %vm425_vm8 = vcmask (!%p199_p3), 1031168   ;;  %vm468_vm9 = vcmask (!%p199_p3), 900096   ;;  %vm451_vm10 = vcmask (!%p199_p3), 908288  }
   0xb   : > { %v285_v7 = vsub.s32 (!%p199_p3), %v282_v6, %v284_v4  ;;  %s1203_s5 = smov (!%p199_p3), 127   ;;  %s1204_s6 = smov (!%p199_p3), 111   ;;  %vm442_vm11 = vcmask (!%p199_p3), 916480   ;;  %vm485_vm12 = vcmask (!%p199_p3), 785408   ;;  %vm494_vm13 = vcmask (!%p199_p3), 777216  }
   0xc   : > { %s1205_s7 = smov (!%p199_p3), 95   ;;  %s1206_s8 = smov (!%p199_p3), 112   ;;  %vm511_vm14 = vcmask (!%p199_p3), 769024   ;;  %vm669_vm15 = vcmask (!%p199_p3), 924672  }
   0xd   : > { %v286_v8 = vrot.slane (!%p199_p3), %v1058_v0, %v285_v7  ;;  %v293_v9 = vrot.slane (!%p199_p3), %v279_v5, %v285_v7  ;;  %s1207_s9 = smov (!%p199_p3), 96   ;;  %s1208_s10 = smov (!%p199_p3), 126  }
   0xe   : > { %s1456_s15 = smov (!%p239_p4, %s1186_s15), 1  ;;  %s1209_s11 = smov 110  }
   0xf   : > { %v322_v11 = vshrl.u32 %v286_v8, 16  ;;  %v329_v12 = vshrl.u32 %v293_v9, 16  ;;  %v295_v13 = vpack.i.b16 %v286_v8, %v286_v8  ;;  %v302_v14 = vpack.i.b16 %v293_v9, %v293_v9  ;;  %s1119_s21 = smul.u32 12, %s1456_s15  ;;  %s1210_s12 = smov 94  }
  0x10   : > { %s1211_s13 = smov 113   ;;  %s1213_s20 = smov 32  }
  0x11   : > { %v323_v15 = vpack.i.b16 %v322_v11, %v322_v11  ;;  %v330_v16 = vpack.i.b16 %v329_v12, %v329_v12  ;;  %v300_v19 = vrot.slane %v295_v13, %v299_v10  ;;  %v307_v20 = vrot.slane %v302_v14, %v299_v10  ;;  %s243_s26 = scalar_lea.vmem %s1446_s0, %s1119_s21  ;;  %s1120_s21 = smul.u32 96, %s1456_s15 }
  0x12   : > { %v1266_v23 = vld [vmem:[%s243_s26 + $0x8] sm:$0xf]  ;;  %v1268_v24 = vld [vmem:[%s243_s26] sm:$0xff] }
  0x13   : > { %v328_v17 = vrot.slane %v323_v15, %v299_v10  ;;  %v335_v18 = vrot.slane %v330_v16, %v299_v10  ;;  %v1059_v22 = vcombine.low %v300_v19, %v307_v20  ;;  %v1066_v25 = vcombine.low %v1266_v23, %v1266_v23  ;;  %s1400_s24 = scalar_lea.vmem %s1450_s4, %s1120_s21 }
  0x14   : > { %v1065_v26 = vcombine.high %v1268_v24, %v1268_v24  ;;  %v1276_v27 = vcombine.low %v1268_v24, %v1268_v24 }
  0x15   : > { %v1060_v21 = vcombine.low %v328_v17, %v335_v18 }
  0x17   : > { %341 = vrot.lane.b32.xlu0 %v1060_v21, %s1197_s22  ;;  %359 = vrot.lane.b32.xlu1 %v1060_v21, %s1198_s23 }
  0x1b   : > { %350 = vrot.lane.b32.xlu0 %v1059_v22, %s1199_s27  ;;  %368 = vrot.lane.b32.xlu1 %v1059_v22, %s1200_s28 }
  0x1f   : > { %377 = vrot.lane.b32.xlu0 %v1060_v21, %s1201_s29  ;;  %313 = vrot.lane.b32.xlu1 %v1059_v22, %s1202_s30 }
  0x23   : > { %406 = vrot.lane.b32.xlu1 %v1066_v25, %s1203_s5  ;;  %404 = vrot.lane.b32.xlu0 %v1065_v26, %s1203_s5 }
  0x27   : > { %402 = vrot.lane.b32.xlu0 %v1276_v27, %s1203_s5  ;;  %447 = vrot.lane.b32.xlu1 %v1065_v26, %s1204_s6 }
  0x2b   : > { %445 = vrot.lane.b32.xlu1 %v1276_v27, %s1204_s6  ;;  %449 = vrot.lane.b32.xlu0 %v1066_v25, %s1204_s6 }
  0x2f   : > { %490 = vrot.lane.b32.xlu1 %v1065_v26, %s1205_s7  ;;  %492 = vrot.lane.b32.xlu0 %v1066_v25, %s1205_s7 }
  0x89   : > { %v342_v28 = vpop.permute.xlu0 %341  ;;  %v360_v29 = vpop.permute.xlu1 %359 }
  0x8a   : > { %v343_v34 = vrot.slane %v342_v28, 4  ;;  %v361_v47 = vrot.slane %v360_v29, 4 }
  0x8c   : > { %v345_v43 = vsel %vm344_vm2, %v343_v34, %v342_v28  ;;  %v349_v48 = vmul.bf16 %v343_v34, %v1266_v23  ;;  %v363_v52 = vsel %vm362_vm3, %v361_v47, %v360_v29  ;;  %v367_v53 = vmul.bf16 %v361_v47, %v1266_v23 }
  0x8d   : > { %v351_v30 = vpop.permute.xlu0 %350  ;;  %v369_v31 = vpop.permute.xlu1 %368  ;;  %v348_v45 = vmul.bf16 %v345_v43, %v1268_v24  ;;  %v366_v56 = vmul.bf16 %v363_v52, %v1268_v24  ;;  %vm916_vm2 = vcmask 519168  }
  0x8e   : > { %v352_v32 = vrot.slane %v351_v30, 4  ;;  %v370_v33 = vrot.slane %v369_v31, 4  ;;  %v1069_v54 = vcombine.low %v349_v48, %v349_v48  ;;  %v1075_v59 = vcombine.low %v367_v53, %v367_v53 }
  0x8f   : > { %v1068_v50 = vcombine.high %v348_v45, %v348_v45  ;;  %v1067_v57 = vcombine.low %v348_v45, %v348_v45  ;;  %v1074_v62 = vcombine.high %v366_v56, %v366_v56  ;;  %v1073_v0 = vcombine.low %v366_v56, %v366_v56 }
  0x90   : > { %v354_v35 = vsel %vm353_vm0, %v352_v32, %v351_v30  ;;  %v358_v36 = vmul.bf16 %v352_v32, %v1266_v23  ;;  %v372_v37 = vsel %vm371_vm1, %v370_v33, %v369_v31  ;;  %v376_v38 = vmul.bf16 %v370_v33, %v1266_v23 }
  0x91   : > { %v357_v39 = vmul.bf16 %v354_v35, %v1268_v24  ;;  %v375_v41 = vmul.bf16 %v372_v37, %v1268_v24  ;;  %v378_v51 = vpop.permute.xlu0 %377  ;;  %v314_v58 = vpop.permute.xlu1 %313  ;;  %vm688_vm0 = vcmask 588800   ;;  %vm828_vm1 = vcmask 261120  }
  0x92   : > { %v1072_v40 = vcombine.low %v358_v36, %v358_v36  ;;  %v1078_v44 = vcombine.low %v376_v38, %v376_v38  ;;  %v379_v55 = vrot.slane %v378_v51, 4  ;;  %v315_v61 = vrot.slane %v314_v58, 4 }
  0x93   : > { %v1071_v42 = vcombine.high %v357_v39, %v357_v39  ;;  %v1077_v46 = vcombine.high %v375_v41, %v375_v41  ;;  %v1070_v49 = vcombine.low %v357_v39, %v357_v39  ;;  %v1076_v2 = vcombine.low %v375_v41, %v375_v41 }
  0x94   : > { %440 = vrot.lane.b32.xlu0 %v1072_v40, %s1206_s8  ;;  %v381_v60 = vsel %vm380_vm4, %v379_v55, %v378_v51  ;;  %v317_v1 = vsel %vm316_vm5, %v315_v61, %v314_v58  ;;  %v385_v3 = vmul.bf16 %v379_v55, %v1266_v23  ;;  %v321_v7 = vmul.bf16 %v315_v61, %v1266_v23 }
  0x95   : > { %438 = vrot.lane.b32.xlu1 %v1071_v42, %s1206_s8  ;;  %v384_v63 = vmul.bf16 %v381_v60, %v1268_v24  ;;  %v320_v5 = vmul.bf16 %v317_v1, %v1268_v24  ;;  %v405_v6 = vpop.permute.xlu0 %404  ;;  %v407_v8 = vpop.permute.xlu1 %406 }
  0x96   : > { %v1081_v10 = vcombine.low %v385_v3, %v385_v3  ;;  %v1063_v12 = vcombine.low %v321_v7, %v321_v7  ;;  %v410_v13 = vsel %vm408_vm6, %v405_v6, %v407_v8  ;;  %v560_v7 = vld [vmem:[%s1448_s2 + $0x8] sm:$0xff] }
  0x97   : > { %v1079_v4 = vcombine.low %v384_v63, %v384_v63  ;;  %v1080_v9 = vcombine.high %v384_v63, %v384_v63  ;;  %v1062_v11 = vcombine.high %v320_v5, %v320_v5  ;;  %v1061_v15 = vcombine.low %v320_v5, %v320_v5 }
  0x98   : > { %483 = vrot.lane.b32.xlu0 %v1078_v44, %s1207_s9  ;;  %v523_v18 = vsel %vm514_vm7, %v1063_v12, %v407_v8  ;;  %v563_v8 = vld [vmem:[%s1448_s2 + $0x20] sm:$0xff]  ;;  %v564_v12 = vld [vmem:[%s1448_s2 + $0x28] sm:$0xff] }
  0x99   : > { %481 = vrot.lane.b32.xlu1 %v1077_v46, %s1207_s9  ;;  %v403_v14 = vpop.permute.xlu0 %402  ;;  %v520_v16 = vsel %vm514_vm7, %v1062_v11, %v410_v13  ;;  %v448_v20 = vpop.permute.xlu1 %447  ;;  %v562_v11 = vld [vmem:[%s1448_s2 + $0x18] sm:$0xff] }
  0x9a   : > { %v409_v17 = vsel %vm408_vm6, %v403_v14, %v405_v6  ;;  %v559_v6 = vld [vmem:[%s1448_s2] sm:$0xff]  ;;  %v566_v13 = vld [vmem:[%s1448_s2 + $0x38] sm:$0xff] }
  0x9b   : > { %v517_v19 = vsel %vm514_vm7, %v1061_v15, %v409_v17 }
  0x9c   : > { %436 = vrot.lane.b32.xlu0 %v1070_v49, %s1206_s8 }
  0x9d   : > { %421 = vrot.lane.b32.xlu1 %v1068_v50, %s1208_s10  ;;  %v450_v21 = vpop.permute.xlu0 %449  ;;  %v446_v22 = vpop.permute.xlu1 %445 }
  0x9e   : > { %v453_v40 = vsel %vm451_vm10, %v448_v20, %v450_v21  ;;  %v452_v48 = vsel %vm451_vm10, %v446_v22, %v448_v20 }
  0xa0   : > { %423 = vrot.lane.b32.xlu0 %v1069_v54, %s1208_s10 }
  0xa1   : > { %419 = vrot.lane.b32.xlu1 %v1067_v57, %s1208_s10  ;;  %v493_v23 = vpop.permute.xlu0 %492  ;;  %v491_v24 = vpop.permute.xlu1 %490  ;;  %v1212_v57 = vmov 0  }
  0xa2   : > { %v496_v55 = vsel %vm494_vm13, %v491_v24, %v493_v23  ;;  %739 = vmatprep.mubr.bf16.mxu0 %v1212_v57  ;;  %759 = vmatprep.mubr.bf16.mxu1 %v1212_v57 }
  0xa3   : > { %1163 = vset.pattern.permute.xlu1 %v1212_v57  ;;  %1164 = vset.pattern.permute.xlu0 %v1212_v57 }
  0xa4   : > { %466 = vrot.lane.b32.xlu0 %v1075_v59, %s1209_s11 }
  0xa5   : > { %464 = vrot.lane.b32.xlu1 %v1074_v62, %s1209_s11 }
  0xa8   : > { %462 = vrot.lane.b32.xlu0 %v1073_v0, %s1209_s11 }
  0xa9   : > { %479 = vrot.lane.b32.xlu1 %v1076_v2, %s1207_s9 }
  0xac   : > { %488 = vrot.lane.b32.xlu0 %v1276_v27, %s1205_s7 }
  0xad   : > { %505 = vrot.lane.b32.xlu1 %v1079_v4, %s1210_s12 }
  0xb0   : > { %507 = vrot.lane.b32.xlu0 %v1080_v9, %s1210_s12  ;;  %v561_v9 = vld [vmem:[%s1448_s2 + $0x10] sm:$0xff] }
  0xb1   : > { %509 = vrot.lane.b32.xlu1 %v1081_v10, %s1210_s12  ;;  %v565_v10 = vld [vmem:[%s1448_s2 + $0x30] sm:$0xff] }
  0xb4   : > { %641 = vrot.lane.b32.xlu0 %v520_v16, %s1211_s13 }
  0xb5   : > { %643 = vrot.lane.b32.xlu1 %v523_v18, %s1211_s13 }
  0xb8   : > { %639 = vrot.lane.b32.xlu0 %v517_v19, %s1211_s13 }
 0x106   : > { %v441_v25 = vpop.permute.xlu0 %440 }
 0x107   : > { %v439_v26 = vpop.permute.xlu1 %438 }
 0x108   : > { %v444_v41 = vsel %vm442_vm11, %v439_v26, %v441_v25 }
 0x10a   : > { %v484_v27 = vpop.permute.xlu0 %483 }
 0x10b   : > { %v482_v28 = vpop.permute.xlu1 %481  ;;  %v550_v37 = vsel %vm514_vm7, %v484_v27, %v493_v23 }
 0x10c   : > { %v487_v54 = vsel %vm485_vm12, %v482_v28, %v484_v27 }
 0x10d   : > { %v547_v58 = vsel %vm514_vm7, %v487_v54, %v496_v55 }
 0x10e   : > { %v437_v29 = vpop.permute.xlu0 %436 }
 0x10f   : > { %v422_v30 = vpop.permute.xlu1 %421  ;;  %v443_v49 = vsel %vm442_vm11, %v437_v29, %v439_v26 }
 0x112   : > { %v424_v31 = vpop.permute.xlu0 %423 }
 0x113   : > { %v420_v32 = vpop.permute.xlu1 %419  ;;  %v532_v33 = vsel %vm514_vm7, %v424_v31, %v441_v25  ;;  %v427_v38 = vsel %vm425_vm8, %v422_v30, %v424_v31 }
 0x114   : > { %649 = vrot.lane.b32.xlu0 %v532_v33, %s1211_s13  ;;  %v529_v44 = vsel %vm514_vm7, %v427_v38, %v444_v41  ;;  %v426_v46 = vsel %vm425_vm8, %v420_v32, %v422_v30  ;;  %v1171_v38 = vld [vmem:[%s1447_s1 + $0x18] sm:$0xff]  }
 0x115   : > { %v526_v51 = vsel %vm514_vm7, %v426_v46, %v443_v49 }
 0x116   : > { %v467_v34 = vpop.permute.xlu0 %466 }
 0x117   : > { %v465_v35 = vpop.permute.xlu1 %464  ;;  %v541_v36 = vsel %vm514_vm7, %v450_v21, %v467_v34 }
 0x118   : > { %v470_v39 = vsel %vm468_vm9, %v465_v35, %v467_v34  ;;  %655 = vrot.lane.b32.xlu1 %v541_v36, %s1211_s13  ;;  %661 = vrot.lane.b32.xlu0 %v550_v37, %s1211_s13  ;;  %v1169_v36 = vld [vmem:[%s1447_s1 + $0x10] sm:$0xff]   ;;  %v1170_v37 = vld [vmem:[%s1447_s1 + $0x8] sm:$0xff]  }
 0x119   : > { %v538_v45 = vsel %vm514_vm7, %v453_v40, %v470_v39 }
 0x11a   : > { %v463_v42 = vpop.permute.xlu0 %462 }
 0x11b   : > { %v480_v43 = vpop.permute.xlu1 %479  ;;  %v469_v47 = vsel %vm468_vm9, %v463_v42, %v465_v35  ;;  %v1168_v35 = vld [vmem:[%s1447_s1] sm:$0xff]  }
 0x11c   : > { %647 = vrot.lane.b32.xlu1 %v529_v44, %s1211_s13  ;;  %653 = vrot.lane.b32.xlu0 %v538_v45, %s1211_s13  ;;  %v535_v53 = vsel %vm514_vm7, %v452_v48, %v469_v47  ;;  %v486_v62 = vsel %vm485_vm12, %v480_v43, %v482_v28 }
 0x11e   : > { %v489_v50 = vpop.permute.xlu0 %488 }
 0x11f   : > { %v506_v52 = vpop.permute.xlu1 %505  ;;  %v495_v61 = vsel %vm494_vm13, %v489_v50, %v491_v24 }
 0x120   : > { %645 = vrot.lane.b32.xlu1 %v526_v51, %s1211_s13  ;;  %651 = vrot.lane.b32.xlu0 %v535_v53, %s1211_s13  ;;  %v544_v0 = vsel %vm514_vm7, %v486_v62, %v495_v61 }
 0x122   : > { %v508_v56 = vpop.permute.xlu0 %507 }
 0x123   : > { %v510_v59 = vpop.permute.xlu1 %509  ;;  %v512_v60 = vsel %vm511_vm14, %v506_v52, %v508_v56 }
 0x124   : > { %659 = vrot.lane.b32.xlu1 %v547_v58, %s1211_s13  ;;  %663 = vrot.lane.b32.xlu0 %v512_v60, %s1211_s13  ;;  %v513_v4 = vsel %vm511_vm14, %v508_v56, %v510_v59 }
 0x126   : > { %v642_v63 = vpop.permute.xlu0 %641 }
 0x127   : > { %v644_v1 = vpop.permute.xlu1 %643 }
 0x128   : > { %657 = vrot.lane.b32.xlu1 %v544_v0, %s1211_s13  ;;  %667 = vrot.lane.b32.xlu0 %v510_v59, %s1211_s13  ;;  %v671_v2 = vsel %vm669_vm15, %v642_v63, %v644_v1 }
 0x129   : > { %707 = vmatprep.subr.bf16.mxu0 %v671_v2  ;;  %1109 = vmatprep.subr.bf16.mxu1 %v671_v2 }
 0x12a   : > { %v640_v3 = vpop.permute.xlu0 %639 }
 0x12b   : > { %v670_v5 = vsel %vm669_vm15, %v640_v3, %v642_v63 }
 0x12c   : > { %665 = vrot.lane.b32.xlu1 %v513_v4, %s1211_s13  ;;  %708 = vmatpush1.bf16.msra.mxu0 %v670_v5 }
 0x12d   : > { %1114 = vmatpush1.bf16.msra.mxu1 %v670_v5  ;;  %574 = vperm.xlu0 %1164, %v560_v7  }
 0x130   : > { %569 = vperm.xlu1 %1163, %v559_v6  }
 0x131   : > { %589 = vperm.xlu0 %1164, %v563_v8  }
 0x134   : > { %579 = vperm.xlu1 %1163, %v561_v9  }
 0x135   : > { %599 = vperm.xlu0 %1164, %v565_v10  }
 0x138   : > { %584 = vperm.xlu1 %1163, %v562_v11  }
 0x13c   : > { %594 = vperm.xlu1 %1163, %v564_v12  }
 0x140   : > { %604 = vperm.xlu1 %1163, %v566_v13  }
 0x186   : > { %v650_v14 = vpop.permute.xlu0 %649 }
 0x18a   : > { %v656_v15 = vpop.permute.xlu1 %655  ;;  %v662_v16 = vpop.permute.xlu0 %661 }
 0x18e   : > { %v648_v17 = vpop.permute.xlu1 %647  ;;  %v654_v18 = vpop.permute.xlu0 %653 }
 0x18f   : > { %v673_v19 = vsel %vm669_vm15, %v648_v17, %v650_v14  ;;  %v675_v23 = vsel %vm669_vm15, %v654_v18, %v656_v15 }
 0x190   : > { %709 = vmatprep.subr.bf16.mxu0 %v673_v19  ;;  %1110 = vmatprep.subr.bf16.mxu1 %v673_v19 }
 0x192   : > { %v646_v20 = vpop.permute.xlu1 %645  ;;  %v652_v21 = vpop.permute.xlu0 %651 }
 0x193   : > { %v672_v22 = vsel %vm669_vm15, %v646_v20, %v648_v17  ;;  %v674_v25 = vsel %vm669_vm15, %v652_v21, %v654_v18 }
 0x194   : > { %710 = vmatpush1.bf16.msra.mxu0 %v672_v22  ;;  %1115 = vmatpush1.bf16.msra.mxu1 %v672_v22 }
 0x195   : > { %711 = vmatprep.subr.bf16.mxu0 %v675_v23  ;;  %1111 = vmatprep.subr.bf16.mxu1 %v675_v23 }
 0x196   : > { %v660_v24 = vpop.permute.xlu1 %659  ;;  %v664_v27 = vpop.permute.xlu0 %663 }
 0x197   : > { %v677_v26 = vsel %vm669_vm15, %v660_v24, %v662_v16 }
 0x198   : > { %712 = vmatpush1.bf16.msra.mxu0 %v674_v25  ;;  %1116 = vmatpush1.bf16.msra.mxu1 %v674_v25 }
 0x199   : > { %713 = vmatprep.subr.bf16.mxu0 %v677_v26  ;;  %1112 = vmatprep.subr.bf16.mxu1 %v677_v26 }
 0x19a   : > { %v658_v28 = vpop.permute.xlu1 %657  ;;  %v668_v30 = vpop.permute.xlu0 %667 }
 0x19b   : > { %v676_v29 = vsel %vm669_vm15, %v658_v28, %v660_v24 }
 0x19c   : > { %714 = vmatpush1.bf16.msra.mxu0 %v676_v29  ;;  %1117 = vmatpush1.bf16.msra.mxu1 %v676_v29 }
 0x19e   : > { %v666_v31 = vpop.permute.xlu1 %665 }
 0x19f   : > { %v678_v32 = vsel %vm669_vm15, %v664_v27, %v666_v31  ;;  %v679_v33 = vsel %vm669_vm15, %v666_v31, %v668_v30 }
 0x1a0   : > { %1086 = vmatprep.subr.msk.bf16.mxu0 %vm514_vm7, %v679_v33  ;;  %1113 = vmatprep.subr.msk.bf16.mxu1 %vm514_vm7, %v679_v33  ;;  %v702_v34 = vsel %vm514_vm7, %v678_v32, 0 }
 0x1a1   : > { %716 = vmatpush1.bf16.msra.mxu0 %v702_v34  ;;  %1118 = vmatpush1.bf16.msra.mxu1 %v702_v34 }
 0x1a4   : > { %1087 = vmatmul.mubr.msk.bf16.vlgmr.msra.gmra.mrb[0].mxu0 %vm688_vm0, %v1168_v35  ;;  %1089 = vmatmul.mubr.msk.bf16.vlgmr.msra.gmra.mrb[0].mxu1 %vm688_vm0, %v1169_v36 }
 0x1a5   : > { %749 = vmatprep.mubr.bf16.mxu0 %v1212_v57  ;;  %769 = vmatprep.mubr.bf16.mxu1 %v1212_v57 }
 0x1ac   : > { %1088 = vmatmul.mubr.msk.bf16.gmra.mrb[4].mxu0 %vm688_vm0, %v1170_v37  ;;  %1090 = vmatmul.mubr.msk.bf16.gmra.mrb[4].mxu1 %vm688_vm0, %v1171_v38  ;;  %v575_v42 = vpop.permute.xlu0 %574 }
 0x1af   : > { %v570_v39 = vpop.permute.xlu1 %569 }
 0x1b0   : > { %v590_v44 = vpop.permute.xlu0 %589 }
 0x1b3   : > { %v580_v40 = vpop.permute.xlu1 %579 }
 0x1b4   : > { %v600_v8 = vpop.permute.xlu0 %599 }
 0x1b7   : > { %v585_v41 = vpop.permute.xlu1 %584 }
 0x1bb   : > { %v595_v43 = vpop.permute.xlu1 %594 }
 0x1bf   : > { %v605_v5 = vpop.permute.xlu1 %604 }
 0x277   : > { %v741_v45 = vpop.f32.mrb[0].mxu0  ;;  %v761_v46 = vpop.f32.mrb[0].mxu1 }
 0x278   : > { %v742_v47 = vadd.f32 %v741_v45, %v570_v39  ;;  %v762_v48 = vadd.f32 %v761_v46, %v590_v44  ;;  %v743_v49 = vpop.f32.mrb[1].mxu0  ;;  %v763_v50 = vpop.f32.mrb[1].mxu1 }
 0x279   : > { %v744_v51 = vadd.f32 %v743_v49, %v570_v39  ;;  %v764_v52 = vadd.f32 %v763_v50, %v590_v44  ;;  %v745_v53 = vpop.f32.mrb[2].mxu0  ;;  %v765_v54 = vpop.f32.mrb[2].mxu1 }
 0x27a   : > { %v788_v55 = vmax.f32 %v762_v48, 0.0  ;;  %v746_v56 = vadd.f32 %v745_v53, %v575_v42  ;;  %v766_v57 = vadd.f32 %v765_v54, %v595_v43  ;;  %v747_v58 = vpop.f32.mrb[3].mxu0  ;;  %v767_v59 = vpop.f32.mrb[3].mxu1  ;;  %v780_v63 = vmax.f32 %v742_v47, 0.0 }
 0x27b   : > { %v789_v60 = vmax.f32 %v764_v52, 0.0  ;;  %v748_v61 = vadd.f32 %v747_v58, %v575_v42  ;;  %v768_v62 = vadd.f32 %v767_v59, %v595_v43  ;;  %v781_v2 = vmax.f32 %v744_v51, 0.0 }
 0x27c   : > { %v782_v0 = vmax.f32 %v746_v56, 0.0  ;;  %v790_v1 = vmax.f32 %v766_v57, 0.0 }
 0x27d   : > { %v783_v3 = vmax.f32 %v748_v61, 0.0  ;;  %v791_v4 = vmax.f32 %v768_v62, 0.0 }
 0x27e   : > { %v796_v6 = vpack.c.bf16 %v782_v0, %v780_v63  ;;  %v800_v7 = vpack.c.bf16 %v790_v1, %v788_v55 }
 0x27f   : > { %v797_v9 = vpack.c.bf16 %v783_v3, %v781_v2  ;;  %v801_v10 = vpack.c.bf16 %v791_v4, %v789_v60  ;;  %v751_v11 = vpop.f32.mrb[4].mxu0  ;;  %v771_v12 = vpop.f32.mrb[4].mxu1 }
 0x280   : > { %v752_v13 = vadd.f32 %v751_v11, %v580_v40  ;;  %v772_v14 = vadd.f32 %v771_v12, %v600_v8  ;;  %v753_v15 = vpop.f32.mrb[5].mxu0  ;;  %v773_v16 = vpop.f32.mrb[5].mxu1  ;;  %812 = vrot.lane.b32.xlu0 %v796_v6, %s1213_s20 }
 0x281   : > { %v754_v17 = vadd.f32 %v753_v15, %v580_v40  ;;  %v774_v18 = vadd.f32 %v773_v16, %v600_v8  ;;  %v755_v19 = vpop.f32.mrb[6].mxu0  ;;  %v775_v20 = vpop.f32.mrb[6].mxu1  ;;  %814 = vrot.lane.b32.xlu1 %v797_v9, %s1213_s20 }
 0x282   : > { %v756_v21 = vadd.f32 %v755_v19, %v585_v41  ;;  %v776_v22 = vadd.f32 %v775_v20, %v605_v5  ;;  %v757_v23 = vpop.f32.mrb[7].mxu0  ;;  %v777_v24 = vpop.f32.mrb[7].mxu1  ;;  %v784_v27 = vmax.f32 %v752_v13, 0.0  ;;  %v792_v28 = vmax.f32 %v772_v14, 0.0 }
 0x283   : > { %v758_v25 = vadd.f32 %v757_v23, %v585_v41  ;;  %v778_v26 = vadd.f32 %v777_v24, %v605_v5  ;;  %v785_v31 = vmax.f32 %v754_v17, 0.0  ;;  %v793_v32 = vmax.f32 %v774_v18, 0.0 }
 0x284   : > { %v786_v29 = vmax.f32 %v756_v21, 0.0  ;;  %v794_v30 = vmax.f32 %v776_v22, 0.0  ;;  %820 = vrot.lane.b32.xlu0 %v800_v7, %s1213_s20 }
 0x285   : > { %v787_v33 = vmax.f32 %v758_v25, 0.0  ;;  %v795_v34 = vmax.f32 %v778_v26, 0.0  ;;  %822 = vrot.lane.b32.xlu1 %v801_v10, %s1213_s20 }
 0x286   : > { %v798_v35 = vpack.c.bf16 %v786_v29, %v784_v27  ;;  %v802_v36 = vpack.c.bf16 %v794_v30, %v792_v28 }
 0x287   : > { %v799_v37 = vpack.c.bf16 %v787_v33, %v785_v31  ;;  %v803_v38 = vpack.c.bf16 %v795_v34, %v793_v32 }
 0x288   : > { %816 = vrot.lane.b32.xlu0 %v798_v35, %s1213_s20 }
 0x289   : > { %818 = vrot.lane.b32.xlu1 %v799_v37, %s1213_s20 }
 0x28c   : > { %824 = vrot.lane.b32.xlu0 %v802_v36, %s1213_s20 }
 0x28d   : > { %826 = vrot.lane.b32.xlu1 %v803_v38, %s1213_s20 }
 0x2f2   : > { %v813_v39 = vpop.permute.xlu0 %812 }
 0x2f3   : > { %v836_v40 = vsel %vm828_vm1, 0, %v813_v39  ;;  %v815_v41 = vpop.permute.xlu1 %814 }
 0x2f4   : > { %v829_v42 = vsel %vm828_vm1, %v813_v39, %v815_v41  ;;  %v844_v43 = vsel %vm828_vm1, %v815_v41, 0 }
 0x2f5   : > { %v1091_v44 = vcombine.low %v836_v40, %v829_v42  ;;  %v1092_v45 = vcombine.low %v844_v43, %v844_v43  ;;  %v1093_v46 = vcombine.high %v836_v40, %v829_v42  ;;  %v1094_v47 = vcombine.high %v844_v43, %v844_v43 }
 0x2f6   : > { %v821_v48 = vpop.permute.xlu0 %820 }
 0x2f7   : > { %915 = vst [vmem:[%s1400_s24] sm:$0xff] %v1091_v44  ;;  %917 = vst.msk [vmem:[%s1400_s24 + $0x8] sm:$0xf] %vm916_vm2, %v1092_v45  ;;  %v840_v49 = vsel %vm828_vm1, 0, %v821_v48  ;;  %v823_v50 = vpop.permute.xlu1 %822 }
 0x2f8   : > { %918 = vst [vmem:[%s1400_s24 + $0xc] sm:$0xff] %v1093_v46  ;;  %919 = vst.msk [vmem:[%s1400_s24 + $0x14] sm:$0xf] %vm916_vm2, %v1094_v47  ;;  %v831_v51 = vsel %vm828_vm1, %v821_v48, %v823_v50  ;;  %v848_v52 = vsel %vm828_vm1, %v823_v50, 0 }
 0x2f9   : > { %v1099_v53 = vcombine.low %v840_v49, %v831_v51  ;;  %v1100_v54 = vcombine.low %v848_v52, %v848_v52  ;;  %v1101_v55 = vcombine.high %v840_v49, %v831_v51  ;;  %v1102_v56 = vcombine.high %v848_v52, %v848_v52 }
 0x2fa   : > { %v817_v57 = vpop.permute.xlu0 %816 }
 0x2fb   : > { %924 = vst [vmem:[%s1400_s24 + $0x30] sm:$0xff] %v1099_v53  ;;  %925 = vst.msk [vmem:[%s1400_s24 + $0x38] sm:$0xf] %vm916_vm2, %v1100_v54  ;;  %v838_v58 = vsel %vm828_vm1, 0, %v817_v57  ;;  %v819_v59 = vpop.permute.xlu1 %818 }
 0x2fc   : > { %926 = vst [vmem:[%s1400_s24 + $0x3c] sm:$0xff] %v1101_v55  ;;  %927 = vst.msk [vmem:[%s1400_s24 + $0x44] sm:$0xf] %vm916_vm2, %v1102_v56  ;;  %v830_v60 = vsel %vm828_vm1, %v817_v57, %v819_v59  ;;  %v846_v61 = vsel %vm828_vm1, %v819_v59, 0 }
 0x2fd   : > { %v1095_v62 = vcombine.low %v838_v58, %v830_v60  ;;  %v1096_v63 = vcombine.low %v846_v61, %v846_v61  ;;  %v1097_v0 = vcombine.high %v838_v58, %v830_v60  ;;  %v1098_v1 = vcombine.high %v846_v61, %v846_v61 }
 0x2fe   : > { %v825_v2 = vpop.permute.xlu0 %824 }
 0x2ff   : > { %920 = vst [vmem:[%s1400_s24 + $0x18] sm:$0xff] %v1095_v62  ;;  %921 = vst.msk [vmem:[%s1400_s24 + $0x20] sm:$0xf] %vm916_vm2, %v1096_v63  ;;  %v842_v3 = vsel %vm828_vm1, 0, %v825_v2  ;;  %v827_v4 = vpop.permute.xlu1 %826 }
 0x300   : > { %922 = vst [vmem:[%s1400_s24 + $0x24] sm:$0xff] %v1097_v0  ;;  %923 = vst.msk [vmem:[%s1400_s24 + $0x2c] sm:$0xf] %vm916_vm2, %v1098_v1  ;;  %v832_v5 = vsel %vm828_vm1, %v825_v2, %v827_v4  ;;  %v850_v6 = vsel %vm828_vm1, %v827_v4, 0 }
 0x301   : > { %v1103_v7 = vcombine.low %v842_v3, %v832_v5  ;;  %v1104_v8 = vcombine.low %v850_v6, %v850_v6  ;;  %v1105_v9 = vcombine.high %v842_v3, %v832_v5  ;;  %v1106_v10 = vcombine.high %v850_v6, %v850_v6 }
 0x303   : > { %928 = vst [vmem:[%s1400_s24 + $0x48] sm:$0xff] %v1103_v7  ;;  %929 = vst.msk [vmem:[%s1400_s24 + $0x50] sm:$0xf] %vm916_vm2, %v1104_v8 }
 0x304   : > { %930 = vst [vmem:[%s1400_s24 + $0x54] sm:$0xff] %v1105_v9  ;;  %931 = vst.msk [vmem:[%s1400_s24 + $0x5c] sm:$0xf] %vm916_vm2, %v1106_v10 }
 0x305 PF: > { %s14_s17 = sadd.s32 1, %s1194_s17   ;;  %s1451_s15 = smov %s1190_s16 }
 0x306   : > { %p11_p5 = scmp.ge.s32.totalorder %s14_s17, 4   ;;  %s1452_s16 = smov %s1454_s18 }
 0x308   :  { %13 = sbr.rel (!%p11_p5) target bundleno = 2 (0x2), region = 72 }

// kernel: vgg19_gram_pyramid_forward.6
= control target key start
LH: loop header
LB: loop body
LE: loop exit
PB: predicated region body
PF: predicated region fallthrough
CT: control target
= control target key end

     0   :  { %s2415_s15 = smov 0   ;;  %s2417_s16 = smov 0   ;;  %s3560_s0 = inlined_call_operand.vmem [shape: bf16[2,64,320], index: 0, kind: input, shape index: {}]   ;;  %s3561_s1 = inlined_call_operand.vmem [shape: bf16[64,576], index: 1, kind: input, shape index: {}]   ;;  %s3562_s2 = inlined_call_operand.vmem [shape: f32[64,1], index: 2, kind: input, shape index: {}]   ;;  %s3563_s3 = inlined_call_operand.vmem [shape: bf16[2,256], index: 3, kind: input, shape index: {}]   ;;  %s3564_s4 = inlined_call_operand.vmem [shape: bf16[2,64,256], index: 4, kind: output, shape index: {}]  }
   0x1   :  { %s2419_s17 = smov 0  }
   0x2 LB: > { %s26_s18 = sadd.s32 1, %s2367_s16  ;;  %p2075_p0 = scmp.ge.s32.totalorder %s2371_s17, 1  ;;  %s2371_s17 = sphi %s2419_s17, %s14_s17   ;;  %s2367_s16 = sphi %s2417_s16, %s3575_s16   ;;  %s2363_s15 = sphi %s2415_s15, %s3574_s15  }
   0x3   : > { %p28_p1 = scmp.ge.s32.totalorder %s26_s18, 2  ;;  %p199_p2 = scmp.lt.s32.totalorder %s2371_s17, 3 }
   0x5   : > { %s3577_s18 = smov (%p28_p1, %s26_s18), 0  ;;  %p200_p3 = pnand %p2075_p0, %p199_p2 }
   0x7   : > { %203 = sbr.rel (%p200_p3) target bundleno = 870 (0x366), region = 36 }
   0xe   : > { %p241_p4 = scmp.lt.s32.totalorder %s2363_s15, 1  ;;  %v2079_v0 = vld.sshfl [vmem:[%s3563_s3] sm:$0x11 pattern:$0x75316420]  ;;  %v300_v1 = vlaneseq  ;;  %s2374_s25 = smov 111  }
   0xf   : > { %v2373_v2 = vmov 1966171168   ;;  %v296_v5 = vcombine.high %v2079_v0, %v2079_v0  ;;  %s2375_s26 = smov 15   ;;  %s2376_s27 = smov 47   ;;  %vm444_vm0 = vcmask 384000   ;;  %vm398_vm1 = vcmask 252928  }
  0x10   : > { %s3579_s15 = smov (!%p241_p4, %s2363_s15), 1  ;;  %v298_v3 = vunpack.c.l.s4 %v2373_v2  ;;  %v301_v4 = vshrl.u32 %v300_v1, 7  ;;  %s2377_s28 = smov 33   ;;  %vm421_vm2 = vcmask 269312   ;;  %vm375_vm3 = vcmask 138240  }
  0x11   : > { %s2265_s21 = smul.u32 96, %s3579_s15  ;;  %s2378_s29 = smov 31   ;;  %vm333_vm4 = vcmask 121856   ;;  %vm818_vm5 = vcmask 908288   ;;  %vm615_vm6 = vcmask 1039360   ;;  %vm467_vm7 = vcmask 400384  }
  0x12   : > { %v299_v6 = vunpack.c.0.s8 %v298_v3  ;;  %v316_v15 = vsub.s32 0, %v301_v4  ;;  %s2379_s30 = smov 17   ;;  %s2380_s5 = smov 49   ;;  %vm903_vm8 = vcmask 900096   ;;  %vm1503_vm9 = vcmask 924672  }
  0x13   : > { %s2442_s24 = scalar_lea.vmem %s3560_s0, %s2265_s21  ;;  %s2381_s6 = smov 127   ;;  %vm700_vm10 = vcmask 1031168   ;;  %vm988_vm11 = vcmask 785408   ;;  %vm785_vm12 = vcmask 916480   ;;  %vm1021_vm13 = vcmask 777216  }
  0x14   : > { %v302_v7 = vsub.s32 %v299_v6, %v301_v4  ;;  %v2445_v8 = vld [vmem:[%s2442_s24 + $0x8] sm:$0xf]  ;;  %v2448_v9 = vld [vmem:[%s2442_s24 + $0x14] sm:$0xf]  ;;  %v2451_v10 = vld [vmem:[%s2442_s24] sm:$0xff]  ;;  %s2382_s7 = smov 95  }
  0x15   : > { %v2455_v11 = vcombine.low %v2445_v8, %v2448_v9  ;;  %v2458_v12 = vld [vmem:[%s2442_s24 + $0xc] sm:$0xff]  ;;  %v2461_v16 = vld [vmem:[%s2442_s24 + $0x18] sm:$0xff]  ;;  %v2464_v17 = vld [vmem:[%s2442_s24 + $0x24] sm:$0xff]  ;;  %s2383_s8 = smov 96   ;;  %s2384_s9 = smov 112   ;;  %vm1106_vm14 = vcmask 769024  }
  0x16   : > { %v303_v13 = vrot.slane %v2079_v0, %v302_v7  ;;  %v310_v14 = vrot.slane %v296_v5, %v302_v7  ;;  %v2468_v18 = vcombine.high %v2451_v10, %v2458_v12  ;;  %v2472_v19 = vcombine.high %v2461_v16, %v2464_v17  ;;  %v2487_v33 = vld [vmem:[%s2442_s24 + $0x20] sm:$0xf]  ;;  %v2490_v34 = vld [vmem:[%s2442_s24 + $0x2c] sm:$0xf]  ;;  %v2497_v36 = vld [vmem:[%s2442_s24 + $0x30] sm:$0xff]  ;;  %s2385_s10 = smov 110  }
  0x17   : > { %798 = vrot.lane.b32.xlu0 %v2455_v11, %s2374_s25  ;;  %v2480_v24 = vcombine.low %v2451_v10, %v2458_v12  ;;  %v2494_v35 = vcombine.low %v2487_v33, %v2490_v34  ;;  %v2500_v37 = vld [vmem:[%s2442_s24 + $0x3c] sm:$0xff]  ;;  %v2504_v38 = vcombine.low %v2461_v16, %v2464_v17  ;;  %v2509_v39 = vld [vmem:[%s2442_s24 + $0x38] sm:$0xf]  ;;  %v2512_v40 = vld [vmem:[%s2442_s24 + $0x44] sm:$0xf]  ;;  %s2386_s11 = smov 126  }
  0x18   : > { %v312_v20 = vpack.i.b16 %v303_v13, %v303_v13  ;;  %v319_v21 = vpack.i.b16 %v310_v14, %v310_v14  ;;  %v353_v22 = vshrl.u32 %v303_v13, 16  ;;  %v360_v23 = vshrl.u32 %v310_v14, 16  ;;  %796 = vrot.lane.b32.xlu1 %v2468_v18, %s2374_s25  ;;  %v2525_v43 = vld [vmem:[%s2442_s24 + $0x48] sm:$0xff]  ;;  %v2528_v44 = vld [vmem:[%s2442_s24 + $0x54] sm:$0xff]  ;;  %v2537_v46 = vld [vmem:[%s2442_s24 + $0x50] sm:$0xf] }
  0x19   : > { %v2516_v41 = vcombine.high %v2497_v36, %v2500_v37  ;;  %v2522_v42 = vcombine.low %v2509_v39, %v2512_v40  ;;  %v2534_v45 = vcombine.low %v2497_v36, %v2500_v37  ;;  %v2540_v47 = vld [vmem:[%s2442_s24 + $0x5c] sm:$0xf]  ;;  %v2546_v48 = vcombine.high %v2525_v43, %v2528_v44  ;;  %s2387_s12 = smov 113   ;;  %s2388_s13 = smov 94  }
  0x1a   : > { %v317_v25 = vrot.slane %v312_v20, %v316_v15  ;;  %v324_v26 = vrot.slane %v319_v21, %v316_v15  ;;  %v354_v27 = vpack.i.b16 %v353_v22, %v353_v22  ;;  %v361_v28 = vpack.i.b16 %v360_v23, %v360_v23 }
  0x1b   : > { %802 = vrot.lane.b32.xlu0 %v2472_v19, %s2374_s25  ;;  %v2552_v49 = vcombine.low %v2537_v46, %v2540_v47  ;;  %v2558_v50 = vcombine.low %v2525_v43, %v2528_v44  ;;  %vm1648_vm15 = vcmask 523264  }
  0x1c   : > { %v359_v29 = vrot.slane %v354_v27, %v316_v15  ;;  %v366_v30 = vrot.slane %v361_v28, %v316_v15  ;;  %794 = vrot.lane.b32.xlu1 %v2480_v24, %s2374_s25  ;;  %v2080_v31 = vcombine.low %v317_v25, %v324_v26 }
  0x1e   : > { %v2081_v32 = vcombine.low %v359_v29, %v366_v30 }
  0x1f   : > { %330 = vrot.lane.b32.xlu0 %v2080_v31, %s2375_s26 }
  0x20   : > { %441 = vrot.lane.b32.xlu1 %v2080_v31, %s2376_s27 }
  0x23   : > { %418 = vrot.lane.b32.xlu0 %v2081_v32, %s2377_s28 }
  0x24   : > { %395 = vrot.lane.b32.xlu1 %v2080_v31, %s2378_s29 }
  0x27   : > { %372 = vrot.lane.b32.xlu0 %v2081_v32, %s2379_s30  ;;  %s2200_s30 = sshll.u32 %s3579_s15, 6 }
  0x28   : > { %804 = vrot.lane.b32.xlu1 %v2494_v35, %s2374_s25 }
  0x2b   : > { %800 = vrot.lane.b32.xlu0 %v2504_v38, %s2374_s25 }
  0x2c   : > { %808 = vrot.lane.b32.xlu1 %v2516_v41, %s2374_s25 }
  0x2f   : > { %810 = vrot.lane.b32.xlu0 %v2522_v42, %s2374_s25 }
  0x30   : > { %806 = vrot.lane.b32.xlu1 %v2534_v45, %s2374_s25 }
  0x33   : > { %814 = vrot.lane.b32.xlu0 %v2546_v48, %s2374_s25 }
  0x34   : > { %816 = vrot.lane.b32.xlu1 %v2552_v49, %s2374_s25 }
  0x37   : > { %812 = vrot.lane.b32.xlu0 %v2558_v50, %s2374_s25 }
  0x38   : > { %464 = vrot.lane.b32.xlu1 %v2081_v32, %s2380_s5 }
  0x3b   : > { %593 = vrot.lane.b32.xlu0 %v2468_v18, %s2381_s6 }
  0x3c   : > { %595 = vrot.lane.b32.xlu1 %v2455_v11, %s2381_s6 }
  0x3f   : > { %591 = vrot.lane.b32.xlu0 %v2480_v24, %s2381_s6 }
  0x40   : > { %601 = vrot.lane.b32.xlu1 %v2494_v35, %s2381_s6 }
  0x43   : > { %599 = vrot.lane.b32.xlu0 %v2472_v19, %s2381_s6 }
  0x44   : > { %607 = vrot.lane.b32.xlu1 %v2522_v42, %s2381_s6 }
  0x47   : > { %597 = vrot.lane.b32.xlu0 %v2504_v38, %s2381_s6 }
  0x48   : > { %613 = vrot.lane.b32.xlu1 %v2552_v49, %s2381_s6 }
  0x4b   : > { %605 = vrot.lane.b32.xlu0 %v2516_v41, %s2381_s6 }
  0x4c   : > { %1001 = vrot.lane.b32.xlu1 %v2455_v11, %s2382_s7 }
  0x4f   : > { %603 = vrot.lane.b32.xlu0 %v2534_v45, %s2381_s6 }
  0x53   : > { %611 = vrot.lane.b32.xlu0 %v2546_v48, %s2381_s6 }
  0x57   : > { %609 = vrot.lane.b32.xlu0 %v2558_v50, %s2381_s6 }
  0x5b   : > { %999 = vrot.lane.b32.xlu0 %v2468_v18, %s2382_s7 }
  0x89   : > { %v2582_v52 = vpop.permute.xlu0 %798 }
  0x8a   : > { %v2580_v51 = vpop.permute.xlu1 %796 }
  0x8d   : > { %v2586_v54 = vpop.permute.xlu0 %802 }
  0x8e   : > { %v2584_v53 = vpop.permute.xlu1 %794 }
  0x91   : > { %v2592_v62 = vpop.permute.xlu0 %330 }
  0x92   : > { %v442_v55 = vpop.permute.xlu1 %441 }
  0x93   : > { %v443_v56 = vrot.slane %v442_v55, 4 }
  0x95   : > { %v445_v57 = vsel %vm444_vm0, %v443_v56, %v442_v55  ;;  %v449_v58 = vmul.bf16 %v443_v56, %v2445_v8  ;;  %v451_v59 = vmul.bf16 %v443_v56, %v2448_v9  ;;  %v453_v0 = vmul.bf16 %v443_v56, %v2487_v33  ;;  %v419_v18 = vpop.permute.xlu0 %418 }
  0x96   : > { %v448_v60 = vmul.bf16 %v445_v57, %v2451_v10  ;;  %v450_v61 = vmul.bf16 %v445_v57, %v2458_v12  ;;  %v455_v1 = vmul.bf16 %v443_v56, %v2490_v34  ;;  %v452_v3 = vmul.bf16 %v445_v57, %v2461_v16  ;;  %v396_v5 = vpop.permute.xlu1 %395 }
  0x97   : > { %v2144_v63 = vcombine.low %v449_v58, %v451_v59  ;;  %v454_v4 = vmul.bf16 %v445_v57, %v2464_v17  ;;  %v457_v7 = vmul.bf16 %v443_v56, %v2509_v39  ;;  %v459_v11 = vmul.bf16 %v443_v56, %v2512_v40 }
  0x98   : > { %v2143_v2 = vcombine.high %v448_v60, %v450_v61  ;;  %v2147_v6 = vcombine.low %v453_v0, %v455_v1  ;;  %v456_v14 = vmul.bf16 %v445_v57, %v2497_v36  ;;  %v458_v15 = vmul.bf16 %v445_v57, %v2500_v37 }
  0x99   : > { %968 = vrot.lane.b32.xlu1 %v2144_v63, %s2383_s8  ;;  %v2146_v13 = vcombine.high %v452_v3, %v454_v4  ;;  %v2605_v20 = vrot.slane %v396_v5, 4  ;;  %v2150_v21 = vcombine.low %v457_v7, %v459_v11  ;;  %v2608_v22 = vrot.slane %v419_v18, 4  ;;  %v373_v11 = vpop.permute.xlu0 %372 }
  0x9a   : > { %966 = vrot.lane.b32.xlu0 %v2143_v2, %s2383_s8  ;;  %v461_v23 = vmul.bf16 %v443_v56, %v2537_v46  ;;  %v463_v25 = vmul.bf16 %v443_v56, %v2540_v47  ;;  %v2149_v26 = vcombine.high %v456_v14, %v458_v15  ;;  %v460_v27 = vmul.bf16 %v445_v57, %v2525_v43 }
  0x9b   : > { %v462_v28 = vmul.bf16 %v445_v57, %v2528_v44  ;;  %v2615_v29 = vsel %vm398_vm1, %v2605_v20, %v396_v5  ;;  %v403_v30 = vmul.bf16 %v2605_v20, %v2445_v8  ;;  %v405_v31 = vmul.bf16 %v2605_v20, %v2448_v9 }
  0x9c   : > { %v422_v32 = vsel %vm421_vm2, %v2608_v22, %v419_v18  ;;  %v2153_v55 = vcombine.low %v461_v23, %v463_v25  ;;  %v2626_v57 = vmul.bf16 %v2615_v29, %v2451_v10  ;;  %v2630_v58 = vmul.bf16 %v2615_v29, %v2458_v12 }
  0x9d   : > { %974 = vrot.lane.b32.xlu1 %v2147_v6, %s2383_s8  ;;  %v2152_v56 = vcombine.high %v460_v27, %v462_v28  ;;  %v2120_v59 = vcombine.low %v403_v30, %v405_v31  ;;  %v2635_v63 = vmul.bf16 %v422_v32, %v2451_v10  ;;  %v2638_v0 = vmul.bf16 %v422_v32, %v2458_v12 }
  0x9e   : > { %972 = vrot.lane.b32.xlu0 %v2146_v13, %s2383_s8  ;;  %v2119_v1 = vcombine.high %v2626_v57, %v2630_v58  ;;  %v2647_v5 = vmul.bf16 %v422_v32, %v2461_v16  ;;  %v2650_v6 = vmul.bf16 %v422_v32, %v2464_v17  ;;  %v2142_v7 = vcombine.low %v448_v60, %v450_v61 }
  0x9f   : > { %v2131_v2 = vcombine.high %v2635_v63, %v2638_v0  ;;  %v2657_v18 = vmul.bf16 %v422_v32, %v2497_v36  ;;  %v2662_v23 = vrot.slane %v373_v11, 4  ;;  %v2145_v25 = vcombine.low %v452_v3, %v454_v4 }
  0xa0   : > { %v2134_v13 = vcombine.high %v2647_v5, %v2650_v6  ;;  %v2669_v61 = vmul.bf16 %v422_v32, %v2525_v43  ;;  %v2148_v31 = vcombine.low %v456_v14, %v458_v15  ;;  %v426_v3 = vmul.bf16 %v2608_v22, %v2445_v8 }
  0xa1   : > { %980 = vrot.lane.b32.xlu1 %v2150_v21, %s2383_s8  ;;  %v2660_v21 = vmul.bf16 %v422_v32, %v2500_v37  ;;  %v376_v30 = vsel %vm375_vm3, %v2662_v23, %v373_v11  ;;  %v428_v4 = vmul.bf16 %v2608_v22, %v2448_v9 }
  0xa2   : > { %978 = vrot.lane.b32.xlu0 %v2149_v26, %s2383_s8  ;;  %v2672_v26 = vmul.bf16 %v422_v32, %v2528_v44  ;;  %v381_v32 = vmul.bf16 %v376_v30, %v2458_v12 }
  0xa3   : > { %v2137_v60 = vcombine.high %v2657_v18, %v2660_v21  ;;  %v2132_v14 = vcombine.low %v426_v3, %v428_v4  ;;  %v438_v4 = vmul.bf16 %v2608_v22, %v2537_v46 }
  0xa5   : > { %986 = vrot.lane.b32.xlu1 %v2153_v55, %s2383_s8  ;;  %v2140_v55 = vcombine.high %v2669_v61, %v2672_v26 }
  0xa6   : > { %984 = vrot.lane.b32.xlu0 %v2152_v56, %s2383_s8  ;;  %v379_v56 = vmul.bf16 %v376_v30, %v2451_v10 }
  0xa8   : > { %v2107_v15 = vcombine.high %v379_v56, %v381_v32 }
  0xa9   : > { %765 = vrot.lane.b32.xlu1 %v2120_v59, %s2384_s9  ;;  %v2151_v59 = vcombine.low %v460_v27, %v462_v28  ;;  %v383_v27 = vmul.bf16 %v376_v30, %v2461_v16  ;;  %v385_v28 = vmul.bf16 %v376_v30, %v2464_v17 }
  0xaa   : > { %763 = vrot.lane.b32.xlu0 %v2119_v1, %s2384_s9  ;;  %v430_v1 = vmul.bf16 %v2608_v22, %v2487_v33 }
  0xad   : > { %964 = vrot.lane.b32.xlu1 %v2142_v7, %s2383_s8  ;;  %v2106_v7 = vcombine.low %v379_v56, %v381_v32  ;;  %v380_v32 = vmul.bf16 %v2662_v23, %v2445_v8 }
  0xae   : > { %881 = vrot.lane.b32.xlu0 %v2131_v2, %s2385_s10  ;;  %v432_v2 = vmul.bf16 %v2608_v22, %v2490_v34 }
  0xb0   : > { %v2135_v11 = vcombine.low %v430_v1, %v432_v2  ;;  %v387_v1 = vmul.bf16 %v376_v30, %v2497_v36  ;;  %v389_v2 = vmul.bf16 %v376_v30, %v2500_v37 }
  0xb1   : > { %970 = vrot.lane.b32.xlu1 %v2145_v25, %s2383_s8  ;;  %v436_v25 = vmul.bf16 %v2608_v22, %v2512_v40 }
  0xb2   : > { %887 = vrot.lane.b32.xlu0 %v2134_v13, %s2385_s10  ;;  %v434_v13 = vmul.bf16 %v2608_v22, %v2509_v39 }
  0xb4   : > { %v2138_v3 = vcombine.low %v434_v13, %v436_v25  ;;  %v386_v13 = vmul.bf16 %v2662_v23, %v2490_v34  ;;  %v2113_v25 = vcombine.high %v387_v1, %v389_v2 }
  0xb5   : > { %976 = vrot.lane.b32.xlu1 %v2148_v31, %s2383_s8  ;;  %v2110_v31 = vcombine.high %v383_v27, %v385_v28 }
  0xb6   : > { %893 = vrot.lane.b32.xlu0 %v2137_v60, %s2385_s10  ;;  %v2699_v60 = vpop.permute.xlu0 %800 }
  0xb9   : > { %982 = vrot.lane.b32.xlu1 %v2151_v59, %s2383_s8  ;;  %v382_v59 = vmul.bf16 %v2662_v23, %v2448_v9 }
  0xba   : > { %899 = vrot.lane.b32.xlu0 %v2140_v55, %s2385_s10  ;;  %v440_v55 = vmul.bf16 %v2608_v22, %v2540_v47  ;;  %v2707_v56 = vpop.permute.xlu0 %810 }
  0xbb   : > { %v2108_v22 = vcombine.low %v380_v32, %v382_v59 }
  0xbd   : > { %883 = vrot.lane.b32.xlu1 %v2132_v14, %s2385_s10  ;;  %v2109_v14 = vcombine.low %v383_v27, %v385_v28  ;;  %v388_v28 = vmul.bf16 %v2662_v23, %v2509_v39 }
  0xbe   : > { %678 = vrot.lane.b32.xlu0 %v2107_v15, %s2386_s11  ;;  %v2141_v15 = vcombine.low %v438_v4, %v440_v55  ;;  %v391_v4 = vmul.bf16 %v376_v30, %v2525_v43  ;;  %v393_v55 = vmul.bf16 %v376_v30, %v2528_v44 }
  0xc1   : > { %889 = vrot.lane.b32.xlu1 %v2135_v11, %s2385_s10  ;;  %v384_v11 = vmul.bf16 %v2662_v23, %v2487_v33 }
  0xc2   : > { %676 = vrot.lane.b32.xlu0 %v2106_v7, %s2386_s11  ;;  %v2719_v7 = vpop.permute.xlu0 %814 }
  0xc3   : > { %v2111_v27 = vcombine.low %v384_v11, %v386_v13  ;;  %v2741_v11 = vpop.permute.xlu1 %804 }
  0xc5   : > { %895 = vrot.lane.b32.xlu1 %v2138_v3, %s2385_s10  ;;  %v2112_v3 = vcombine.low %v387_v1, %v389_v2  ;;  %v2115_v2 = vcombine.low %v391_v4, %v393_v55 }
  0xc6   : > { %684 = vrot.lane.b32.xlu0 %v2110_v31, %s2386_s11  ;;  %v390_v31 = vmul.bf16 %v2662_v23, %v2512_v40  ;;  %v2733_v32 = vpop.permute.xlu0 %812 }
  0xc7   : > { %v2748_v13 = vpop.permute.xlu1 %808 }
  0xc8   : > { %v2114_v59 = vcombine.low %v388_v28, %v390_v31  ;;  %v408_v28 = vmul.bf16 %v2615_v29, %v2464_v17 }
  0xc9   : > { %901 = vrot.lane.b32.xlu1 %v2141_v15, %s2385_s10  ;;  %v394_v15 = vmul.bf16 %v2662_v23, %v2540_v47 }
  0xca   : > { %682 = vrot.lane.b32.xlu0 %v2109_v14, %s2386_s11  ;;  %v392_v14 = vmul.bf16 %v2662_v23, %v2537_v46  ;;  %v2745_v30 = vpop.permute.xlu0 %593  ;;  %v2130_v23 = vcombine.low %v2635_v63, %v2638_v0 }
  0xcc   : > { %v2117_v1 = vcombine.low %v392_v14, %v394_v15 }
  0xcd   : > { %680 = vrot.lane.b32.xlu1 %v2108_v22, %s2386_s11  ;;  %v2116_v22 = vcombine.high %v391_v4, %v393_v55  ;;  %v2765_v4 = vpop.permute.xlu1 %806  ;;  %v410_v55 = vmul.bf16 %v2615_v29, %v2497_v36 }
  0xce   : > { %690 = vrot.lane.b32.xlu0 %v2113_v25, %s2386_s11  ;;  %v2118_v25 = vcombine.low %v2626_v57, %v2630_v58  ;;  %v2759_v31 = vpop.permute.xlu0 %591  ;;  %v2136_v58 = vcombine.low %v2657_v18, %v2660_v21  ;;  %v409_v21 = vmul.bf16 %v2605_v20, %v2490_v34 }
  0xd1   : > { %686 = vrot.lane.b32.xlu1 %v2111_v27, %s2386_s11  ;;  %v406_v27 = vmul.bf16 %v2615_v29, %v2461_v16  ;;  %v2773_v0 = vpop.permute.xlu1 %816 }
  0xd2   : > { %688 = vrot.lane.b32.xlu0 %v2112_v3, %s2386_s11  ;;  %v2133_v3 = vcombine.low %v2647_v5, %v2650_v6  ;;  %v2769_v57 = vpop.permute.xlu0 %599  ;;  %v2139_v5 = vcombine.low %v2669_v61, %v2672_v26  ;;  %v2795_v26 = vrot.slane %v2592_v62, 4 }
  0xd3   : > { %v2122_v63 = vcombine.high %v406_v27, %v408_v28  ;;  %v2121_v6 = vcombine.low %v406_v27, %v408_v28 }
  0xd5   : > { %692 = vrot.lane.b32.xlu1 %v2114_v59, %s2386_s11  ;;  %v412_v59 = vmul.bf16 %v2615_v29, %v2500_v37  ;;  %v2787_v18 = vpop.permute.xlu1 %464 }
  0xd6   : > { %696 = vrot.lane.b32.xlu0 %v2116_v22, %s2386_s11  ;;  %v2784_v14 = vpop.permute.xlu0 %597 }
  0xd7   : > { %v2125_v61 = vcombine.high %v410_v55, %v412_v59 }
  0xd9   : > { %698 = vrot.lane.b32.xlu1 %v2117_v1, %s2386_s11  ;;  %v2799_v15 = vpop.permute.xlu1 %595 }
  0xda   : > { %694 = vrot.lane.b32.xlu0 %v2115_v2, %s2386_s11  ;;  %v2802_v22 = vpop.permute.xlu0 %605  ;;  %v2806_v2 = vsel %vm333_vm4, %v2795_v26, %v2592_v62  ;;  %v411_v62 = vmul.bf16 %v2605_v20, %v2509_v39 }
  0xdb   : > { %v339_v27 = vmul.bf16 %v2806_v2, %v2458_v12 }
  0xdd   : > { %879 = vrot.lane.b32.xlu1 %v2130_v23, %s2385_s10  ;;  %v2811_v23 = vpop.permute.xlu1 %601 }
  0xde   : > { %761 = vrot.lane.b32.xlu0 %v2118_v25, %s2384_s9  ;;  %v337_v25 = vmul.bf16 %v2806_v2, %v2451_v10  ;;  %v2817_v28 = vpop.permute.xlu0 %603 }
  0xe1   : > { %885 = vrot.lane.b32.xlu1 %v2133_v3, %s2385_s10  ;;  %v2083_v3 = vcombine.high %v337_v25, %v339_v27 }
  0xe2   : > { %769 = vrot.lane.b32.xlu0 %v2122_v63, %s2384_s9  ;;  %v2828_v63 = vpop.permute.xlu1 %607 }
  0xe5   : > { %891 = vrot.lane.b32.xlu1 %v2136_v58, %s2385_s10  ;;  %v2831_v58 = vpop.permute.xlu0 %611 }
  0xe6   : > { %1005 = vrot.lane.b32.xlu0 %v2472_v19, %s2382_s7  ;;  %v407_v19 = vmul.bf16 %v2605_v20, %v2487_v33 }
  0xe8   : > { %v2123_v1 = vcombine.low %v407_v19, %v409_v21  ;;  %v340_v21 = vmul.bf16 %v2795_v26, %v2448_v9 }
  0xe9   : > { %897 = vrot.lane.b32.xlu1 %v2139_v5, %s2385_s10  ;;  %v414_v5 = vmul.bf16 %v2615_v29, %v2525_v43  ;;  %v2844_v19 = vpop.permute.xlu0 %609 }
  0xea   : > { %767 = vrot.lane.b32.xlu0 %v2121_v6, %s2384_s9  ;;  %v416_v6 = vmul.bf16 %v2615_v29, %v2528_v44  ;;  %v338_v29 = vmul.bf16 %v2795_v26, %v2445_v8 }
  0xed   : > { %997 = vrot.lane.b32.xlu1 %v2480_v24, %s2382_s7  ;;  %v2124_v24 = vcombine.low %v410_v55, %v412_v59  ;;  %v2842_v55 = vpop.permute.xlu1 %613  ;;  %v2128_v59 = vcombine.high %v414_v5, %v416_v6 }
  0xee   : > { %775 = vrot.lane.b32.xlu0 %v2125_v61, %s2384_s9 }
  0xf1   : > { %771 = vrot.lane.b32.xlu1 %v2123_v1, %s2384_s9  ;;  %v2855_v61 = vpop.permute.xlu1 %1001  ;;  %v2859_v1 = vpop.permute.xlu0 %999 }
  0xf2   : > { %1011 = vrot.lane.b32.xlu0 %v2516_v41, %s2382_s7  ;;  %v413_v41 = vmul.bf16 %v2605_v20, %v2512_v40  ;;  %3568 = vst [vmem:[#allocation2_spill] sm:$0xff] %v2855_v61  ;;  %3569 = vst [vmem:[#allocation3_spill] sm:$0xff] %v2859_v1  ;;  %v826_v61 = vsel %vm818_vm5, %v2719_v7, %v2773_v0 }
  0xf5   : > { %1007 = vrot.lane.b32.xlu1 %v2494_v35, %s2382_s7  ;;  %v2126_v35 = vcombine.low %v411_v62, %v413_v41  ;;  %v415_v41 = vmul.bf16 %v2605_v20, %v2537_v46 }
  0xf6   : > { %773 = vrot.lane.b32.xlu0 %v2124_v24, %s2384_s9  ;;  %v2084_v24 = vcombine.low %v338_v29, %v340_v21 }
  0xf9   : > { %1003 = vrot.lane.b32.xlu1 %v2504_v38, %s2382_s7  ;;  %v820_v38 = vsel %vm818_vm5, %v2580_v51, %v2582_v52 }
  0xfa   : > { %1289 = vrot.lane.b32.xlu0 %v2083_v3, %s2387_s12 }
  0xfd   : > { %777 = vrot.lane.b32.xlu1 %v2126_v35, %s2384_s9  ;;  %v2127_v35 = vcombine.low %v414_v5, %v416_v6 }
  0xfe   : > { %1385 = vrot.lane.b32.xlu0 %v820_v38, %s2387_s12 }
 0x101   : > { %1013 = vrot.lane.b32.xlu1 %v2522_v42, %s2382_s7  ;;  %v2082_v42 = vcombine.low %v337_v25, %v339_v27  ;;  %v343_v25 = vmul.bf16 %v2806_v2, %v2464_v17 }
 0x102   : > { %781 = vrot.lane.b32.xlu0 %v2128_v59, %s2384_s9 }
 0x105   : > { %1009 = vrot.lane.b32.xlu1 %v2534_v45, %s2382_s7  ;;  %v417_v45 = vmul.bf16 %v2605_v20, %v2540_v47 }
 0x106   : > { %1017 = vrot.lane.b32.xlu0 %v2546_v48, %s2382_s7  ;;  %v341_v48 = vmul.bf16 %v2806_v2, %v2461_v16 }
 0x107   : > { %v2129_v38 = vcombine.low %v415_v41, %v417_v45  ;;  %v345_v41 = vmul.bf16 %v2806_v2, %v2497_v36 }
 0x108   : > { %v2086_v20 = vcombine.high %v341_v48, %v343_v25 }
 0x109   : > { %1291 = vrot.lane.b32.xlu1 %v2084_v24, %s2387_s12  ;;  %v819_v24 = vsel %vm818_vm5, %v2584_v53, %v2580_v51 }
 0x10a   : > { %1287 = vrot.lane.b32.xlu0 %v2082_v42, %s2387_s12  ;;  %v2085_v42 = vcombine.low %v341_v48, %v343_v25 }
 0x10b   : > { %v2863_v62 = vpop.permute.xlu1 %968 }
 0x10c   : > { %v2869_v3 = vpop.permute.xlu0 %966 }
 0x10d   : > { %1387 = vrot.lane.b32.xlu1 %v2582_v52, %s2387_s12  ;;  %v822_v52 = vsel %vm818_vm5, %v2586_v54, %v2741_v11 }
 0x10e   : > { %779 = vrot.lane.b32.xlu0 %v2127_v35, %s2384_s9  ;;  %v342_v35 = vmul.bf16 %v2795_v26, %v2487_v33 }
 0x10f   : > { %v2878_v27 = vpop.permute.xlu1 %974 }
 0x110   : > { %v2880_v59 = vpop.permute.xlu0 %972 }
 0x111   : > { %783 = vrot.lane.b32.xlu1 %v2129_v38, %s2384_s9  ;;  %v344_v38 = vmul.bf16 %v2795_v26, %v2490_v34 }
 0x112   : > { %1295 = vrot.lane.b32.xlu0 %v2086_v20, %s2387_s12 }
 0x113   : > { %v2884_v5 = vpop.permute.xlu1 %980  ;;  %v2087_v25 = vcombine.low %v342_v35, %v344_v38  ;;  %v351_v35 = vmul.bf16 %v2806_v2, %v2528_v44 }
 0x114   : > { %v2886_v6 = vpop.permute.xlu0 %978 }
 0x115   : > { %1019 = vrot.lane.b32.xlu1 %v2552_v49, %s2382_s7  ;;  %v347_v49 = vmul.bf16 %v2806_v2, %v2500_v37 }
 0x116   : > { %1391 = vrot.lane.b32.xlu0 %v822_v52, %s2387_s12  ;;  %v824_v52 = vsel %vm818_vm5, %v2748_v13, %v2707_v56 }
 0x117   : > { %v2894_v29 = vpop.permute.xlu1 %986  ;;  %v2089_v53 = vcombine.high %v345_v41, %v347_v49 }
 0x118   : > { %v2896_v21 = vpop.permute.xlu0 %984 }
 0x119   : > { %1383 = vrot.lane.b32.xlu1 %v819_v24, %s2387_s12 }
 0x11a   : > { %1293 = vrot.lane.b32.xlu0 %v2085_v42, %s2387_s12 }
 0x11b   : > { %v2907_v45 = vpop.permute.xlu1 %765 }
 0x11c   : > { %v2913_v51 = vpop.permute.xlu0 %763 }
 0x11d   : > { %3570 = vst [vmem:[#allocation4_spill] sm:$0xff] %v2913_v51  ;;  %1015 = vrot.lane.b32.xlu1 %v2558_v50, %s2382_s7  ;;  %v2088_v50 = vcombine.low %v345_v41, %v347_v49  ;;  %v821_v41 = vsel %vm818_vm5, %v2699_v60, %v2586_v54  ;;  %s3536_s7 = scalar_lea.vmem %s3564_s4, %s2200_s30 }
 0x11e   : > { %1301 = vrot.lane.b32.xlu0 %v2089_v53, %s2387_s12  ;;  %v349_v53 = vmul.bf16 %v2806_v2, %v2525_v43 }
 0x11f   : > { %v2918_v48 = vpop.permute.xlu1 %964 }
 0x120   : > { %v2920_v20 = vpop.permute.xlu0 %881  ;;  %v2092_v2 = vcombine.high %v349_v53, %v351_v35  ;;  %v2091_v51 = vcombine.low %v349_v53, %v351_v35  ;;  %v2975_v53 = vrot.slane %v2787_v18, 4 }
 0x121   : > { %1297 = vrot.lane.b32.xlu1 %v2087_v25, %s2387_s12  ;;  %v346_v25 = vmul.bf16 %v2795_v26, %v2509_v39 }
 0x122   : > { %1397 = vrot.lane.b32.xlu0 %v824_v52, %s2387_s12  ;;  %v348_v52 = vmul.bf16 %v2795_v26, %v2512_v40 }
 0x123   : > { %v2927_v24 = vpop.permute.xlu1 %970 }
 0x124   : > { %v2929_v42 = vpop.permute.xlu0 %887 }
 0x125   : > { %1393 = vrot.lane.b32.xlu1 %v2741_v11, %s2387_s12 }
 0x126   : > { %1299 = vrot.lane.b32.xlu0 %v2088_v50, %s2387_s12  ;;  %v2090_v50 = vcombine.low %v346_v25, %v348_v52  ;;  %v350_v52 = vmul.bf16 %v2795_v26, %v2537_v46 }
 0x127   : > { %v2938_v38 = vpop.permute.xlu1 %976 }
 0x128   : > { %v2947_v49 = vpop.permute.xlu0 %893 }
 0x129   : > { %1389 = vrot.lane.b32.xlu1 %v821_v41, %s2387_s12  ;;  %v352_v41 = vmul.bf16 %v2795_v26, %v2540_v47 }
 0x12a   : > { %1307 = vrot.lane.b32.xlu0 %v2092_v2, %s2387_s12 }
 0x12b   : > { %v2951_v11 = vpop.permute.xlu1 %982  ;;  %v2093_v26 = vcombine.low %v350_v52, %v352_v41 }
 0x12c   : > { %v2953_v1 = vpop.permute.xlu0 %899 }
 0x12d   : > { %1303 = vrot.lane.b32.xlu1 %v2090_v50, %s2387_s12 }
 0x12e   : > { %1403 = vrot.lane.b32.xlu0 %v826_v61, %s2387_s12  ;;  %v823_v61 = vsel %vm818_vm5, %v2765_v4, %v2748_v13  ;;  %v616_v13 = vsel %vm615_vm6, %v2759_v31, %v2745_v30  ;;  %v2991_v4 = vsel %vm467_vm7, %v2975_v53, %v2787_v18  ;;  %v825_v18 = vsel %vm818_vm5, %v2733_v32, %v2719_v7 }
 0x12f   : > { %v884_v54 = vpop.permute.xlu1 %883  ;;  %v471_v52 = vmul.bf16 %v2991_v4, %v2451_v10  ;;  %v473_v41 = vmul.bf16 %v2991_v4, %v2458_v12  ;;  %v472_v32 = vmul.bf16 %v2975_v53, %v2445_v8 }
 0x130   : > { %v2960_v60 = vpop.permute.xlu0 %678 }
 0x131   : > { %1399 = vrot.lane.b32.xlu1 %v2707_v56, %s2387_s12  ;;  %v617_v56 = vsel %vm615_vm6, %v2745_v30, %v2799_v15  ;;  %v619_v30 = vsel %vm615_vm6, %v2769_v57, %v2811_v23  ;;  %v2155_v10 = vcombine.high %v471_v52, %v473_v41 }
 0x132   : > { %1305 = vrot.lane.b32.xlu0 %v2091_v51, %s2387_s12 }
 0x133   : > { %v890_v25 = vpop.permute.xlu1 %889 }
 0x134   : > { %v2972_v2 = vpop.permute.xlu0 %676  ;;  %v907_v8 = vsel %vm903_vm8, %v2929_v42, %v890_v25 }
 0x135   : > { %1395 = vrot.lane.b32.xlu1 %v823_v61, %s2387_s12 }
 0x136   : > { %1313 = vrot.lane.b32.xlu0 %v617_v56, %s2387_s12 }
 0x137   : > { %v2982_v51 = vpop.permute.xlu1 %895 }
 0x138   : > { %v2984_v35 = vpop.permute.xlu0 %684 }
 0x139   : > { %1309 = vrot.lane.b32.xlu1 %v2093_v26, %s2387_s12  ;;  %v618_v26 = vsel %vm615_vm6, %v2784_v14, %v2769_v57  ;;  %v905_v57 = vsel %vm903_vm8, %v2920_v20, %v884_v54 }
 0x13a   : > { %1311 = vrot.lane.b32.xlu0 %v616_v13, %s2387_s12  ;;  %v474_v13 = vmul.bf16 %v2975_v53, %v2448_v9 }
 0x13b   : > { %v2995_v50 = vpop.permute.xlu1 %901 }
 0x13c   : > { %v2997_v61 = vpop.permute.xlu0 %682 }
 0x13d   : > { %1405 = vrot.lane.b32.xlu1 %v2773_v0, %s2387_s12 }
 0x13e   : > { %1319 = vrot.lane.b32.xlu0 %v619_v30, %s2387_s12 }
 0x13f   : > { %v3009_v31 = vpop.permute.xlu1 %680 }
 0x140   : > { %v3014_v56 = vpop.permute.xlu0 %690 }
 0x141   : > { %1401 = vrot.lane.b32.xlu1 %v825_v18, %s2387_s12 }
 0x142   : > { %1084 = vrot.lane.b32.xlu0 %v2155_v10, %s2388_s13 }
 0x143   : > { %v3018_v12 = vpop.permute.xlu1 %686 }
 0x144   : > { %v3020_v0 = vpop.permute.xlu0 %688 }
 0x145   : > { %1315 = vrot.lane.b32.xlu1 %v2799_v15, %s2387_s12  ;;  %v2156_v15 = vcombine.low %v472_v32, %v474_v13 }
 0x146   : > { %1317 = vrot.lane.b32.xlu0 %v618_v26, %s2387_s12 }
 0x147   : > { %v3028_v7 = vpop.permute.xlu1 %692 }
 0x148   : > { %v3034_v30 = vpop.permute.xlu0 %696 }
 0x149   : > { %1321 = vrot.lane.b32.xlu1 %v2811_v23, %s2387_s12  ;;  %v2154_v23 = vcombine.low %v471_v52, %v473_v41  ;;  %v476_v52 = vmul.bf16 %v2975_v53, %v2487_v33 }
 0x14a   : > { %1409 = vrot.lane.b32.xlu0 %v905_v57, %s2387_s12 }
 0x14b   : > { %v3041_v14 = vpop.permute.xlu1 %698 }
 0x14c   : > { %v3043_v18 = vpop.permute.xlu0 %694 }
 0x14d   : > { %1086 = vrot.lane.b32.xlu1 %v2156_v15, %s2388_s13 }
 0x14e   : > { %1415 = vrot.lane.b32.xlu0 %v907_v8, %s2387_s12 }
 0x14f   : > { %v880_v9 = vpop.permute.xlu1 %879 }
 0x150   : > { %v3049_v10 = vpop.permute.xlu0 %761  ;;  %v904_v13 = vsel %vm903_vm8, %v880_v9, %v2920_v20  ;;  %v621_v9 = vsel %vm615_vm6, %v2802_v22, %v2828_v63 }
 0x151   : > { %1411 = vrot.lane.b32.xlu1 %v884_v54, %s2387_s12  ;;  %v478_v54 = vmul.bf16 %v2975_v53, %v2490_v34 }
 0x152   : > { %1082 = vrot.lane.b32.xlu0 %v2154_v23, %s2388_s13 }
 0x153   : > { %v886_v26 = vpop.permute.xlu1 %885  ;;  %v2159_v20 = vcombine.low %v476_v52, %v478_v54 }
 0x154   : > { %v3053_v57 = vpop.permute.xlu0 %769  ;;  %v906_v41 = vsel %vm903_vm8, %v886_v26, %v2929_v42  ;;  %v475_v26 = vmul.bf16 %v2991_v4, %v2461_v16 }
 0x155   : > { %1417 = vrot.lane.b32.xlu1 %v890_v25, %s2387_s12 }
 0x156   : > { %1327 = vrot.lane.b32.xlu0 %v2828_v63, %s2387_s12  ;;  %v909_v63 = vsel %vm903_vm8, %v2947_v49, %v2982_v51 }
 0x157   : > { %v892_v32 = vpop.permute.xlu1 %891 }
 0x158   : > { %v3060_v15 = vpop.permute.xlu0 %1005  ;;  %v908_v23 = vsel %vm903_vm8, %v892_v32, %v2947_v49  ;;  %v623_v32 = vsel %vm615_vm6, %v2831_v58, %v2842_v55  ;;  %v911_v49 = vsel %vm903_vm8, %v2953_v1, %v2995_v50 }
 0x159   : > { %1407 = vrot.lane.b32.xlu1 %v904_v13, %s2387_s12  ;;  %v477_v13 = vmul.bf16 %v2991_v4, %v2464_v17  ;;  %v479_v17 = vmul.bf16 %v2991_v4, %v2497_v36 }
 0x15a   : > { %1423 = vrot.lane.b32.xlu0 %v2982_v51, %s2387_s12 }
 0x15b   : > { %v3069_v25 = vpop.permute.xlu1 %897  ;;  %v2158_v16 = vcombine.high %v475_v26, %v477_v13 }
 0x15c   : > { %v3073_v8 = vpop.permute.xlu0 %767 }
 0x15d   : > { %1413 = vrot.lane.b32.xlu1 %v906_v41, %s2387_s12 }
 0x15e   : > { %1092 = vrot.lane.b32.xlu0 %v2159_v20, %s2388_s13  ;;  %v481_v20 = vmul.bf16 %v2991_v4, %v2500_v37  ;;  %v2157_v37 = vcombine.low %v475_v26, %v477_v13  ;;  %v480_v13 = vmul.bf16 %v2975_v53, %v2509_v39  ;;  %v484_v39 = vmul.bf16 %v2975_v53, %v2537_v46 }
 0x15f   : > { %v3077_v33 = vpop.permute.xlu1 %997 }
 0x160   : > { %v3079_v34 = vpop.permute.xlu0 %775 }
 0x161   : > { %1325 = vrot.lane.b32.xlu1 %v621_v9, %s2387_s12  ;;  %v620_v9 = vsel %vm615_vm6, %v2817_v28, %v2802_v22  ;;  %v2160_v28 = vcombine.low %v479_v17, %v481_v20 }
 0x162   : > { %1419 = vrot.lane.b32.xlu0 %v908_v23, %s2387_s12 }
 0x163   : > { %v3088_v42 = vpop.permute.xlu1 %771 }
 0x164   : > { %v3094_v52 = vpop.permute.xlu0 %1011 }
 0x165   : > { %1421 = vrot.lane.b32.xlu1 %v909_v63, %s2387_s12  ;;  %v2161_v63 = vcombine.high %v479_v17, %v481_v20 }
 0x166   : > { %1331 = vrot.lane.b32.xlu0 %v623_v32, %s2387_s12 }
 0x167   : > { %v3104_v54 = vpop.permute.xlu1 %1007 }
 0x168   : > { %v3106_v41 = vpop.permute.xlu0 %773 }
 0x169   : > { %1090 = vrot.lane.b32.xlu1 %v2158_v16, %s2388_s13  ;;  %v622_v16 = vsel %vm615_vm6, %v2844_v19, %v2831_v58  ;;  %v482_v58 = vmul.bf16 %v2975_v53, %v2512_v40  ;;  %v486_v40 = vmul.bf16 %v2975_v53, %v2540_v47 }
 0x16a   : > { %1427 = vrot.lane.b32.xlu0 %v911_v49, %s2387_s12 }
 0x16b   : > { %v3117_v51 = vpop.permute.xlu1 %1003  ;;  %v2162_v17 = vcombine.low %v480_v13, %v482_v58  ;;  %v483_v13 = vmul.bf16 %v2991_v4, %v2525_v43  ;;  %v485_v58 = vmul.bf16 %v2991_v4, %v2528_v44  ;;  %v992_v44 = vsel %vm988_vm11, %v2880_v59, %v2878_v27 }
 0x16c   : > { %v1290_v23 = vpop.permute.xlu0 %1289 }
 0x16d   : > { %1323 = vrot.lane.b32.xlu1 %v620_v9, %s2387_s12 }
 0x16e   : > { %1096 = vrot.lane.b32.xlu0 %v2161_v63, %s2388_s13 }
 0x16f   : > { %v3124_v36 = vpop.permute.xlu1 %777 }
 0x170   : > { %v1386_v32 = vpop.permute.xlu0 %1385 }
 0x171   : > { %1088 = vrot.lane.b32.xlu1 %v2157_v37, %s2388_s13  ;;  %v910_v37 = vsel %vm903_vm8, %v3069_v25, %v2953_v1  ;;  %v989_v1 = vsel %vm988_vm11, %v2918_v48, %v2869_v3  ;;  %v704_v48 = vsel %vm700_vm10, %v2984_v35, %v3018_v12 }
 0x172   : > { %1329 = vrot.lane.b32.xlu0 %v622_v16, %s2387_s12 }
 0x173   : > { %v3131_v49 = vpop.permute.xlu1 %1013 }
 0x174   : > { %v3133_v22 = vpop.permute.xlu0 %781 }
 0x175   : > { %1333 = vrot.lane.b32.xlu1 %v2842_v55, %s2387_s12 }
 0x176   : > { %1094 = vrot.lane.b32.xlu0 %v2160_v28, %s2388_s13  ;;  %v2165_v28 = vcombine.low %v484_v39, %v486_v40  ;;  %v2163_v40 = vcombine.low %v483_v13, %v485_v58 }
 0x177   : > { %v3138_v26 = vpop.permute.xlu1 %1009 }
 0x178   : > { %v3144_v19 = vpop.permute.xlu0 %1017 }
 0x179   : > { %1429 = vrot.lane.b32.xlu1 %v2995_v50, %s2387_s12 }
 0x17a   : > { %1339 = vrot.lane.b32.xlu0 %v3009_v31, %s2387_s12 }
 0x17b   : > { %v1292_v55 = vpop.permute.xlu1 %1291 }
 0x17c   : > { %v1288_v20 = vpop.permute.xlu0 %1287  ;;  %v1505_v9 = vsel %vm1503_vm9, %v1290_v23, %v1292_v55 }
 0x17d   : > { %1098 = vrot.lane.b32.xlu1 %v2162_v17, %s2388_s13  ;;  %1661 = vmatprep.subr.bf16.mxu1 %v1505_v9  ;;  %v1504_v50 = vsel %vm1503_vm9, %v1288_v20, %v1290_v23  ;;  %v702_v23 = vsel %vm700_vm10, %v2960_v60, %v3009_v31  ;;  %v990_v31 = vsel %vm988_vm11, %v2869_v3, %v2863_v62 }
 0x17e   : > { %1435 = vrot.lane.b32.xlu0 %v2863_v62, %s2387_s12  ;;  %1662 = vmatpush1.bf16.msra.mxu1 %v1504_v50  ;;  %v2164_v20 = vcombine.high %v483_v13, %v485_v58  ;;  %v701_v3 = vsel %vm700_vm10, %v2972_v2, %v2960_v60  ;;  %v706_v60 = vsel %vm700_vm10, %v3014_v56, %v3028_v7 }
 0x17f   : > { %v1388_v63 = vpop.permute.xlu1 %1387  ;;  %v991_v13 = vsel %vm988_vm11, %v2927_v24, %v2880_v59  ;;  %v996_v59 = vsel %vm988_vm11, %v2896_v21, %v2894_v29 }
 0x180   : > { %v3162_v16 = vpop.permute.xlu0 %779  ;;  %v1537_v46 = vsel %vm1503_vm9, %v1386_v32, %v1388_v63 }
 0x181   : > { %1425 = vrot.lane.b32.xlu1 %v910_v37, %s2387_s12  ;;  %1734 = vmatprep.subr.bf16.mxu0 %v1537_v46  ;;  %v994_v46 = vsel %vm988_vm11, %v2886_v6, %v2884_v5 }
 0x182   : > { %1104 = vrot.lane.b32.xlu0 %v2165_v28, %s2388_s13 }
 0x183   : > { %v3167_v47 = vpop.permute.xlu1 %783 }
 0x184   : > { %v1296_v53 = vpop.permute.xlu0 %1295 }
 0x185   : > { %1337 = vrot.lane.b32.xlu1 %v702_v23, %s2387_s12 }
 0x186   : > { %1431 = vrot.lane.b32.xlu0 %v989_v1, %s2387_s12  ;;  %v705_v1 = vsel %vm700_vm10, %v3020_v0, %v3014_v56  ;;  %v708_v56 = vsel %vm700_vm10, %v3034_v30, %v3041_v14 }
 0x187   : > { %v3177_v25 = vpop.permute.xlu1 %1019 }
 0x188   : > { %v1392_v55 = vpop.permute.xlu0 %1391 }
 0x189   : > { %1433 = vrot.lane.b32.xlu1 %v990_v31, %s2387_s12 }
 0x18a   : > { %1343 = vrot.lane.b32.xlu0 %v704_v48, %s2387_s12 }
 0x18b   : > { %v1384_v17 = vpop.permute.xlu1 %1383 }
 0x18c   : > { %v1294_v9 = vpop.permute.xlu0 %1293  ;;  %v1536_v43 = vsel %vm1503_vm9, %v1384_v17, %v1386_v32  ;;  %v703_v32 = vsel %vm700_vm10, %v2997_v61, %v2984_v35 }
 0x18d   : > { %1102 = vrot.lane.b32.xlu1 %v2164_v20, %s2388_s13  ;;  %1735 = vmatpush1.bf16.msra.mxu0 %v1536_v43  ;;  %v1506_v2 = vsel %vm1503_vm9, %v1294_v9, %v1296_v53  ;;  %v707_v9 = vsel %vm700_vm10, %v3043_v18, %v3034_v30  ;;  %v993_v43 = vsel %vm988_vm11, %v2938_v38, %v2886_v6  ;;  %v3571_v30 = vld [vmem:[#allocation4_spill] sm:$0xff]  ;;  %v3572_v38 = vld [vmem:[#allocation2_spill] sm:$0xff] }
 0x18e   : > { %1439 = vrot.lane.b32.xlu0 %v992_v44, %s2387_s12  ;;  %v787_v18 = vsel %vm785_vm12, %v3571_v30, %v2907_v45 }
 0x18f   : > { %v3197_v62 = vpop.permute.xlu1 %1015 }
 0x190   : > { %v1302_v4 = vpop.permute.xlu0 %1301 }
 0x191   : > { %1335 = vrot.lane.b32.xlu1 %v701_v3, %s2387_s12 }
 0x192   : > { %1341 = vrot.lane.b32.xlu0 %v703_v32, %s2387_s12 }
 0x193   : > { %v1298_v39 = vpop.permute.xlu1 %1297 }
 0x194   : > { %v1398_v50 = vpop.permute.xlu0 %1397  ;;  %v1507_v63 = vsel %vm1503_vm9, %v1296_v53, %v1298_v39  ;;  %v3573_v39 = vld [vmem:[#allocation3_spill] sm:$0xff] }
 0x195   : > { %1100 = vrot.lane.b32.xlu1 %v2163_v40, %s2388_s13  ;;  %1663 = vmatprep.subr.bf16.mxu1 %v1507_v63  ;;  %v1023_v40 = vsel %vm1021_vm13, %v3573_v39, %v3572_v38 }
 0x196   : > { %1349 = vrot.lane.b32.xlu0 %v706_v60, %s2387_s12  ;;  %1664 = vmatpush1.bf16.msra.mxu1 %v1506_v2  ;;  %v786_v2 = vsel %vm785_vm12, %v3049_v10, %v3571_v30  ;;  %v789_v10 = vsel %vm785_vm12, %v3053_v57, %v3088_v42  ;;  %v1026_v30 = vsel %vm1021_vm13, %v3138_v26, %v3094_v52 }
 0x197   : > { %v1394_v35 = vpop.permute.xlu1 %1393 }
 0x198   : > { %v1300_v61 = vpop.permute.xlu0 %1299  ;;  %v1539_v37 = vsel %vm1503_vm9, %v1392_v55, %v1394_v35  ;;  %v995_v35 = vsel %vm988_vm11, %v2951_v11, %v2896_v21  ;;  %v1025_v21 = vsel %vm1021_vm13, %v3060_v15, %v3104_v54 }
 0x199   : > { %1345 = vrot.lane.b32.xlu1 %v3018_v12, %s2387_s12  ;;  %1736 = vmatprep.subr.bf16.mxu0 %v1539_v37 }
 0x19a   : > { %1445 = vrot.lane.b32.xlu0 %v994_v46, %s2387_s12 }
 0x19b   : > { %v1390_v28 = vpop.permute.xlu1 %1389 }
 0x19c   : > { %v1308_v23 = vpop.permute.xlu0 %1307  ;;  %v1538_v53 = vsel %vm1503_vm9, %v1390_v28, %v1392_v55 }
 0x19d   : > { %1441 = vrot.lane.b32.xlu1 %v2878_v27, %s2387_s12  ;;  %1737 = vmatpush1.bf16.msra.mxu0 %v1538_v53  ;;  %v1508_v27 = vsel %vm1503_vm9, %v1300_v61, %v1302_v4 }
 0x19e   : > { %1347 = vrot.lane.b32.xlu0 %v705_v1, %s2387_s12 }
 0x19f   : > { %v1304_v12 = vpop.permute.xlu1 %1303 }
 0x1a0   : > { %v1404_v58 = vpop.permute.xlu0 %1403  ;;  %v1509_v31 = vsel %vm1503_vm9, %v1302_v4, %v1304_v12  ;;  %v788_v12 = vsel %vm785_vm12, %v3073_v8, %v3053_v57  ;;  %v791_v57 = vsel %vm785_vm12, %v3079_v34, %v3124_v36 }
 0x1a1   : > { %1437 = vrot.lane.b32.xlu1 %v991_v13, %s2387_s12  ;;  %1665 = vmatprep.subr.bf16.mxu1 %v1509_v31  ;;  %v1022_v13 = vsel %vm1021_vm13, %v3077_v33, %v3573_v39  ;;  %v1027_v33 = vsel %vm1021_vm13, %v3094_v52, %v3131_v49  ;;  %v1028_v39 = vsel %vm1021_vm13, %v3197_v62, %v3144_v19 }
 0x1a2   : > { %1355 = vrot.lane.b32.xlu0 %v708_v56, %s2387_s12  ;;  %1666 = vmatpush1.bf16.msra.mxu1 %v1508_v27 }
 0x1a3   : > { %v1400_v0 = vpop.permute.xlu1 %1399 }
 0x1a4   : > { %v1306_v55 = vpop.permute.xlu0 %1305  ;;  %v1541_v48 = vsel %vm1503_vm9, %v1398_v50, %v1400_v0 }
 0x1a5   : > { %1351 = vrot.lane.b32.xlu1 %v3028_v7, %s2387_s12  ;;  %1738 = vmatprep.subr.bf16.mxu0 %v1541_v48  ;;  %v790_v48 = vsel %vm785_vm12, %v3106_v41, %v3079_v34  ;;  %v793_v34 = vsel %vm785_vm12, %v3133_v22, %v3167_v47 }
 0x1a6   : > { %1451 = vrot.lane.b32.xlu0 %v996_v59, %s2387_s12 }
 0x1a7   : > { %v1396_v24 = vpop.permute.xlu1 %1395 }
 0x1a8   : > { %v1314_v17 = vpop.permute.xlu0 %1313  ;;  %v1540_v20 = vsel %vm1503_vm9, %v1396_v24, %v1398_v50  ;;  %v1024_v24 = vsel %vm1021_vm13, %v3117_v51, %v3060_v15  ;;  %v1029_v15 = vsel %vm1021_vm13, %v3144_v19, %v3177_v25 }
 0x1a9   : > { %1447 = vrot.lane.b32.xlu1 %v2884_v5, %s2387_s12  ;;  %1739 = vmatpush1.bf16.msra.mxu0 %v1540_v20  ;;  %v1510_v5 = vsel %vm1503_vm9, %v1306_v55, %v1308_v23 }
 0x1aa   : > { %1353 = vrot.lane.b32.xlu0 %v707_v9, %s2387_s12 }
 0x1ab   : > { %v1310_v7 = vpop.permute.xlu1 %1309 }
 0x1ac   : > { %v1312_v44 = vpop.permute.xlu0 %1311  ;;  %v1511_v3 = vsel %vm1503_vm9, %v1308_v23, %v1310_v7 }
 0x1ad   : > { %1443 = vrot.lane.b32.xlu1 %v993_v43, %s2387_s12  ;;  %1667 = vmatprep.subr.bf16.mxu1 %v1511_v3  ;;  %v792_v3 = vsel %vm785_vm12, %v3162_v16, %v3133_v22  ;;  %v2326_v16 = vld [vmem:[%s3561_s1 + $0xc] ss:$20 sps:$4 sm:$0xff]  }
 0x1ae   : > { %1361 = vrot.lane.b32.xlu0 %v787_v18, %s2387_s12  ;;  %1668 = vmatpush1.bf16.msra.mxu1 %v1510_v5 }
 0x1af   : > { %v1406_v4 = vpop.permute.xlu1 %1405  ;;  %1766 = vmatprep.mubr.bf16.mxu0 %v2326_v16 }
 0x1b0   : > { %v1320_v32 = vpop.permute.xlu0 %1319  ;;  %v1543_v6 = vsel %vm1503_vm9, %v1404_v58, %v1406_v4 }
 0x1b1   : > { %1357 = vrot.lane.b32.xlu1 %v3041_v14, %s2387_s12  ;;  %1740 = vmatprep.subr.bf16.mxu0 %v1543_v6 }
 0x1b2   : > { %1457 = vrot.lane.b32.xlu0 %v1023_v40, %s2387_s12 }
 0x1b3   : > { %v1402_v50 = vpop.permute.xlu1 %1401 }
 0x1b4   : > { %v3269_v63 = vpop.permute.xlu0 %1084  ;;  %v1542_v60 = vsel %vm1503_vm9, %v1402_v50, %v1404_v58 }
 0x1b5   : > { %1453 = vrot.lane.b32.xlu1 %v2894_v29, %s2387_s12  ;;  %1741 = vmatpush1.bf16.msra.mxu0 %v1542_v60  ;;  %v1512_v29 = vsel %vm1503_vm9, %v1312_v44, %v1314_v17 }
 0x1b6   : > { %1359 = vrot.lane.b32.xlu0 %v786_v2, %s2387_s12 }
 0x1b7   : > { %v1316_v14 = vpop.permute.xlu1 %1315 }
 0x1b8   : > { %v1318_v61 = vpop.permute.xlu0 %1317  ;;  %v1513_v37 = vsel %vm1503_vm9, %v1314_v17, %v1316_v14 }
 0x1b9   : > { %1449 = vrot.lane.b32.xlu1 %v995_v35, %s2387_s12  ;;  %1669 = vmatprep.subr.bf16.mxu1 %v1513_v37  ;;  %v1514_v11 = vsel %vm1503_vm9, %v1318_v61, %v1320_v32 }
 0x1ba   : > { %1367 = vrot.lane.b32.xlu0 %v789_v10, %s2387_s12  ;;  %1670 = vmatpush1.bf16.msra.mxu1 %v1512_v29 }
 0x1bb   : > { %v1322_v46 = vpop.permute.xlu1 %1321 }
 0x1bc   : > { %v1410_v28 = vpop.permute.xlu0 %1409  ;;  %v1515_v23 = vsel %vm1503_vm9, %v1320_v32, %v1322_v46 }
 0x1bd   : > { %1363 = vrot.lane.b32.xlu1 %v2907_v45, %s2387_s12  ;;  %1671 = vmatprep.subr.bf16.mxu1 %v1515_v23 }
 0x1be   : > { %1463 = vrot.lane.b32.xlu0 %v1025_v21, %s2387_s12  ;;  %1672 = vmatpush1.bf16.msra.mxu1 %v1514_v11 }
 0x1bf   : > { %v3296_v53 = vpop.permute.xlu1 %1086 }
 0x1c0   : > { %v1416_v1 = vpop.permute.xlu0 %1415  ;;  %v1108_v22 = vsel %vm1106_vm14, %v3269_v63, %v3296_v53 }
 0x1c1   : > { %1459 = vrot.lane.b32.xlu1 %v3572_v38, %s2387_s12 }
 0x1c2   : > { %1365 = vrot.lane.b32.xlu0 %v788_v12, %s2387_s12  ;;  %v2389_v12 = vmov 0  }
 0x1c3   : > { %v1412_v45 = vpop.permute.xlu1 %1411  ;;  %2308 = vset.pattern.permute.xlu1 %v2389_v12  ;;  %2307 = vset.pattern.permute.xlu0 %v2389_v12 }
 0x1c4   : > { %v1083_v58 = vpop.permute.xlu0 %1082  ;;  %v1545_v31 = vsel %vm1503_vm9, %v1410_v28, %v1412_v45 }
 0x1c5   : > { %1455 = vrot.lane.b32.xlu1 %v1022_v13, %s2387_s12  ;;  %1742 = vmatprep.subr.bf16.mxu0 %v1545_v31  ;;  %v1107_v4 = vsel %vm1106_vm14, %v1083_v58, %v3269_v63 }
 0x1c6   : > { %1373 = vrot.lane.b32.xlu0 %v791_v57, %s2387_s12 }
 0x1c7   : > { %v1418_v8 = vpop.permute.xlu1 %1417 }
 0x1c8   : > { %v1328_v56 = vpop.permute.xlu0 %1327 }
 0x1c9   : > { %1369 = vrot.lane.b32.xlu1 %v3088_v42, %s2387_s12  ;;  %v1547_v42 = vsel %vm1503_vm9, %v1416_v1, %v1418_v8 }
 0x1ca   : > { %1469 = vrot.lane.b32.xlu0 %v1027_v33, %s2387_s12 }
 0x1cb   : > { %v1408_v27 = vpop.permute.xlu1 %1407 }
 0x1cc   : > { %v1424_v0 = vpop.permute.xlu0 %1423  ;;  %v1544_v55 = vsel %vm1503_vm9, %v1408_v27, %v1410_v28 }
 0x1cd   : > { %1465 = vrot.lane.b32.xlu1 %v3104_v54, %s2387_s12  ;;  %1743 = vmatpush1.bf16.msra.mxu0 %v1544_v55  ;;  %v1144_v55 = vld [vmem:[%s3562_s2 + $0x28] sm:$0xff] }
 0x1ce   : > { %1371 = vrot.lane.b32.xlu0 %v790_v48, %s2387_s12  ;;  %1744 = vmatprep.subr.bf16.mxu0 %v1547_v42  ;;  %v1146_v42 = vld [vmem:[%s3562_s2 + $0x38] sm:$0xff] }
 0x1cf   : > { %v1414_v59 = vpop.permute.xlu1 %1413 }
 0x1d0   : > { %v1093_v17 = vpop.permute.xlu0 %1092  ;;  %v1546_v20 = vsel %vm1503_vm9, %v1414_v59, %v1416_v1 }
 0x1d1   : > { %1461 = vrot.lane.b32.xlu1 %v1024_v24, %s2387_s12  ;;  %1745 = vmatpush1.bf16.msra.mxu0 %v1546_v20  ;;  %v1145_v20 = vld [vmem:[%s3562_s2 + $0x30] sm:$0xff] }
 0x1d2   : > { %1379 = vrot.lane.b32.xlu0 %v793_v34, %s2387_s12 }
 0x1d3   : > { %v1326_v54 = vpop.permute.xlu1 %1325 }
 0x1d4   : > { %v1420_v41 = vpop.permute.xlu0 %1419  ;;  %v1517_v9 = vsel %vm1503_vm9, %v1326_v54, %v1328_v56 }
 0x1d5   : > { %1375 = vrot.lane.b32.xlu1 %v3124_v36, %s2387_s12  ;;  %1673 = vmatprep.subr.bf16.mxu1 %v1517_v9 }
 0x1d6   : > { %1475 = vrot.lane.b32.xlu0 %v1029_v15, %s2387_s12  ;;  %v1139_v15 = vld [vmem:[%s3562_s2] sm:$0xff] }
 0x1d7   : > { %v1422_v51 = vpop.permute.xlu1 %1421 }
 0x1d8   : > { %v1332_v7 = vpop.permute.xlu0 %1331  ;;  %v1549_v43 = vsel %vm1503_vm9, %v1422_v51, %v1424_v0  ;;  %v1548_v44 = vsel %vm1503_vm9, %v1420_v41, %v1422_v51  ;;  %v1143_v0 = vld [vmem:[%s3562_s2 + $0x20] sm:$0xff] }
 0x1d9   : > { %1471 = vrot.lane.b32.xlu1 %v3131_v49, %s2387_s12  ;;  %1746 = vmatprep.subr.bf16.mxu0 %v1549_v43  ;;  %v2323_v49 = vld [vmem:[%s3561_s1 + $0x4] ss:$20 sps:$4 sm:$0xff]  }
 0x1da   : > { %1377 = vrot.lane.b32.xlu0 %v792_v3, %s2387_s12  ;;  %1747 = vmatpush1.bf16.msra.mxu0 %v1548_v44  ;;  %v1141_v3 = vld [vmem:[%s3562_s2 + $0x10] sm:$0xff] }
 0x1db   : > { %v1091_v36 = vpop.permute.xlu1 %1090  ;;  %1693 = vmatprep.mubr.bf16.mxu1 %v2323_v49 }
 0x1dc   : > { %v1428_v18 = vpop.permute.xlu0 %1427  ;;  %v1110_v19 = vsel %vm1106_vm14, %v1091_v36, %v1093_v17 }
 0x1dd   : > { %1467 = vrot.lane.b32.xlu1 %v1026_v30, %s2387_s12 }
 0x1de   : > { %1481 = vrot.lane.b32.xlu0 %v1108_v22, %s2387_s12 }
 0x1df   : > { %v1324_v5 = vpop.permute.xlu1 %1323 }
 0x1e0   : > { %v1097_v52 = vpop.permute.xlu0 %1096  ;;  %v1516_v26 = vsel %vm1503_vm9, %v1324_v5, %v1326_v54  ;;  %v1140_v54 = vld [vmem:[%s3562_s2 + $0x8] sm:$0xff] }
 0x1e1   : > { %1381 = vrot.lane.b32.xlu1 %v3167_v47, %s2387_s12  ;;  %1674 = vmatpush1.bf16.msra.mxu1 %v1516_v26 }
 0x1e2   : > { %1479 = vrot.lane.b32.xlu0 %v1107_v4, %s2387_s12 }
 0x1e3   : > { %v1089_v32 = vpop.permute.xlu1 %1088 }
 0x1e4   : > { %v1330_v6 = vpop.permute.xlu0 %1329  ;;  %v1109_v61 = vsel %vm1106_vm14, %v1089_v32, %v1091_v36 }
 0x1e5   : > { %1477 = vrot.lane.b32.xlu1 %v3177_v25, %s2387_s12  ;;  %v1518_v47 = vsel %vm1503_vm9, %v1330_v6, %v1332_v7 }
 0x1e6   : > { %1489 = vrot.lane.b32.xlu0 %v1093_v17, %s2387_s12 }
 0x1e7   : > { %v1334_v38 = vpop.permute.xlu1 %1333 }
 0x1e8   : > { %v1095_v40 = vpop.permute.xlu0 %1094  ;;  %v1519_v50 = vsel %vm1503_vm9, %v1332_v7, %v1334_v38  ;;  %v1142_v7 = vld [vmem:[%s3562_s2 + $0x18] sm:$0xff] }
 0x1e9   : > { %1473 = vrot.lane.b32.xlu1 %v1028_v39, %s2387_s12  ;;  %1675 = vmatprep.subr.bf16.mxu1 %v1519_v50  ;;  %v1111_v29 = vsel %vm1106_vm14, %v1095_v40, %v1097_v52 }
 0x1ea   : > { %1676 = vmatpush1.bf16.msra.mxu1 %v1518_v47 }
 0x1eb   : > { %v1430_v63 = vpop.permute.xlu1 %1429 }
 0x1ec   : > { %v1340_v60 = vpop.permute.xlu0 %1339  ;;  %v1551_v25 = vsel %vm1503_vm9, %v1428_v18, %v1430_v63 }
 0x1ed   : > { %1483 = vrot.lane.b32.xlu1 %v3296_v53, %s2387_s12  ;;  %1748 = vmatprep.subr.bf16.mxu0 %v1551_v25 }
 0x1ef   : > { %v1099_v2 = vpop.permute.xlu1 %1098 }
 0x1f0   : > { %v1112_v62 = vsel %vm1106_vm14, %v1097_v52, %v1099_v2  ;;  %v1436_v14 = vpop.permute.xlu0 %1435 }
 0x1f1   : > { %1487 = vrot.lane.b32.xlu1 %v1110_v19, %s2387_s12  ;;  %1493 = vrot.lane.b32.xlu0 %v1112_v62, %s2387_s12 }
 0x1f3   : > { %v1426_v35 = vpop.permute.xlu1 %1425 }
 0x1f4   : > { %v1105_v37 = vpop.permute.xlu0 %1104  ;;  %v1550_v10 = vsel %vm1503_vm9, %v1426_v35, %v1428_v18 }
 0x1f5   : > { %1485 = vrot.lane.b32.xlu1 %v1109_v61, %s2387_s12  ;;  %1749 = vmatpush1.bf16.msra.mxu0 %v1550_v10 }
 0x1f6   : > { %1491 = vrot.lane.b32.xlu0 %v1111_v29, %s2387_s12 }
 0x1f7   : > { %v1338_v46 = vpop.permute.xlu1 %1337 }
 0x1f8   : > { %v1432_v28 = vpop.permute.xlu0 %1431  ;;  %v1521_v23 = vsel %vm1503_vm9, %v1338_v46, %v1340_v60 }
 0x1f9   : > { %1495 = vrot.lane.b32.xlu1 %v1099_v2, %s2387_s12  ;;  %1677 = vmatprep.subr.bf16.mxu1 %v1521_v23 }
 0x1fa   : > { %1501 = vrot.lane.b32.xlu0 %v1105_v37, %s2387_s12 }
 0x1fb   : > { %v1434_v21 = vpop.permute.xlu1 %1433 }
 0x1fc   : > { %v1344_v11 = vpop.permute.xlu0 %1343  ;;  %v1553_v53 = vsel %vm1503_vm9, %v1434_v21, %v1436_v14  ;;  %v1552_v1 = vsel %vm1503_vm9, %v1432_v28, %v1434_v21 }
 0x1fd   : > { %1750 = vmatprep.subr.bf16.mxu0 %v1553_v53 }
 0x1fe   : > { %1751 = vmatpush1.bf16.msra.mxu0 %v1552_v1  ;;  %1169 = vperm.xlu0 %2307, %v1143_v0  }
 0x1ff   : > { %v1103_v45 = vpop.permute.xlu1 %1102 }
 0x200   : > { %v1114_v13 = vsel %vm1106_vm14, %v1103_v45, %v1105_v37  ;;  %v1440_v58 = vpop.permute.xlu0 %1439 }
 0x201   : > { %1499 = vrot.lane.b32.xlu1 %v1114_v13, %s2387_s12 }
 0x202   : > { %1184 = vperm.xlu0 %2307, %v1146_v42  }
 0x203   : > { %v1336_v31 = vpop.permute.xlu1 %1335 }
 0x204   : > { %v1342_v57 = vpop.permute.xlu0 %1341  ;;  %v1520_v8 = vsel %vm1503_vm9, %v1336_v31, %v1338_v46 }
 0x205   : > { %1678 = vmatpush1.bf16.msra.mxu1 %v1520_v8  ;;  %v1522_v17 = vsel %vm1503_vm9, %v1342_v57, %v1344_v11 }
 0x206   : > { %1154 = vperm.xlu0 %2307, %v1140_v54   ;;  %v2327_v54 = vld [vmem:[%s3561_s1 + $0x2c] ss:$20 sps:$4 sm:$0xff]  }
 0x207   : > { %v1101_v56 = vpop.permute.xlu1 %1100 }
 0x208   : > { %v1113_v33 = vsel %vm1106_vm14, %v1101_v56, %v1103_v45  ;;  %v1350_v27 = vpop.permute.xlu0 %1349 }
 0x209   : > { %1497 = vrot.lane.b32.xlu1 %v1113_v33, %s2387_s12 }
 0x20a   : > { %1164 = vperm.xlu0 %2307, %v1142_v7  }
 0x20b   : > { %v1346_v48 = vpop.permute.xlu1 %1345 }
 0x20c   : > { %v1446_v59 = vpop.permute.xlu0 %1445  ;;  %v1523_v24 = vsel %vm1503_vm9, %v1344_v11, %v1346_v48 }
 0x20d   : > { %1679 = vmatprep.subr.bf16.mxu1 %v1523_v24  ;;  %1174 = vperm.xlu1 %2308, %v1144_v55  }
 0x20e   : > { %1680 = vmatpush1.bf16.msra.mxu1 %v1522_v17 }
 0x20f   : > { %v1442_v34 = vpop.permute.xlu1 %1441 }
 0x210   : > { %v1348_v41 = vpop.permute.xlu0 %1347  ;;  %v1555_v9 = vsel %vm1503_vm9, %v1440_v58, %v1442_v34  ;;  %v2321_v34 = vld [vmem:[%s3561_s1] ss:$20 sps:$4 sm:$0xff]  }
 0x211   : > { %1752 = vmatprep.subr.bf16.mxu0 %v1555_v9  ;;  %1179 = vperm.xlu1 %2308, %v1145_v20   ;;  %v1524_v22 = vsel %vm1503_vm9, %v1348_v41, %v1350_v27 }
 0x213   : > { %v1438_v51 = vpop.permute.xlu1 %1437 }
 0x214   : > { %v1356_v43 = vpop.permute.xlu0 %1355  ;;  %v1554_v44 = vsel %vm1503_vm9, %v1438_v51, %v1440_v58 }
 0x215   : > { %1753 = vmatpush1.bf16.msra.mxu0 %v1554_v44  ;;  %1149 = vperm.xlu1 %2308, %v1139_v15  }
 0x217   : > { %v1352_v36 = vpop.permute.xlu1 %1351 }
 0x218   : > { %v1452_v30 = vpop.permute.xlu0 %1451  ;;  %v1525_v18 = vsel %vm1503_vm9, %v1350_v27, %v1352_v36  ;;  %v2331_v36 = vld [vmem:[%s3561_s1 + $0x28] ss:$20 sps:$4 sm:$0xff]  }
 0x219   : > { %1681 = vmatprep.subr.bf16.mxu1 %v1525_v18  ;;  %1159 = vperm.xlu1 %2308, %v1141_v3   ;;  %v2329_v3 = vld [vmem:[%s3561_s1 + $0x34] ss:$20 sps:$4 sm:$0xff]  }
 0x21a   : > { %1682 = vmatpush1.bf16.msra.mxu1 %v1524_v22  ;;  %v2333_v22 = vld [vmem:[%s3561_s1 + $0x54] ss:$20 sps:$4 sm:$0xff]  }
 0x21b   : > { %v1448_v49 = vpop.permute.xlu1 %1447 }
 0x21c   : > { %v1354_v16 = vpop.permute.xlu0 %1353  ;;  %v1557_v5 = vsel %vm1503_vm9, %v1446_v59, %v1448_v49 }
 0x21d   : > { %1754 = vmatprep.subr.bf16.mxu0 %v1557_v5  ;;  %v1526_v39 = vsel %vm1503_vm9, %v1354_v16, %v1356_v43 }
 0x21f   : > { %v1444_v52 = vpop.permute.xlu1 %1443 }
 0x220   : > { %v1362_v26 = vpop.permute.xlu0 %1361  ;;  %v1556_v4 = vsel %vm1503_vm9, %v1444_v52, %v1446_v59 }
 0x221   : > { %1755 = vmatpush1.bf16.msra.mxu0 %v1556_v4  ;;  %v2335_v4 = vld [vmem:[%s3561_s1 + $0x5c] ss:$20 sps:$4 sm:$0xff]  }
 0x223   : > { %v1358_v32 = vpop.permute.xlu1 %1357 }
 0x224   : > { %v1458_v6 = vpop.permute.xlu0 %1457  ;;  %v1527_v38 = vsel %vm1503_vm9, %v1356_v43, %v1358_v32  ;;  %v2324_v43 = vld [vmem:[%s3561_s1 + $0x8] ss:$20 sps:$4 sm:$0xff]  }
 0x225   : > { %1683 = vmatprep.subr.bf16.mxu1 %v1527_v38 }
 0x226   : > { %1684 = vmatpush1.bf16.msra.mxu1 %v1526_v39  ;;  %v2339_v39 = vld [vmem:[%s3561_s1 + $0x7c] ss:$20 sps:$4 sm:$0xff]  }
 0x227   : > { %v1454_v40 = vpop.permute.xlu1 %1453 }
 0x228   : > { %v1360_v50 = vpop.permute.xlu0 %1359  ;;  %v1559_v47 = vsel %vm1503_vm9, %v1452_v30, %v1454_v40 }
 0x229   : > { %1756 = vmatprep.subr.bf16.mxu0 %v1559_v47  ;;  %v1528_v14 = vsel %vm1503_vm9, %v1360_v50, %v1362_v26 }
 0x22b   : > { %v1450_v63 = vpop.permute.xlu1 %1449 }
 0x22c   : > { %v1368_v60 = vpop.permute.xlu0 %1367  ;;  %v1558_v25 = vsel %vm1503_vm9, %v1450_v63, %v1452_v30  ;;  %v2338_v63 = vld [vmem:[%s3561_s1 + $0x58] ss:$20 sps:$4 sm:$0xff]  }
 0x22d   : > { %1757 = vmatpush1.bf16.msra.mxu0 %v1558_v25  ;;  %v2341_v25 = vld [vmem:[%s3561_s1 + $0x84] ss:$20 sps:$4 sm:$0xff]  }
 0x22f   : > { %v1364_v2 = vpop.permute.xlu1 %1363 }
 0x230   : > { %v1464_v19 = vpop.permute.xlu0 %1463  ;;  %v1529_v62 = vsel %vm1503_vm9, %v1362_v26, %v1364_v2  ;;  %v2332_v26 = vld [vmem:[%s3561_s1 + $0x30] ss:$20 sps:$4 sm:$0xff]   ;;  %v2343_v2 = vld [vmem:[%s3561_s1 + $0x78] ss:$20 sps:$4 sm:$0xff]  }
 0x231   : > { %1685 = vmatprep.subr.bf16.mxu1 %v1529_v62 }
 0x232   : > { %1686 = vmatpush1.bf16.msra.mxu1 %v1528_v14 }
 0x233   : > { %v1460_v35 = vpop.permute.xlu1 %1459 }
 0x234   : > { %v1366_v61 = vpop.permute.xlu0 %1365  ;;  %v1561_v37 = vsel %vm1503_vm9, %v1458_v6, %v1460_v35  ;;  %v2344_v35 = vld [vmem:[%s3561_s1 + $0x80] ss:$20 sps:$4 sm:$0xff]  }
 0x235   : > { %1758 = vmatprep.subr.bf16.mxu0 %v1561_v37  ;;  %v1530_v11 = vsel %vm1503_vm9, %v1366_v61, %v1368_v60 }
 0x237   : > { %v1456_v10 = vpop.permute.xlu1 %1455 }
 0x238   : > { %v1374_v29 = vpop.permute.xlu0 %1373  ;;  %v1560_v46 = vsel %vm1503_vm9, %v1456_v10, %v1458_v6  ;;  %v2337_v6 = vld [vmem:[%s3561_s1 + $0x50] ss:$20 sps:$4 sm:$0xff]  }
 0x239   : > { %1759 = vmatpush1.bf16.msra.mxu0 %v1560_v46  ;;  %v2345_v10 = vld [vmem:[%s3561_s1 + $0x10] ss:$20 sps:$4 sm:$0xff]   ;;  %v2347_v46 = vld [vmem:[%s3561_s1 + $0x38] ss:$20 sps:$4 sm:$0xff]  }
 0x23b   : > { %v1370_v28 = vpop.permute.xlu1 %1369 }
 0x23c   : > { %v1470_v23 = vpop.permute.xlu0 %1469  ;;  %v1531_v21 = vsel %vm1503_vm9, %v1368_v60, %v1370_v28  ;;  %v2348_v28 = vld [vmem:[%s3561_s1 + $0x88] ss:$20 sps:$4 sm:$0xff]  }
 0x23d   : > { %1687 = vmatprep.subr.bf16.mxu1 %v1531_v21 }
 0x23e   : > { %1688 = vmatpush1.bf16.msra.mxu1 %v1530_v11 }
 0x23f   : > { %v1466_v53 = vpop.permute.xlu1 %1465 }
 0x240   : > { %v1372_v1 = vpop.permute.xlu0 %1371  ;;  %v1563_v45 = vsel %vm1503_vm9, %v1464_v19, %v1466_v53 }
 0x241   : > { %1760 = vmatprep.subr.bf16.mxu0 %v1563_v45  ;;  %v1532_v33 = vsel %vm1503_vm9, %v1372_v1, %v1374_v29 }
 0x243   : > { %v1462_v13 = vpop.permute.xlu1 %1461 }
 0x244   : > { %v1380_v58 = vpop.permute.xlu0 %1379  ;;  %v1562_v31 = vsel %vm1503_vm9, %v1462_v13, %v1464_v19 }
 0x245   : > { %1761 = vmatpush1.bf16.msra.mxu0 %v1562_v31 }
 0x247   : > { %v1376_v57 = vpop.permute.xlu1 %1375 }
 0x248   : > { %v1476_v8 = vpop.permute.xlu0 %1475  ;;  %v1533_v56 = vsel %vm1503_vm9, %v1374_v29, %v1376_v57  ;;  %v2346_v29 = vld [vmem:[%s3561_s1 + $0x60] ss:$20 sps:$4 sm:$0xff]  }
 0x249   : > { %1689 = vmatprep.subr.bf16.mxu1 %v1533_v56 }
 0x24a   : > { %1690 = vmatpush1.bf16.msra.mxu1 %v1532_v33 }
 0x24b   : > { %v1472_v27 = vpop.permute.xlu1 %1471 }
 0x24c   : > { %v1565_v0 = vsel %vm1503_vm9, %v1470_v23, %v1472_v27  ;;  %v1378_v55 = vpop.permute.xlu0 %1377 }
 0x24d   : > { %1762 = vmatprep.subr.bf16.mxu0 %v1565_v0  ;;  %v1534_v20 = vsel %vm1503_vm9, %v1378_v55, %v1380_v58 }
 0x24f   : > { %v1468_v48 = vpop.permute.xlu1 %1467 }
 0x250   : > { %v1564_v42 = vsel %vm1503_vm9, %v1468_v48, %v1470_v23  ;;  %v1482_v24 = vpop.permute.xlu0 %1481 }
 0x251   : > { %1763 = vmatpush1.bf16.msra.mxu0 %v1564_v42 }
 0x253   : > { %v1382_v59 = vpop.permute.xlu1 %1381 }
 0x254   : > { %v1535_v17 = vsel %vm1503_vm9, %v1380_v58, %v1382_v59  ;;  %v1480_v15 = vpop.permute.xlu0 %1479 }
 0x255   : > { %1691 = vmatprep.subr.bf16.mxu1 %v1535_v17  ;;  %v1568_v49 = vsel %vm1503_vm9, %v1480_v15, %v1482_v24 }
 0x256   : > { %1692 = vmatpush1.bf16.msra.mxu1 %v1534_v20 }
 0x257   : > { %v1478_v41 = vpop.permute.xlu1 %1477 }
 0x258   : > { %v1567_v9 = vsel %vm1503_vm9, %v1476_v8, %v1478_v41  ;;  %v1490_v30 = vpop.permute.xlu0 %1489 }
 0x259   : > { %1764 = vmatprep.subr.bf16.mxu0 %v1567_v9  ;;  %1694 = vmatmul.mubr.bf16.vlgmr.msra.gmra.mrb[0].mxu1 %v2321_v34 }
 0x25a   : > { %1703 = vmatprep.mubr.bf16.mxu1 %v2327_v54 }
 0x25b   : > { %v1474_v51 = vpop.permute.xlu1 %1473 }
 0x25c   : > { %v1566_v7 = vsel %vm1503_vm9, %v1474_v51, %v1476_v8 }
 0x25d   : > { %1765 = vmatpush1.bf16.msra.mxu0 %v1566_v7 }
 0x25f   : > { %v1484_v44 = vpop.permute.xlu1 %1483 }
 0x260   : > { %1767 = vmatmul.mubr.bf16.vlgmr.msra.gmra.mrb[0].mxu0 %v2324_v43  ;;  %v1569_v18 = vsel %vm1503_vm9, %v1482_v24, %v1484_v44 }
 0x261   : > { %1807 = vmatprep.subr.bf16.mxu0 %v1569_v18  ;;  %2209 = vmatprep.subr.bf16.mxu1 %v1569_v18 }
 0x262   : > { %1808 = vmatpush1.bf16.msra.mxu0 %v1568_v49  ;;  %2213 = vmatpush1.bf16.msra.mxu1 %v1568_v49 }
 0x263   : > { %v1488_v16 = vpop.permute.xlu1 %1487  ;;  %1776 = vmatprep.mubr.bf16.mxu0 %v2329_v3  ;;  %1704 = vmatmul.mubr.bf16.gmra.mrb[4].mxu1 %v2331_v36  ;;  %v1494_v5 = vpop.permute.xlu0 %1493 }
 0x264   : > { %v1571_v52 = vsel %vm1503_vm9, %v1488_v16, %v1490_v30  ;;  %1713 = vmatprep.mubr.bf16.mxu1 %v2333_v22 }
 0x265   : > { %1809 = vmatprep.subr.bf16.mxu0 %v1571_v52  ;;  %2210 = vmatprep.subr.bf16.mxu1 %v1571_v52 }
 0x267   : > { %v1486_v32 = vpop.permute.xlu1 %1485 }
 0x268   : > { %v1570_v38 = vsel %vm1503_vm9, %v1486_v32, %v1488_v16  ;;  %1777 = vmatmul.mubr.bf16.gmra.mrb[4].mxu0 %v2332_v26  ;;  %v1492_v40 = vpop.permute.xlu0 %1491 }
 0x269   : > { %1810 = vmatpush1.bf16.msra.mxu0 %v1570_v38  ;;  %2214 = vmatpush1.bf16.msra.mxu1 %v1570_v38  ;;  %v1572_v60 = vsel %vm1503_vm9, %v1492_v40, %v1494_v5 }
 0x26a   : > { %1786 = vmatprep.mubr.bf16.mxu0 %v2335_v4 }
 0x26b   : > { %v1496_v50 = vpop.permute.xlu1 %1495  ;;  %1714 = vmatmul.mubr.bf16.gmra.mrb[8].mxu1 %v2337_v6 }
 0x26c   : > { %v1573_v47 = vsel %vm1503_vm9, %v1494_v5, %v1496_v50  ;;  %1723 = vmatprep.mubr.bf16.mxu1 %v2339_v39  ;;  %v1502_v19 = vpop.permute.xlu0 %1501 }
 0x26d   : > { %1811 = vmatprep.subr.bf16.mxu0 %v1573_v47  ;;  %2211 = vmatprep.subr.bf16.mxu1 %v1573_v47 }
 0x26e   : > { %1812 = vmatpush1.bf16.msra.mxu0 %v1572_v60  ;;  %2215 = vmatpush1.bf16.msra.mxu1 %v1572_v60 }
 0x270   : > { %1787 = vmatmul.mubr.bf16.gmra.mrb[8].mxu0 %v2338_v63 }
 0x271   : > { %1796 = vmatprep.mubr.bf16.mxu0 %v2341_v25 }
 0x273   : > { %v1500_v62 = vpop.permute.xlu1 %1499  ;;  %1724 = vmatmul.mubr.bf16.gmra.mrb[12].mxu1 %v2343_v2 }
 0x274   : > { %v1575_v14 = vsel %vm1503_vm9, %v1500_v62, %v1502_v19  ;;  %1859 = vmatprep.mubr.bf16.mxu1 %v2389_v12 }
 0x275   : > { %1813 = vmatprep.subr.bf16.mxu0 %v1575_v14  ;;  %2212 = vmatprep.subr.bf16.mxu1 %v1575_v14 }
 0x278   : > { %1797 = vmatmul.mubr.bf16.gmra.mrb[12].mxu0 %v2344_v35 }
 0x279   : > { %1839 = vmatprep.mubr.bf16.mxu0 %v2389_v12 }
 0x27b   : > { %v1498_v61 = vpop.permute.xlu1 %1497 }
 0x27c   : > { %v1574_v37 = vsel %vm1503_vm9, %v1498_v61, %v1500_v62 }
 0x27d   : > { %1814 = vmatpush1.bf16.msra.mxu0 %v1574_v37  ;;  %2216 = vmatpush1.bf16.msra.mxu1 %v1574_v37  ;;  %v1170_v31 = vpop.permute.xlu0 %1169 }
 0x280   : > { %2186 = vmatmul.mubr.msk.bf16.vlgmr.msra.gmra.mrb[0].mxu0 %vm1648_vm15, %v2345_v10  ;;  %2188 = vmatmul.mubr.msk.bf16.vlgmr.msra.gmra.mrb[16].mxu1 %vm1648_vm15, %v2346_v29 }
 0x281   : > { %1849 = vmatprep.mubr.bf16.mxu0 %v2389_v12  ;;  %1869 = vmatprep.mubr.bf16.mxu1 %v2389_v12  ;;  %v1185_v44 = vpop.permute.xlu0 %1184 }
 0x285   : > { %v1155_v38 = vpop.permute.xlu0 %1154 }
 0x288   : > { %2187 = vmatmul.mubr.msk.bf16.gmra.mrb[4].mxu0 %vm1648_vm15, %v2347_v46  ;;  %2189 = vmatmul.mubr.msk.bf16.gmra.mrb[20].mxu1 %vm1648_vm15, %v2348_v28 }
 0x28c   : > { %v1175_v33 = vpop.permute.xlu1 %1174 }
 0x290   : > { %v1180_v9 = vpop.permute.xlu1 %1179 }
 0x294   : > { %v1150_v32 = vpop.permute.xlu1 %1149 }
 0x32c   : > { %v1695_v23 = vpop.f32.mrb[0].mxu1 }
 0x32d   : > { %v1697_v21 = vpop.f32.mrb[1].mxu1  ;;  %v1696_v39 = vadd.f32 %v1695_v23, %v1150_v32 }
 0x32e   : > { %v1699_v11 = vpop.f32.mrb[2].mxu1  ;;  %v1698_v40 = vadd.f32 %v1697_v21, %v1150_v32  ;;  %v1160_v21 = vpop.permute.xlu1 %1159 }
 0x32f   : > { %v1701_v53 = vpop.f32.mrb[3].mxu1  ;;  %v1700_v63 = vadd.f32 %v1699_v11, %v1155_v38 }
 0x330   : > { %v1702_v62 = vadd.f32 %v1701_v53, %v1155_v38 }
 0x336   : > { %v3522_v1 = vpop.f32.mrb[4].mxu1 }
 0x337   : > { %v3524_v45 = vpop.f32.mrb[5].mxu1 }
 0x338   : > { %v3526_v13 = vpop.f32.mrb[6].mxu1 }
 0x339   : > { %v3528_v12 = vpop.f32.mrb[7].mxu1 }
 0x33e   : > { %v1715_v58 = vpop.f32.mrb[8].mxu1 }
 0x33f   : > { %v1717_v57 = vpop.f32.mrb[9].mxu1  ;;  %v1716_v8 = vadd.f32 %v1715_v58, %v1170_v31 }
 0x340   : > { %v1719_v56 = vpop.f32.mrb[10].mxu1  ;;  %v1718_v27 = vadd.f32 %v1717_v57, %v1170_v31 }
 0x341   : > { %v1721_v0 = vpop.f32.mrb[11].mxu1  ;;  %v1720_v55 = vadd.f32 %v1719_v56, %v1175_v33 }
 0x342   : > { %v1722_v42 = vadd.f32 %v1721_v0, %v1175_v33  ;;  %v1165_v33 = vpop.permute.xlu0 %1164 }
 0x343   : > { %v1788_v48 = vpop.f32.mrb[8].mxu0 }
 0x344   : > { %v1789_v59 = vadd.f32 %v1788_v48, %v1716_v8  ;;  %v1790_v24 = vpop.f32.mrb[9].mxu0 }
 0x345   : > { %v1791_v17 = vadd.f32 %v1790_v24, %v1718_v27  ;;  %v1792_v20 = vpop.f32.mrb[10].mxu0 }
 0x346   : > { %v1793_v34 = vadd.f32 %v1792_v20, %v1720_v55  ;;  %v1794_v54 = vpop.f32.mrb[11].mxu0  ;;  %v1725_v41 = vpop.f32.mrb[12].mxu1 }
 0x347   : > { %v1795_v15 = vadd.f32 %v1794_v54, %v1722_v42  ;;  %v1727_v51 = vpop.f32.mrb[13].mxu1  ;;  %v1726_v7 = vadd.f32 %v1725_v41, %v1180_v9  ;;  %v1706_v42 = vadd.f32 %v3522_v1, %v1160_v21  ;;  %v1710_v54 = vadd.f32 %v3526_v13, %v1165_v33 }
 0x348   : > { %v1729_v43 = vpop.f32.mrb[14].mxu1  ;;  %v1728_v3 = vadd.f32 %v1727_v51, %v1180_v9 }
 0x349   : > { %v1731_v36 = vpop.f32.mrb[15].mxu1  ;;  %v1730_v30 = vadd.f32 %v1729_v43, %v1185_v44 }
 0x34a   : > { %v1732_v22 = vadd.f32 %v1731_v36, %v1185_v44 }
 0x34b   : > { %v1798_v18 = vpop.f32.mrb[12].mxu0 }
 0x34c   : > { %v1799_v49 = vadd.f32 %v1798_v18, %v1726_v7  ;;  %v1800_v16 = vpop.f32.mrb[13].mxu0  ;;  %v1712_v7 = vadd.f32 %v3528_v12, %v1165_v33 }
 0x34d   : > { %v1801_v5 = vadd.f32 %v1800_v16, %v1728_v3  ;;  %v1802_v52 = vpop.f32.mrb[14].mxu0 }
 0x34e   : > { %v1803_v26 = vadd.f32 %v1802_v52, %v1730_v30  ;;  %v1804_v4 = vpop.f32.mrb[15].mxu0 }
 0x34f   : > { %v3530_v6 = vadd.f32 %v1804_v4, %v1732_v22 }
 0x353   : > { %v1841_v50 = vpop.f32.mrb[0].mxu0  ;;  %v1861_v47 = vpop.f32.mrb[16].mxu1 }
 0x354   : > { %v2218_v60 = vadd.f32 %v1841_v50, %v1696_v39  ;;  %v1862_v25 = vadd.f32 %v1861_v47, %v1789_v59  ;;  %v1843_v2 = vpop.f32.mrb[1].mxu0  ;;  %v1863_v19 = vpop.f32.mrb[17].mxu1  ;;  %v1708_v59 = vadd.f32 %v3524_v45, %v1160_v21 }
 0x355   : > { %v2220_v14 = vadd.f32 %v1843_v2, %v1698_v40  ;;  %v1864_v35 = vadd.f32 %v1863_v19, %v1791_v17  ;;  %v1845_v61 = vpop.f32.mrb[2].mxu0  ;;  %v1865_v37 = vpop.f32.mrb[18].mxu1 }
 0x356   : > { %v1880_v10 = vmax.f32 %v2218_v60, 0.0  ;;  %v1888_v29 = vmax.f32 %v1862_v25, 0.0  ;;  %v2222_v46 = vadd.f32 %v1845_v61, %v1700_v63  ;;  %v1866_v28 = vadd.f32 %v1865_v37, %v1793_v34  ;;  %v1847_v58 = vpop.f32.mrb[3].mxu0  ;;  %v1867_v23 = vpop.f32.mrb[19].mxu1 }
 0x357   : > { %v1881_v31 = vmax.f32 %v2220_v14, 0.0  ;;  %v1889_v57 = vmax.f32 %v1864_v35, 0.0  ;;  %v2224_v11 = vadd.f32 %v1847_v58, %v1702_v62  ;;  %v1868_v8 = vadd.f32 %v1867_v23, %v1795_v15 }
 0x358   : > { %v1882_v53 = vmax.f32 %v2222_v46, 0.0  ;;  %v1890_v56 = vmax.f32 %v1866_v28, 0.0 }
 0x359   : > { %v2201_v27 = vpack.c.bf16 %v1881_v31, %v1880_v10  ;;  %v2205_v0 = vpack.c.bf16 %v1889_v57, %v1888_v29  ;;  %v1883_v55 = vmax.f32 %v2224_v11, 0.0  ;;  %v1891_v48 = vmax.f32 %v1868_v8, 0.0 }
 0x35b   : > { %1944 = vst [vmem:[%s3536_s7] sm:$0xff] %v2201_v27  ;;  %1948 = vst [vmem:[%s3536_s7 + $0x20] sm:$0xff] %v2205_v0  ;;  %v2202_v24 = vpack.c.bf16 %v1883_v55, %v1882_v53  ;;  %v2206_v17 = vpack.c.bf16 %v1891_v48, %v1890_v56  ;;  %v1851_v20 = vpop.f32.mrb[4].mxu0  ;;  %v1871_v34 = vpop.f32.mrb[20].mxu1 }
 0x35c   : > { %v2226_v41 = vadd.f32 %v1851_v20, %v1706_v42  ;;  %v1872_v9 = vadd.f32 %v1871_v34, %v1799_v49  ;;  %v1853_v15 = vpop.f32.mrb[5].mxu0  ;;  %v1873_v51 = vpop.f32.mrb[21].mxu1 }
 0x35d   : > { %1945 = vst [vmem:[%s3536_s7 + $0x8] sm:$0xff] %v2202_v24  ;;  %1949 = vst [vmem:[%s3536_s7 + $0x28] sm:$0xff] %v2206_v17  ;;  %v2228_v43 = vadd.f32 %v1853_v15, %v1708_v59  ;;  %v1874_v1 = vadd.f32 %v1873_v51, %v1801_v5  ;;  %v1855_v44 = vpop.f32.mrb[6].mxu0  ;;  %v1875_v45 = vpop.f32.mrb[22].mxu1 }
 0x35e   : > { %v1884_v3 = vmax.f32 %v2226_v41, 0.0  ;;  %v1892_v36 = vmax.f32 %v1872_v9, 0.0  ;;  %v2230_v30 = vadd.f32 %v1855_v44, %v1710_v54  ;;  %v1876_v18 = vadd.f32 %v1875_v45, %v1803_v26  ;;  %v1857_v22 = vpop.f32.mrb[7].mxu0  ;;  %v1877_v13 = vpop.f32.mrb[23].mxu1 }
 0x35f   : > { %v1885_v49 = vmax.f32 %v2228_v43, 0.0  ;;  %v1893_v16 = vmax.f32 %v1874_v1, 0.0  ;;  %v2232_v52 = vadd.f32 %v1857_v22, %v1712_v7  ;;  %v1878_v12 = vadd.f32 %v1877_v13, %v3530_v6 }
 0x360   : > { %v1886_v4 = vmax.f32 %v2230_v30, 0.0  ;;  %v1894_v32 = vmax.f32 %v1876_v18, 0.0 }
 0x361   : > { %v2203_v5 = vpack.c.bf16 %v1885_v49, %v1884_v3  ;;  %v2207_v38 = vpack.c.bf16 %v1893_v16, %v1892_v36  ;;  %v1887_v39 = vmax.f32 %v2232_v52, 0.0  ;;  %v1895_v40 = vmax.f32 %v1878_v12, 0.0 }
 0x363   : > { %1946 = vst [vmem:[%s3536_s7 + $0x10] sm:$0xff] %v2203_v5  ;;  %1950 = vst [vmem:[%s3536_s7 + $0x30] sm:$0xff] %v2207_v38  ;;  %v2204_v50 = vpack.c.bf16 %v1887_v39, %v1886_v4  ;;  %v2208_v47 = vpack.c.bf16 %v1895_v40, %v1894_v32 }
 0x365   : > { %1947 = vst [vmem:[%s3536_s7 + $0x18] sm:$0xff] %v2204_v50  ;;  %1951 = vst [vmem:[%s3536_s7 + $0x38] sm:$0xff] %v2208_v47 }
 0x366 PF: > { %s14_s17 = sadd.s32 1, %s2371_s17   ;;  %s3574_s15 = smov %s2367_s16 }
 0x367   : > { %p11_p5 = scmp.ge.s32.totalorder %s14_s17, 4   ;;  %s3575_s16 = smov %s3577_s18 }
 0x369   :  { %13 = sbr.rel (!%p11_p5) target bundleno = 2 (0x2), region = 72 }

// kernel: vgg19_gram_pyramid_forward.7
= control target key start
LH: loop header
LB: loop body
LE: loop exit
PB: predicated region body
PF: predicated region fallthrough
CT: control target
= control target key end

     0   :  { %s2045_s15 = smov 0   ;;  %s2047_s16 = smov 0   ;;  %s2518_s0 = inlined_call_operand.vmem [shape: bf16[2,64,96], index: 0, kind: input, shape index: {}]   ;;  %s2519_s1 = inlined_call_operand.vmem [shape: bf16[128,576], index: 1, kind: input, shape index: {}]   ;;  %s2520_s2 = inlined_call_operand.vmem [shape: f32[128,1], index: 2, kind: input, shape index: {}]   ;;  %s2521_s3 = inlined_call_operand.vmem [shape: bf16[2,64], index: 3, kind: input, shape index: {}]   ;;  %s2522_s4 = inlined_call_operand.vmem [shape: bf16[2,128,96], index: 4, kind: output, shape index: {}]  }
   0x1   :  { %s2049_s17 = smov 0  }
   0x2 LB: > { %s26_s18 = sadd.s32 1, %s1997_s16  ;;  %p1601_p0 = scmp.ge.s32.totalorder %s2001_s17, 1  ;;  %s2001_s17 = sphi %s2049_s17, %s14_s17   ;;  %s1997_s16 = sphi %s2047_s16, %s2524_s16   ;;  %s1993_s15 = sphi %s2045_s15, %s2523_s15  }
   0x3   : > { %p28_p1 = scmp.ge.s32.totalorder %s26_s18, 2  ;;  %p199_p2 = scmp.lt.s32.totalorder %s2001_s17, 3 }
   0x5   : > { %s2526_s18 = smov (%p28_p1, %s26_s18), 0  ;;  %p200_p3 = pnand %p1601_p0, %p199_p2 }
   0x6   : > { %v277_v0 = vld [vmem:[%s2521_s3] sm:$0x1] (!%p200_p3)  ;;  %v281_v1 = vlaneseq (!%p200_p3)  ;;  %p240_p4 = scmp.lt.s32.totalorder (!%p200_p3), %s1993_s15, 1  ;;  %s2003_s25 = smov (!%p200_p3), 9   ;;  %vm1020_vm0 = vcmask (!%p200_p3), 523264   ;;  %vm1384_vm1 = vcmask (!%p200_p3), 130048  }
   0x7   : > { %203 = sbr.rel (%p200_p3) target bundleno = 889 (0x379), region = 36  ;;  %v299_v2 = vshrl.u32 (!%p200_p3), %v277_v0, 16  ;;  %v279_v4 = vpack.i.b16 (!%p200_p3), %v277_v0, %v277_v0  ;;  %s2004_s26 = smov (!%p200_p3), 15   ;;  %vm1402_vm2 = vcmask (!%p200_p3), 654336   ;;  %vm1467_vm3 = vcmask (!%p200_p3), 781312  }
   0x8   : > { %v282_v3 = vshrl.u32 (!%p200_p3), %v281_v1, 7  ;;  %s2005_s27 = smov (!%p200_p3), 17   ;;  %s2006_s28 = smov (!%p200_p3), 23  }
   0x9   : > { %v300_v5 = vpack.i.b16 (!%p200_p3), %v299_v2, %v299_v2  ;;  %s2007_s29 = smov (!%p200_p3), 7   ;;  %s2008_s30 = smov (!%p200_p3), 119  }
   0xa   : > { %v283_v6 = vsub.s32 (!%p200_p3), 0, %v282_v3  ;;  %s2009_s5 = smov (!%p200_p3), 127   ;;  %s2010_s6 = smov (!%p200_p3), 111  }
   0xb   : > { %s2011_s7 = smov (!%p200_p3), 25   ;;  %s2012_s8 = smov (!%p200_p3), 121  }
   0xc   : > { %v305_v7 = vrot.slane (!%p200_p3), %v300_v5, %v283_v6  ;;  %v284_v8 = vrot.slane (!%p200_p3), %v279_v4, %v283_v6  ;;  %s2013_s9 = smov (!%p200_p3), 112   ;;  %s2014_s10 = smov (!%p200_p3), 126  }
   0xd   : > { %s2015_s11 = smov (!%p200_p3), 118   ;;  %s2016_s12 = smov (!%p200_p3), 120  }
   0xe   : > { %s2528_s15 = smov (!%p240_p4, %s1993_s15), 1  ;;  %v1607_v9 = vcombine.low %v305_v7, %v305_v7  ;;  %v1606_v10 = vcombine.low %v284_v8, %v284_v8  ;;  %s2017_s13 = smov 110  }
   0xf   : > { %s1702_s21 = sshll.u32 %s2528_s15, 5  ;;  %s2019_s20 = smov 16  }
  0x10   : > { %s244_s24 = scalar_lea.vmem %s2518_s0, %s1702_s21  ;;  %309 = vrot.lane.b32.xlu0 %v1607_v9, %s2003_s25  ;;  %320 = vrot.lane.b32.xlu1 %v1606_v10, %s2004_s26  ;;  %s1703_s21 = sshll.u32 %s2528_s15, 6 }
  0x11   : > { %v2072_v11 = vld [vmem:[%s244_s24] sm:$0xf]  ;;  %v2074_v12 = vld [vmem:[%s244_s24 + $0x4] sm:$0xf]  ;;  %v2076_v13 = vld [vmem:[%s244_s24 + $0x8] sm:$0xf] }
  0x12   : > { %v2078_v14 = vld [vmem:[%s244_s24 + $0xc] sm:$0xf]  ;;  %v2080_v15 = vld [vmem:[%s244_s24 + $0x10] sm:$0xf]  ;;  %v2082_v16 = vld [vmem:[%s244_s24 + $0x14] sm:$0xf]  ;;  %v1612_v17 = vcombine.low %v2072_v11, %v2074_v12 }
  0x13   : > { %v2086_v18 = vld [vmem:[%s244_s24 + $0x18] sm:$0xf]  ;;  %v2088_v19 = vld [vmem:[%s244_s24 + $0x1c] sm:$0xf]  ;;  %v1613_v20 = vcombine.low %v2076_v13, %v2078_v14  ;;  %v1614_v21 = vcombine.low %v2080_v15, %v2082_v16  ;;  %s2460_s24 = scalar_lea.vmem %s2522_s4, %s1703_s21 }
  0x14   : > { %331 = vrot.lane.b32.xlu1 %v1607_v9, %s2005_s27  ;;  %342 = vrot.lane.b32.xlu0 %v1606_v10, %s2006_s28  ;;  %v1615_v22 = vcombine.low %v2086_v18, %v2088_v19 }
  0x18   : > { %288 = vrot.lane.b32.xlu0 %v1606_v10, %s2007_s29  ;;  %468 = vrot.lane.b32.xlu1 %v1612_v17, %s2008_s30 }
  0x1c   : > { %470 = vrot.lane.b32.xlu0 %v1613_v20, %s2008_s30  ;;  %472 = vrot.lane.b32.xlu1 %v1614_v21, %s2008_s30 }
  0x20   : > { %474 = vrot.lane.b32.xlu0 %v1615_v22, %s2008_s30  ;;  %404 = vrot.lane.b32.xlu1 %v1612_v17, %s2009_s5 }
  0x24   : > { %532 = vrot.lane.b32.xlu0 %v1612_v17, %s2010_s6  ;;  %353 = vrot.lane.b32.xlu1 %v1607_v9, %s2011_s7 }
  0x28   : > { %406 = vrot.lane.b32.xlu0 %v1613_v20, %s2009_s5  ;;  %534 = vrot.lane.b32.xlu1 %v1613_v20, %s2010_s6 }
  0x2c   : > { %536 = vrot.lane.b32.xlu1 %v1614_v21, %s2010_s6  ;;  %408 = vrot.lane.b32.xlu0 %v1614_v21, %s2009_s5 }
  0x30   : > { %410 = vrot.lane.b32.xlu0 %v1615_v22, %s2009_s5  ;;  %538 = vrot.lane.b32.xlu1 %v1615_v22, %s2010_s6 }
  0x82   : > { %v310_v23 = vpop.permute.xlu0 %309  ;;  %v2096_v24 = vpop.permute.xlu1 %320 }
  0x83   : > { %v314_v30 = vmul.bf16 %v310_v23, %v2076_v13  ;;  %v315_v31 = vmul.bf16 %v310_v23, %v2078_v14  ;;  %v312_v34 = vmul.bf16 %v310_v23, %v2072_v11  ;;  %v313_v38 = vmul.bf16 %v310_v23, %v2074_v12 }
  0x84   : > { %v318_v40 = vmul.bf16 %v310_v23, %v2086_v18  ;;  %v319_v41 = vmul.bf16 %v310_v23, %v2088_v19  ;;  %v316_v46 = vmul.bf16 %v310_v23, %v2080_v15  ;;  %v317_v47 = vmul.bf16 %v310_v23, %v2082_v16 }
  0x85   : > { %v1617_v35 = vcombine.low %v314_v30, %v315_v31  ;;  %v1616_v43 = vcombine.low %v312_v34, %v313_v38  ;;  %v325_v52 = vmul.bf16 %v2096_v24, %v2076_v13  ;;  %v326_v53 = vmul.bf16 %v2096_v24, %v2078_v14 }
  0x86   : > { %v2098_v25 = vpop.permute.xlu1 %331  ;;  %v343_v26 = vpop.permute.xlu0 %342  ;;  %v1619_v48 = vcombine.low %v318_v40, %v319_v41  ;;  %v1618_v56 = vcombine.low %v316_v46, %v317_v47  ;;  %v327_v59 = vmul.bf16 %v2096_v24, %v2080_v15  ;;  %v328_v60 = vmul.bf16 %v2096_v24, %v2082_v16 }
  0x87   : > { %v345_v27 = vmul.bf16 %v343_v26, %v2072_v11  ;;  %v346_v28 = vmul.bf16 %v343_v26, %v2074_v12  ;;  %v349_v36 = vmul.bf16 %v343_v26, %v2080_v15  ;;  %v350_v37 = vmul.bf16 %v343_v26, %v2082_v16 }
  0x88   : > { %v347_v44 = vmul.bf16 %v343_v26, %v2076_v13  ;;  %v348_v45 = vmul.bf16 %v343_v26, %v2078_v14  ;;  %v334_v50 = vmul.bf16 %v2098_v25, %v2072_v11  ;;  %v335_v51 = vmul.bf16 %v2098_v25, %v2074_v12 }
  0x89   : > { %v1628_v29 = vcombine.low %v345_v27, %v346_v28  ;;  %v1630_v42 = vcombine.low %v349_v36, %v350_v37  ;;  %v351_v57 = vmul.bf16 %v343_v26, %v2086_v18  ;;  %v352_v58 = vmul.bf16 %v343_v26, %v2088_v19 }
  0x8a   : > { %v2104_v32 = vpop.permute.xlu0 %288  ;;  %v469_v33 = vpop.permute.xlu1 %468  ;;  %v1629_v49 = vcombine.low %v347_v44, %v348_v45  ;;  %v1624_v55 = vcombine.low %v334_v50, %v335_v51  ;;  %v1621_v61 = vcombine.low %v325_v52, %v326_v53  ;;  %v323_v63 = vmul.bf16 %v2096_v24, %v2072_v11 }
  0x8b   : > { %944 = vrot.lane.b32.xlu1 %v469_v33, %s2012_s8  ;;  %524 = vrot.lane.b32.xlu0 %v1628_v29, %s2013_s9  ;;  %v1631_v62 = vcombine.low %v351_v57, %v352_v58  ;;  %v324_v0 = vmul.bf16 %v2096_v24, %v2074_v12  ;;  %v1622_v2 = vcombine.low %v327_v59, %v328_v60 }
  0x8c   : > { %v329_v4 = vmul.bf16 %v2096_v24, %v2086_v18  ;;  %v330_v6 = vmul.bf16 %v2096_v24, %v2088_v19  ;;  %v336_v7 = vmul.bf16 %v2098_v25, %v2076_v13  ;;  %v337_v8 = vmul.bf16 %v2098_v25, %v2078_v14 }
  0x8d   : > { %v1620_v5 = vcombine.low %v323_v63, %v324_v0  ;;  %v338_v20 = vmul.bf16 %v2098_v25, %v2080_v15  ;;  %v339_v21 = vmul.bf16 %v2098_v25, %v2082_v16  ;;  %v340_v24 = vmul.bf16 %v2098_v25, %v2086_v18 }
  0x8e   : > { %v471_v39 = vpop.permute.xlu0 %470  ;;  %v473_v54 = vpop.permute.xlu1 %472  ;;  %v1623_v10 = vcombine.low %v329_v4, %v330_v6  ;;  %v1625_v17 = vcombine.low %v336_v7, %v337_v8  ;;  %v341_v26 = vmul.bf16 %v2098_v25, %v2088_v19  ;;  %v291_v31 = vmul.bf16 %v2104_v32, %v2072_v11 }
  0x8f   : > { %946 = vrot.lane.b32.xlu1 %v471_v39, %s2012_s8  ;;  %434 = vrot.lane.b32.xlu0 %v1617_v35, %s2014_s10  ;;  %v1626_v23 = vcombine.low %v338_v20, %v339_v21  ;;  %v292_v33 = vmul.bf16 %v2104_v32, %v2074_v12  ;;  %v293_v34 = vmul.bf16 %v2104_v32, %v2076_v13 }
  0x90   : > { %v1627_v29 = vcombine.low %v340_v24, %v341_v26  ;;  %v294_v35 = vmul.bf16 %v2104_v32, %v2078_v14  ;;  %v295_v37 = vmul.bf16 %v2104_v32, %v2080_v15  ;;  %v296_v38 = vmul.bf16 %v2104_v32, %v2082_v16 }
  0x91   : > { %v1608_v25 = vcombine.low %v291_v31, %v292_v33  ;;  %v297_v40 = vmul.bf16 %v2104_v32, %v2086_v18  ;;  %v298_v41 = vmul.bf16 %v2104_v32, %v2088_v19 }
  0x92   : > { %v405_v1 = vpop.permute.xlu1 %404  ;;  %v475_v3 = vpop.permute.xlu0 %474  ;;  %v1609_v36 = vcombine.low %v293_v34, %v294_v35  ;;  %v1610_v39 = vcombine.low %v295_v37, %v296_v38 }
  0x93   : > { %528 = vrot.lane.b32.xlu0 %v1630_v42, %s2013_s9  ;;  %432 = vrot.lane.b32.xlu1 %v1616_v43, %s2014_s10  ;;  %v1611_v47 = vcombine.low %v297_v40, %v298_v41 }
  0x96   : > { %v2149_v9 = vpop.permute.xlu1 %353  ;;  %v533_v22 = vpop.permute.xlu0 %532 }
  0x97   : > { %438 = vrot.lane.b32.xlu0 %v1619_v48, %s2014_s10  ;;  %526 = vrot.lane.b32.xlu1 %v1629_v49, %s2013_s9  ;;  %v356_v42 = vmul.bf16 %v2149_v9, %v2072_v11  ;;  %v357_v43 = vmul.bf16 %v2149_v9, %v2074_v12  ;;  %v358_v44 = vmul.bf16 %v2149_v9, %v2076_v13 }
  0x98   : > { %v359_v45 = vmul.bf16 %v2149_v9, %v2078_v14  ;;  %v363_v4 = vmul.bf16 %v2149_v9, %v2088_v19  ;;  %v361_v6 = vmul.bf16 %v2149_v9, %v2082_v16  ;;  %v1928_v19 = vld [vmem:[%s2519_s1 + $0xc] ss:$20 sps:$4 sm:$0xff]  }
  0x99   : > { %v1632_v11 = vcombine.low %v356_v42, %v357_v43  ;;  %1174 = vmatprep.mubr.bf16.mxu1 %v1928_v19  ;;  %v630_v19 = vld [vmem:[%s2520_s2 + $0x70] sm:$0xff] }
  0x9a   : > { %v535_v27 = vpop.permute.xlu1 %534  ;;  %v407_v28 = vpop.permute.xlu0 %406  ;;  %v1633_v32 = vcombine.low %v358_v44, %v359_v45 }
  0x9b   : > { %496 = vrot.lane.b32.xlu0 %v1624_v55, %s2015_s11  ;;  %436 = vrot.lane.b32.xlu1 %v1618_v56, %s2014_s10 }
  0x9e   : > { %v537_v30 = vpop.permute.xlu1 %536  ;;  %v409_v46 = vpop.permute.xlu0 %408 }
  0x9f   : > { %462 = vrot.lane.b32.xlu0 %v1621_v61, %s2016_s12  ;;  %530 = vrot.lane.b32.xlu1 %v1631_v62, %s2013_s9 }
  0xa2   : > { %v411_v12 = vpop.permute.xlu0 %410  ;;  %v539_v48 = vpop.permute.xlu1 %538 }
  0xa3   : > { %464 = vrot.lane.b32.xlu0 %v1622_v2, %s2016_s12  ;;  %460 = vrot.lane.b32.xlu1 %v1620_v5, %s2016_s12  ;;  %v360_v5 = vmul.bf16 %v2149_v9, %v2080_v15  ;;  %v1925_v15 = vld [vmem:[%s2519_s1 + $0x4] ss:$20 sps:$4 sm:$0xff]  }
  0xa4   : > { %1077 = vmatprep.mubr.bf16.mxu0 %v1925_v15  ;;  %v1951_v15 = vld [vmem:[%s2519_s1 + $0xa0] ss:$20 sps:$4 sm:$0xff]  }
  0xa7   : > { %466 = vrot.lane.b32.xlu0 %v1623_v10, %s2016_s12  ;;  %498 = vrot.lane.b32.xlu1 %v1625_v17, %s2015_s11  ;;  %v1634_v17 = vcombine.low %v360_v5, %v361_v6  ;;  %v1945_v5 = vld [vmem:[%s2519_s1 + $0x78] ss:$20 sps:$4 sm:$0xff]  }
  0xa8   : > { %v625_v6 = vld [vmem:[%s2520_s2 + $0x48] sm:$0xff] }
  0xab   : > { %920 = vrot.lane.b32.xlu0 %v405_v1, %s2012_s8  ;;  %500 = vrot.lane.b32.xlu1 %v1626_v23, %s2015_s11 }
  0xaf   : > { %922 = vrot.lane.b32.xlu0 %v407_v28, %s2012_s8  ;;  %502 = vrot.lane.b32.xlu1 %v1627_v29, %s2015_s11 }
  0xb3   : > { %972 = vrot.lane.b32.xlu0 %v537_v30, %s2012_s8  ;;  %948 = vrot.lane.b32.xlu1 %v473_v54, %s2012_s8 }
  0xb7   : > { %912 = vrot.lane.b32.xlu0 %v1608_v25, %s2012_s8  ;;  %950 = vrot.lane.b32.xlu1 %v475_v3, %s2012_s8  ;;  %v362_v3 = vmul.bf16 %v2149_v9, %v2086_v18 }
  0xb9   : > { %v1635_v10 = vcombine.low %v362_v3, %v363_v4  ;;  %v1949_v3 = vld [vmem:[%s2519_s1 + $0xac] ss:$20 sps:$4 sm:$0xff]  }
  0xba   : > { %v624_v4 = vld [vmem:[%s2520_s2 + $0x40] sm:$0xff] }
  0xbb   : > { %914 = vrot.lane.b32.xlu0 %v1609_v36, %s2012_s8  ;;  %968 = vrot.lane.b32.xlu1 %v533_v22, %s2012_s8 }
  0xbf   : > { %916 = vrot.lane.b32.xlu0 %v1610_v39, %s2012_s8  ;;  %970 = vrot.lane.b32.xlu1 %v535_v27, %s2012_s8 }
  0xc3   : > { %918 = vrot.lane.b32.xlu0 %v1611_v47, %s2012_s8  ;;  %924 = vrot.lane.b32.xlu1 %v409_v46, %s2012_s8  ;;  %v1926_v46 = vld [vmem:[%s2519_s1 + $0x8] ss:$20 sps:$4 sm:$0xff]   ;;  %v1923_v47 = vld [vmem:[%s2519_s1] ss:$20 sps:$4 sm:$0xff]  }
  0xc7   : > { %560 = vrot.lane.b32.xlu0 %v1632_v11, %s2017_s13  ;;  %562 = vrot.lane.b32.xlu1 %v1633_v32, %s2017_s13  ;;  %v1931_v11 = vld [vmem:[%s2519_s1 + $0x34] ss:$20 sps:$4 sm:$0xff]   ;;  %v1929_v32 = vld [vmem:[%s2519_s1 + $0x2c] ss:$20 sps:$4 sm:$0xff]  }
  0xfd   : > { %v2200_v49 = vpop.permute.xlu1 %944  ;;  %v525_v13 = vpop.permute.xlu0 %524 }
  0xfe   : > { %960 = vrot.lane.b32.xlu1 %v525_v13, %s2012_s8  ;;  %v617_v13 = vld [vmem:[%s2520_s2 + $0x8] sm:$0xff] }
 0x101   : > { %v2203_v14 = vpop.permute.xlu1 %946  ;;  %v435_v50 = vpop.permute.xlu0 %434 }
 0x105   : > { %v529_v51 = vpop.permute.xlu0 %528  ;;  %v433_v52 = vpop.permute.xlu1 %432 }
 0x106   : > { %928 = vrot.lane.b32.xlu0 %v433_v52, %s2012_s8  ;;  %v1933_v52 = vld [vmem:[%s2519_s1 + $0x28] ss:$20 sps:$4 sm:$0xff]  }
 0x109   : > { %v439_v53 = vpop.permute.xlu0 %438  ;;  %v527_v54 = vpop.permute.xlu1 %526 }
 0x10a   : > { %962 = vrot.lane.b32.xlu1 %v527_v54, %s2012_s8  ;;  %930 = vrot.lane.b32.xlu0 %v435_v50, %s2012_s8  ;;  %v2018_v50 = vmov 0   ;;  %v618_v54 = vld [vmem:[%s2520_s2 + $0x10] sm:$0xff] }
 0x10b   : > { %1918 = vset.pattern.permute.xlu1 %v2018_v50  ;;  %1917 = vset.pattern.permute.xlu0 %v2018_v50 }
 0x10d   : > { %v497_v55 = vpop.permute.xlu0 %496  ;;  %v437_v56 = vpop.permute.xlu1 %436 }
 0x10e   : > { %964 = vrot.lane.b32.xlu1 %v529_v51, %s2012_s8  ;;  %932 = vrot.lane.b32.xlu0 %v437_v56, %s2012_s8  ;;  %v616_v51 = vld [vmem:[%s2520_s2] sm:$0xff] }
 0x10f   : > { %v620_v56 = vld [vmem:[%s2520_s2 + $0x20] sm:$0xff] }
 0x111   : > { %v463_v57 = vpop.permute.xlu0 %462  ;;  %v531_v58 = vpop.permute.xlu1 %530 }
 0x112   : > { %966 = vrot.lane.b32.xlu1 %v531_v58, %s2012_s8  ;;  %934 = vrot.lane.b32.xlu0 %v439_v53, %s2012_s8  ;;  %v1935_v53 = vld [vmem:[%s2519_s1 + $0x54] ss:$20 sps:$4 sm:$0xff]  }
 0x113   : > { %v621_v58 = vld [vmem:[%s2520_s2 + $0x28] sm:$0xff] }
 0x115   : > { %v465_v59 = vpop.permute.xlu0 %464  ;;  %v461_v60 = vpop.permute.xlu1 %460 }
 0x116   : > { %952 = vrot.lane.b32.xlu1 %v497_v55, %s2012_s8  ;;  %936 = vrot.lane.b32.xlu0 %v461_v60, %s2012_s8  ;;  %v619_v55 = vld [vmem:[%s2520_s2 + $0x18] sm:$0xff] }
 0x119   : > { %v467_v61 = vpop.permute.xlu0 %466  ;;  %v499_v62 = vpop.permute.xlu1 %498 }
 0x11a   : > { %954 = vrot.lane.b32.xlu1 %v499_v62, %s2012_s8  ;;  %938 = vrot.lane.b32.xlu0 %v463_v57, %s2012_s8  ;;  %v1940_v57 = vld [vmem:[%s2519_s1 + $0x58] ss:$20 sps:$4 sm:$0xff]  }
 0x11b   : > { %v1943_v62 = vld [vmem:[%s2519_s1 + $0x84] ss:$20 sps:$4 sm:$0xff]  }
 0x11d   : > { %v2216_v63 = vpop.permute.xlu0 %920  ;;  %v501_v0 = vpop.permute.xlu1 %500 }
 0x11e   : > { %940 = vrot.lane.b32.xlu1 %v465_v59, %s2012_s8  ;;  %926 = vrot.lane.b32.xlu0 %v411_v12, %s2012_s8 }
 0x121   : > { %v2220_v1 = vpop.permute.xlu0 %922  ;;  %v503_v2 = vpop.permute.xlu1 %502 }
 0x122   : > { %974 = vrot.lane.b32.xlu1 %v539_v48, %s2012_s8  ;;  %956 = vrot.lane.b32.xlu0 %v501_v0, %s2012_s8  ;;  %v622_v0 = vld [vmem:[%s2520_s2 + $0x30] sm:$0xff] }
 0x125   : > { %v973_v7 = vpop.permute.xlu0 %972  ;;  %v949_v8 = vpop.permute.xlu1 %948 }
 0x126   : > { %958 = vrot.lane.b32.xlu1 %v503_v2, %s2012_s8  ;;  %942 = vrot.lane.b32.xlu0 %v467_v61, %s2012_s8  ;;  %v1939_v61 = vld [vmem:[%s2519_s1 + $0x50] ss:$20 sps:$4 sm:$0xff]   ;;  %v623_v2 = vld [vmem:[%s2520_s2 + $0x38] sm:$0xff] }
 0x129   : > { %v913_v20 = vpop.permute.xlu0 %912  ;;  %v951_v21 = vpop.permute.xlu1 %950 }
 0x12a   : > { %566 = vrot.lane.b32.xlu1 %v1635_v10, %s2017_s13  ;;  %564 = vrot.lane.b32.xlu0 %v1634_v17, %s2017_s13  ;;  %v1952_v10 = vld [vmem:[%s2519_s1 + $0xa8] ss:$20 sps:$4 sm:$0xff]  }
 0x12b   : > { %v627_v17 = vld [vmem:[%s2520_s2 + $0x58] sm:$0xff] }
 0x12d   : > { %v915_v18 = vpop.permute.xlu0 %914  ;;  %v969_v16 = vpop.permute.xlu1 %968 }
 0x131   : > { %v917_v9 = vpop.permute.xlu0 %916  ;;  %v971_v22 = vpop.permute.xlu1 %970 }
 0x135   : > { %v919_v23 = vpop.permute.xlu0 %918  ;;  %v925_v24 = vpop.permute.xlu1 %924 }
 0x139   : > { %v561_v26 = vpop.permute.xlu0 %560  ;;  %v563_v27 = vpop.permute.xlu1 %562 }
 0x13a   : > { %976 = vrot.lane.b32.xlu0 %v561_v26, %s2012_s8  ;;  %978 = vrot.lane.b32.xlu1 %v563_v27, %s2012_s8  ;;  %v1959_v26 = vld [vmem:[%s2519_s1 + $0xf4] ss:$20 sps:$4 sm:$0xff]   ;;  %v1964_v27 = vld [vmem:[%s2519_s1 + $0xf8] ss:$20 sps:$4 sm:$0xff]  }
 0x170   : > { %v961_v28 = vpop.permute.xlu1 %960 }
 0x171   : > { %1768 = vmatprep.subr.bf16.mxu1 %v961_v28  ;;  %v1967_v28 = vld [vmem:[%s2519_s1 + $0x124] ss:$20 sps:$4 sm:$0xff]  }
 0x172   : > { %1769 = vmatpush3.bf16.msra.mxu1 %v2200_v49  ;;  %v1934_v49 = vld [vmem:[%s2519_s1 + $0x30] ss:$20 sps:$4 sm:$0xff]  }
 0x178   : > { %v929_v29 = vpop.permute.xlu0 %928 }
 0x179   : > { %1704 = vmatprep.subr.bf16.mxu0 %v929_v29  ;;  %v1963_v29 = vld [vmem:[%s2519_s1 + $0xf0] ss:$20 sps:$4 sm:$0xff]  }
 0x17a   : > { %1705 = vmatpush3.bf16.msra.mxu0 %v913_v20  ;;  %v1955_v20 = vld [vmem:[%s2519_s1 + $0xd4] ss:$20 sps:$4 sm:$0xff]  }
 0x17c   : > { %v963_v30 = vpop.permute.xlu1 %962  ;;  %v931_v31 = vpop.permute.xlu0 %930 }
 0x17d   : > { %1706 = vmatprep.subr.bf16.mxu0 %v931_v31  ;;  %1770 = vmatprep.subr.bf16.mxu1 %v963_v30  ;;  %v1965_v30 = vld [vmem:[%s2519_s1 + $0x11c] ss:$20 sps:$4 sm:$0xff]   ;;  %v1970_v31 = vld [vmem:[%s2519_s1 + $0x120] ss:$20 sps:$4 sm:$0xff]  }
 0x17e   : > { %1707 = vmatpush3.bf16.msra.mxu0 %v915_v18  ;;  %1771 = vmatpush3.bf16.msra.mxu1 %v2203_v14  ;;  %v1937_v14 = vld [vmem:[%s2519_s1 + $0x5c] ss:$20 sps:$4 sm:$0xff]   ;;  %v629_v18 = vld [vmem:[%s2520_s2 + $0x68] sm:$0xff] }
 0x180   : > { %v965_v33 = vpop.permute.xlu1 %964  ;;  %v933_v25 = vpop.permute.xlu0 %932 }
 0x181   : > { %1708 = vmatprep.subr.bf16.mxu0 %v933_v25  ;;  %1772 = vmatprep.subr.bf16.mxu1 %v965_v33  ;;  %v1972_v33 = vld [vmem:[%s2519_s1 + $0xb0] ss:$20 sps:$4 sm:$0xff]   ;;  %v1969_v25 = vld [vmem:[%s2519_s1 + $0x118] ss:$20 sps:$4 sm:$0xff]  }
 0x182   : > { %1709 = vmatpush3.bf16.msra.mxu0 %v917_v9  ;;  %1773 = vmatpush3.bf16.msra.mxu1 %v949_v8  ;;  %v626_v8 = vld [vmem:[%s2520_s2 + $0x50] sm:$0xff] }
 0x183   : > { %v1958_v9 = vld [vmem:[%s2519_s1 + $0xd0] ss:$20 sps:$4 sm:$0xff]  }
 0x184   : > { %v967_v34 = vpop.permute.xlu1 %966  ;;  %v935_v35 = vpop.permute.xlu0 %934 }
 0x185   : > { %1710 = vmatprep.subr.bf16.mxu0 %v935_v35  ;;  %1774 = vmatprep.subr.bf16.mxu1 %v967_v34  ;;  %v1971_v34 = vld [vmem:[%s2519_s1 + $0x10] ss:$20 sps:$4 sm:$0xff]  }
 0x186   : > { %1711 = vmatpush3.bf16.msra.mxu0 %v919_v23  ;;  %1775 = vmatpush3.bf16.msra.mxu1 %v951_v21  ;;  %v628_v21 = vld [vmem:[%s2520_s2 + $0x60] sm:$0xff]  ;;  %v1961_v23 = vld [vmem:[%s2519_s1 + $0xfc] ss:$20 sps:$4 sm:$0xff]  }
 0x187   : > { %1776 = vmatprep.subr.bf16.mxu1 %v969_v16  ;;  %v1953_v16 = vld [vmem:[%s2519_s1 + $0xcc] ss:$20 sps:$4 sm:$0xff]  }
 0x188   : > { %v953_v36 = vpop.permute.xlu1 %952  ;;  %v937_v37 = vpop.permute.xlu0 %936 }
 0x189   : > { %1712 = vmatprep.subr.bf16.mxu0 %v937_v37  ;;  %v1973_v37 = vld [vmem:[%s2519_s1 + $0x38] ss:$20 sps:$4 sm:$0xff]  }
 0x18a   : > { %1713 = vmatpush3.bf16.msra.mxu0 %v2216_v63  ;;  %1777 = vmatpush3.bf16.msra.mxu1 %v953_v36  ;;  %v1941_v63 = vld [vmem:[%s2519_s1 + $0x7c] ss:$20 sps:$4 sm:$0xff]  }
 0x18b   : > { %1778 = vmatprep.subr.bf16.mxu1 %v971_v22  ;;  %v631_v22 = vld [vmem:[%s2520_s2 + $0x78] sm:$0xff] }
 0x18c   : > { %v955_v38 = vpop.permute.xlu1 %954  ;;  %v939_v39 = vpop.permute.xlu0 %938 }
 0x18d   : > { %1714 = vmatprep.subr.bf16.mxu0 %v939_v39  ;;  %v1975_v39 = vld [vmem:[%s2519_s1 + $0x60] ss:$20 sps:$4 sm:$0xff]  }
 0x18e   : > { %1715 = vmatpush3.bf16.msra.mxu0 %v2220_v1  ;;  %1779 = vmatpush3.bf16.msra.mxu1 %v955_v38  ;;  %v1946_v1 = vld [vmem:[%s2519_s1 + $0x80] ss:$20 sps:$4 sm:$0xff]   ;;  %v1974_v38 = vld [vmem:[%s2519_s1 + $0xd8] ss:$20 sps:$4 sm:$0xff]  }
 0x18f   : > { %1780 = vmatprep.subr.bf16.mxu1 %v973_v7  ;;  %v1947_v7 = vld [vmem:[%s2519_s1 + $0xa4] ss:$20 sps:$4 sm:$0xff]  }
 0x190   : > { %v941_v40 = vpop.permute.xlu1 %940  ;;  %v927_v41 = vpop.permute.xlu0 %926 }
 0x191   : > { %1716 = vmatprep.subr.bf16.mxu0 %v941_v40  ;;  %v1977_v40 = vld [vmem:[%s2519_s1 + $0x100] ss:$20 sps:$4 sm:$0xff]  }
 0x192   : > { %1717 = vmatpush3.bf16.msra.mxu0 %v925_v24  ;;  %v1957_v24 = vld [vmem:[%s2519_s1 + $0xc8] ss:$20 sps:$4 sm:$0xff]  }
 0x194   : > { %v975_v42 = vpop.permute.xlu1 %974  ;;  %v957_v43 = vpop.permute.xlu0 %956 }
 0x195   : > { %1781 = vmatpush3.bf16.msra.mxu1 %v957_v43 }
 0x196   : > { %1782 = vmatprep.subr.bf16.mxu1 %v975_v42  ;;  %v1978_v42 = vld [vmem:[%s2519_s1 + $0x128] ss:$20 sps:$4 sm:$0xff]  }
 0x198   : > { %v959_v44 = vpop.permute.xlu1 %958  ;;  %v943_v45 = vpop.permute.xlu0 %942 }
 0x199   : > { %1718 = vmatprep.subr.bf16.mxu0 %v943_v45  ;;  %1783 = vmatpush3.bf16.msra.mxu1 %v959_v44 }
 0x19a   : > { %1719 = vmatpush3.bf16.msra.mxu0 %v927_v41  ;;  %v1976_v41 = vld [vmem:[%s2519_s1 + $0x88] ss:$20 sps:$4 sm:$0xff]  }
 0x19c   : > { %v567_v12 = vpop.permute.xlu1 %566  ;;  %v565_v48 = vpop.permute.xlu0 %564  ;;  %1175 = vmatmul.mubr.bf16.vlgmr.msra.gmra.mrb[0].mxu1 %v1926_v46 }
 0x19d   : > { %982 = vrot.lane.b32.xlu1 %v567_v12, %s2012_s8  ;;  %980 = vrot.lane.b32.xlu0 %v565_v48, %s2012_s8 }
 0x19e   : > { %1078 = vmatmul.mubr.bf16.vlgmr.msra.gmra.mrb[0].mxu0 %v1923_v47  ;;  %1182 = vmatprep.mubr.bf16.mxu1 %v1931_v11 }
 0x19f   : > { %1085 = vmatprep.mubr.bf16.mxu0 %v1929_v32 }
 0x1a1   : > { %639 = vperm.xlu1 %1918, %v617_v13   ;;  %634 = vperm.xlu0 %1917, %v616_v51  }
 0x1a4   : > { %1183 = vmatmul.mubr.bf16.gmra.mrb[4].mxu1 %v1934_v49 }
 0x1a5   : > { %1190 = vmatprep.mubr.bf16.mxu1 %v1937_v14  ;;  %644 = vperm.xlu1 %1918, %v618_v54  }
 0x1a6   : > { %1086 = vmatmul.mubr.bf16.gmra.mrb[4].mxu0 %v1933_v52  ;;  %649 = vperm.xlu0 %1917, %v619_v55  }
 0x1a7   : > { %1093 = vmatprep.mubr.bf16.mxu0 %v1935_v53 }
 0x1a9   : > { %654 = vperm.xlu1 %1918, %v620_v56  }
 0x1aa   : > { %659 = vperm.xlu0 %1917, %v621_v58  }
 0x1ac   : > { %v977_v59 = vpop.permute.xlu0 %976  ;;  %v979_v60 = vpop.permute.xlu1 %978  ;;  %1191 = vmatmul.mubr.bf16.gmra.mrb[8].mxu1 %v1940_v57 }
 0x1ad   : > { %1844 = vmatprep.subr.bf16.mxu0 %v977_v59  ;;  %1868 = vmatprep.subr.bf16.mxu1 %v977_v59 }
 0x1ae   : > { %1845 = vmatpush3.bf16.msra.mxu0 %v977_v59  ;;  %1872 = vmatpush3.bf16.msra.mxu1 %v977_v59 }
 0x1af   : > { %1846 = vmatprep.subr.bf16.mxu0 %v979_v60  ;;  %1869 = vmatprep.subr.bf16.mxu1 %v979_v60 }
 0x1b0   : > { %1094 = vmatmul.mubr.bf16.gmra.mrb[8].mxu0 %v1939_v61  ;;  %1198 = vmatprep.mubr.bf16.mxu1 %v1943_v62 }
 0x1b1   : > { %1101 = vmatprep.mubr.bf16.mxu0 %v1941_v63  ;;  %664 = vperm.xlu1 %1918, %v622_v0  }
 0x1b2   : > { %1847 = vmatpush3.bf16.msra.mxu0 %v979_v60  ;;  %1873 = vmatpush3.bf16.msra.mxu1 %v979_v60 }
 0x1b3   : > { %669 = vperm.xlu0 %1917, %v623_v2  }
 0x1b4   : > { %1199 = vmatmul.mubr.bf16.gmra.mrb[12].mxu1 %v1946_v1 }
 0x1b5   : > { %1206 = vmatprep.mubr.bf16.mxu1 %v1949_v3  ;;  %674 = vperm.xlu1 %1918, %v624_v4  }
 0x1b7   : > { %679 = vperm.xlu0 %1917, %v625_v6  }
 0x1b8   : > { %1102 = vmatmul.mubr.bf16.gmra.mrb[12].mxu0 %v1945_v5 }
 0x1b9   : > { %1109 = vmatprep.mubr.bf16.mxu0 %v1947_v7  ;;  %684 = vperm.xlu1 %1918, %v626_v8  }
 0x1bb   : > { %689 = vperm.xlu0 %1917, %v627_v17  }
 0x1bc   : > { %1207 = vmatmul.mubr.bf16.gmra.mrb[16].mxu1 %v1952_v10 }
 0x1bd   : > { %1214 = vmatprep.mubr.bf16.mxu1 %v1955_v20  ;;  %694 = vperm.xlu1 %1918, %v628_v21  }
 0x1bf   : > { %699 = vperm.xlu0 %1917, %v629_v18  }
 0x1c0   : > { %1110 = vmatmul.mubr.bf16.gmra.mrb[16].mxu0 %v1951_v15 }
 0x1c1   : > { %1117 = vmatprep.mubr.bf16.mxu0 %v1953_v16  ;;  %704 = vperm.xlu1 %1918, %v630_v19  }
 0x1c3   : > { %709 = vperm.xlu0 %1917, %v631_v22  }
 0x1c4   : > { %1215 = vmatmul.mubr.bf16.gmra.mrb[20].mxu1 %v1958_v9 }
 0x1c5   : > { %1222 = vmatprep.mubr.bf16.mxu1 %v1961_v23 }
 0x1c8   : > { %1118 = vmatmul.mubr.bf16.gmra.mrb[20].mxu0 %v1957_v24 }
 0x1c9   : > { %1125 = vmatprep.mubr.bf16.mxu0 %v1959_v26 }
 0x1cc   : > { %1223 = vmatmul.mubr.bf16.gmra.mrb[24].mxu1 %v1964_v27 }
 0x1cd   : > { %1230 = vmatprep.mubr.bf16.mxu1 %v1967_v28 }
 0x1d0   : > { %1126 = vmatmul.mubr.bf16.gmra.mrb[24].mxu0 %v1963_v29 }
 0x1d1   : > { %1133 = vmatprep.mubr.bf16.mxu0 %v1965_v30 }
 0x1d4   : > { %1231 = vmatmul.mubr.bf16.gmra.mrb[28].mxu1 %v1970_v31 }
 0x1d5   : > { %1860 = vmatprep.mubr.msk.bf16.mxu1 %vm1020_vm0, %v1972_v33 }
 0x1d8   : > { %1134 = vmatmul.mubr.bf16.gmra.mrb[28].mxu0 %v1969_v25 }
 0x1d9   : > { %1852 = vmatprep.mubr.msk.bf16.mxu0 %vm1020_vm0, %v1971_v34 }
 0x20f   : > { %v981_v35 = vpop.permute.xlu0 %980  ;;  %v983_v36 = vpop.permute.xlu1 %982 }
 0x210   : > { %1848 = vmatprep.subr.bf16.mxu0 %v981_v35  ;;  %1870 = vmatprep.subr.bf16.mxu1 %v981_v35 }
 0x211   : > { %1849 = vmatpush3.bf16.msra.mxu0 %v981_v35  ;;  %1874 = vmatpush3.bf16.msra.mxu1 %v981_v35 }
 0x212   : > { %1850 = vmatprep.subr.bf16.mxu0 %v983_v36  ;;  %1871 = vmatprep.subr.bf16.mxu1 %v983_v36 }
 0x215   : > { %1851 = vmatpush3.bf16.msra.mxu0 %v983_v36  ;;  %1875 = vmatpush3.bf16.msra.mxu1 %v983_v36 }
 0x218   : > { %1853 = vmatmul.mubr.msk.bf16.vlgmr.msra.gmra.mrb[32].mxu0 %vm1020_vm0, %v1973_v37  ;;  %1861 = vmatmul.mubr.msk.bf16.vlgmr.msra.gmra.mrb[32].mxu1 %vm1020_vm0, %v1974_v38 }
 0x219   : > { %1856 = vmatprep.mubr.msk.bf16.mxu0 %vm1020_vm0, %v1975_v39  ;;  %1864 = vmatprep.mubr.msk.bf16.mxu1 %vm1020_vm0, %v1977_v40 }
 0x220   : > { %1857 = vmatmul.mubr.msk.bf16.gmra.mrb[36].mxu0 %vm1020_vm0, %v1976_v41  ;;  %1865 = vmatmul.mubr.msk.bf16.gmra.mrb[36].mxu1 %vm1020_vm0, %v1978_v42  ;;  %v635_v45 = vpop.permute.xlu0 %634  ;;  %v640_v50 = vpop.permute.xlu1 %639 }
 0x224   : > { %v645_v57 = vpop.permute.xlu1 %644 }
 0x225   : > { %v650_v4 = vpop.permute.xlu0 %649 }
 0x228   : > { %v655_v22 = vpop.permute.xlu1 %654 }
 0x229   : > { %v660_v27 = vpop.permute.xlu0 %659 }
 0x230   : > { %v665_v41 = vpop.permute.xlu1 %664 }
 0x26f   : > { %v1784_v43 = vpop.f32.mrb[0].mxu1 }
 0x270   : > { %v1785_v44 = vpop.f32.mrb[1].mxu1 }
 0x271   : > { %v1720_v46 = vpop.f32.mrb[0].mxu0  ;;  %v1786_v47 = vadd.f32 %v1785_v44, %v1784_v43  ;;  %v1787_v11 = vpop.f32.mrb[2].mxu1 }
 0x272   : > { %v1721_v32 = vpop.f32.mrb[1].mxu0  ;;  %v1788_v12 = vpop.f32.mrb[3].mxu1 }
 0x273   : > { %v1722_v48 = vadd.f32 %v1721_v32, %v1720_v46  ;;  %v1723_v49 = vpop.f32.mrb[2].mxu0  ;;  %v1789_v13 = vadd.f32 %v1788_v12, %v1787_v11 }
 0x274   : > { %v1724_v14 = vpop.f32.mrb[3].mxu0 }
 0x275   : > { %v1725_v51 = vadd.f32 %v1724_v14, %v1723_v49  ;;  %v1080_v52 = vadd.f32 %v1722_v48, %v635_v45  ;;  %v670_v45 = vpop.permute.xlu0 %669 }
 0x277   : > { %v1083_v53 = vadd.f32 %v1725_v51, %v640_v50  ;;  %v1790_v54 = vpop.f32.mrb[4].mxu1  ;;  %v2420_v55 = vadd.f32 %v1786_v47, %v1080_v52 }
 0x278   : > { %v1791_v56 = vpop.f32.mrb[5].mxu1 }
 0x279   : > { %v1726_v58 = vpop.f32.mrb[4].mxu0  ;;  %v1792_v59 = vadd.f32 %v1791_v56, %v1790_v54  ;;  %v1793_v60 = vpop.f32.mrb[6].mxu1  ;;  %v2422_v61 = vadd.f32 %v1789_v13, %v1083_v53 }
 0x27a   : > { %v1727_v62 = vpop.f32.mrb[5].mxu0  ;;  %v1794_v63 = vpop.f32.mrb[7].mxu1 }
 0x27b   : > { %v1728_v0 = vadd.f32 %v1727_v62, %v1726_v58  ;;  %v1729_v1 = vpop.f32.mrb[6].mxu0  ;;  %v1795_v2 = vadd.f32 %v1794_v63, %v1793_v60  ;;  %v675_v54 = vpop.permute.xlu1 %674 }
 0x27c   : > { %v1730_v3 = vpop.f32.mrb[7].mxu0 }
 0x27d   : > { %v1731_v5 = vadd.f32 %v1730_v3, %v1729_v1  ;;  %v1088_v6 = vadd.f32 %v1728_v0, %v645_v57 }
 0x27f   : > { %v1091_v7 = vadd.f32 %v1731_v5, %v650_v4  ;;  %v1796_v8 = vpop.f32.mrb[8].mxu1  ;;  %v2424_v10 = vadd.f32 %v1792_v59, %v1088_v6  ;;  %v680_v59 = vpop.permute.xlu0 %679 }
 0x280   : > { %v1797_v17 = vpop.f32.mrb[9].mxu1 }
 0x281   : > { %v1798_v20 = vadd.f32 %v1797_v17, %v1796_v8  ;;  %v1799_v21 = vpop.f32.mrb[10].mxu1  ;;  %v2426_v15 = vadd.f32 %v1795_v2, %v1091_v7 }
 0x282   : > { %v1800_v18 = vpop.f32.mrb[11].mxu1 }
 0x283   : > { %v1732_v16 = vpop.f32.mrb[8].mxu0  ;;  %v1801_v19 = vadd.f32 %v1800_v18, %v1799_v21 }
 0x284   : > { %v1733_v9 = vpop.f32.mrb[9].mxu0 }
 0x285   : > { %v1734_v23 = vadd.f32 %v1733_v9, %v1732_v16  ;;  %v1735_v24 = vpop.f32.mrb[10].mxu0  ;;  %v685_v16 = vpop.permute.xlu1 %684 }
 0x286   : > { %v1736_v26 = vpop.f32.mrb[11].mxu0 }
 0x287   : > { %v1737_v28 = vadd.f32 %v1736_v26, %v1735_v24  ;;  %v1096_v29 = vadd.f32 %v1734_v23, %v655_v22  ;;  %v1802_v30 = vpop.f32.mrb[12].mxu1  ;;  %v690_v24 = vpop.permute.xlu0 %689 }
 0x288   : > { %v1803_v31 = vpop.f32.mrb[13].mxu1 }
 0x289   : > { %v1099_v33 = vadd.f32 %v1737_v28, %v660_v27  ;;  %v1804_v25 = vadd.f32 %v1803_v31, %v1802_v30  ;;  %v1805_v34 = vpop.f32.mrb[14].mxu1  ;;  %v2428_v35 = vadd.f32 %v1798_v20, %v1096_v29 }
 0x28a   : > { %v1806_v36 = vpop.f32.mrb[15].mxu1 }
 0x28b   : > { %v1738_v37 = vpop.f32.mrb[12].mxu0  ;;  %v1807_v38 = vadd.f32 %v1806_v36, %v1805_v34  ;;  %v2430_v39 = vadd.f32 %v1801_v19, %v1099_v33 }
 0x28c   : > { %v1739_v40 = vpop.f32.mrb[13].mxu0 }
 0x28d   : > { %v1740_v42 = vadd.f32 %v1739_v40, %v1738_v37  ;;  %v1741_v43 = vpop.f32.mrb[14].mxu0  ;;  %v695_v40 = vpop.permute.xlu1 %694 }
 0x28e   : > { %v1742_v44 = vpop.f32.mrb[15].mxu0 }
 0x28f   : > { %v1743_v46 = vadd.f32 %v1742_v44, %v1741_v43  ;;  %v1808_v47 = vpop.f32.mrb[16].mxu1  ;;  %v1104_v11 = vadd.f32 %v1740_v42, %v665_v41 }
 0x290   : > { %v1809_v32 = vpop.f32.mrb[17].mxu1 }
 0x291   : > { %v1810_v12 = vadd.f32 %v1809_v32, %v1808_v47  ;;  %v1811_v48 = vpop.f32.mrb[18].mxu1  ;;  %v1107_v49 = vadd.f32 %v1743_v46, %v670_v45  ;;  %v2432_v13 = vadd.f32 %v1804_v25, %v1104_v11  ;;  %v700_v45 = vpop.permute.xlu0 %699 }
 0x292   : > { %v1812_v14 = vpop.f32.mrb[19].mxu1 }
 0x293   : > { %v1744_v50 = vpop.f32.mrb[16].mxu0  ;;  %v1813_v51 = vadd.f32 %v1812_v14, %v1811_v48  ;;  %v2434_v52 = vadd.f32 %v1807_v38, %v1107_v49 }
 0x294   : > { %v1745_v53 = vpop.f32.mrb[17].mxu0 }
 0x295   : > { %v1746_v56 = vadd.f32 %v1745_v53, %v1744_v50  ;;  %v1747_v57 = vpop.f32.mrb[18].mxu0 }
 0x296   : > { %v1748_v58 = vpop.f32.mrb[19].mxu0 }
 0x297   : > { %v1749_v60 = vadd.f32 %v1748_v58, %v1747_v57  ;;  %v1814_v62 = vpop.f32.mrb[20].mxu1  ;;  %v1112_v63 = vadd.f32 %v1746_v56, %v675_v54  ;;  %v710_v57 = vpop.permute.xlu0 %709 }
 0x298   : > { %v1815_v0 = vpop.f32.mrb[21].mxu1 }
 0x299   : > { %v1816_v1 = vadd.f32 %v1815_v0, %v1814_v62  ;;  %v1817_v2 = vpop.f32.mrb[22].mxu1  ;;  %v1115_v3 = vadd.f32 %v1749_v60, %v680_v59  ;;  %v1209_v4 = vadd.f32 %v1810_v12, %v1112_v63 }
 0x29a   : > { %v1818_v5 = vpop.f32.mrb[23].mxu1 }
 0x29b   : > { %v1750_v6 = vpop.f32.mrb[20].mxu0  ;;  %v1819_v7 = vadd.f32 %v1818_v5, %v1817_v2  ;;  %v2436_v8 = vadd.f32 %v1813_v51, %v1115_v3  ;;  %v705_v51 = vpop.permute.xlu1 %704 }
 0x29c   : > { %v1751_v17 = vpop.f32.mrb[21].mxu0 }
 0x29d   : > { %v1752_v20 = vadd.f32 %v1751_v17, %v1750_v6  ;;  %v1753_v21 = vpop.f32.mrb[22].mxu0 }
 0x29e   : > { %v1754_v18 = vpop.f32.mrb[23].mxu0 }
 0x29f   : > { %v1755_v19 = vadd.f32 %v1754_v18, %v1753_v21  ;;  %v1820_v9 = vpop.f32.mrb[24].mxu1  ;;  %v1120_v22 = vadd.f32 %v1752_v20, %v685_v16 }
 0x2a0   : > { %v1821_v23 = vpop.f32.mrb[25].mxu1 }
 0x2a1   : > { %v1822_v26 = vadd.f32 %v1821_v23, %v1820_v9  ;;  %v1823_v27 = vpop.f32.mrb[26].mxu1  ;;  %v1217_v28 = vadd.f32 %v1816_v1, %v1120_v22  ;;  %v1123_v29 = vadd.f32 %v1755_v19, %v690_v24 }
 0x2a2   : > { %v1824_v30 = vpop.f32.mrb[27].mxu1 }
 0x2a3   : > { %v1756_v31 = vpop.f32.mrb[24].mxu0  ;;  %v1825_v33 = vadd.f32 %v1824_v30, %v1823_v27  ;;  %v1220_v25 = vadd.f32 %v1819_v7, %v1123_v29 }
 0x2a4   : > { %v1757_v34 = vpop.f32.mrb[25].mxu0 }
 0x2a5   : > { %v1758_v36 = vadd.f32 %v1757_v34, %v1756_v31  ;;  %v1759_v37 = vpop.f32.mrb[26].mxu0 }
 0x2a6   : > { %v1760_v38 = vpop.f32.mrb[27].mxu0 }
 0x2a7   : > { %v1761_v41 = vadd.f32 %v1760_v38, %v1759_v37  ;;  %v1826_v42 = vpop.f32.mrb[28].mxu1  ;;  %v1128_v43 = vadd.f32 %v1758_v36, %v695_v40 }
 0x2a8   : > { %v1827_v44 = vpop.f32.mrb[29].mxu1 }
 0x2a9   : > { %v1828_v46 = vadd.f32 %v1827_v44, %v1826_v42  ;;  %v1829_v47 = vpop.f32.mrb[30].mxu1  ;;  %v1131_v11 = vadd.f32 %v1761_v41, %v700_v45  ;;  %v1225_v32 = vadd.f32 %v1822_v26, %v1128_v43 }
 0x2aa   : > { %v1830_v12 = vpop.f32.mrb[31].mxu1 }
 0x2ab   : > { %v1762_v48 = vpop.f32.mrb[28].mxu0  ;;  %v1831_v49 = vadd.f32 %v1830_v12, %v1829_v47  ;;  %v1228_v14 = vadd.f32 %v1825_v33, %v1131_v11 }
 0x2ac   : > { %v1763_v50 = vpop.f32.mrb[29].mxu0 }
 0x2ad   : > { %v1764_v53 = vadd.f32 %v1763_v50, %v1762_v48  ;;  %v1765_v54 = vpop.f32.mrb[30].mxu0 }
 0x2ae   : > { %v1766_v56 = vpop.f32.mrb[31].mxu0 }
 0x2af   : > { %v1767_v58 = vadd.f32 %v1766_v56, %v1765_v54  ;;  %v1136_v59 = vadd.f32 %v1764_v53, %v705_v51 }
 0x2b1   : > { %v1139_v60 = vadd.f32 %v1767_v58, %v710_v57  ;;  %v1233_v62 = vadd.f32 %v1828_v46, %v1136_v59 }
 0x2b3   : > { %v1236_v63 = vadd.f32 %v1831_v49, %v1139_v60 }
 0x2eb   : > { %v1854_v0 = vpop.f32.mrb[32].mxu0  ;;  %v1862_v1 = vpop.f32.mrb[32].mxu1 }
 0x2ec   : > { %v1282_v2 = vadd.f32 %v1854_v0, %v2424_v10  ;;  %v1314_v3 = vadd.f32 %v1862_v1, %v1217_v28  ;;  %v1273_v5 = vpop.f32.mrb[33].mxu0  ;;  %v1305_v6 = vpop.f32.mrb[33].mxu1 }
 0x2ed   : > { %v1274_v7 = vadd.f32 %v1273_v5, %v2420_v55  ;;  %v1306_v17 = vadd.f32 %v1305_v6, %v1209_v4  ;;  %v1855_v20 = vpop.f32.mrb[34].mxu0  ;;  %v1863_v21 = vpop.f32.mrb[34].mxu1 }
 0x2ee   : > { %v1285_v18 = vadd.f32 %v1855_v20, %v2426_v15  ;;  %v1317_v16 = vadd.f32 %v1863_v21, %v1220_v25  ;;  %v1276_v19 = vpop.f32.mrb[35].mxu0  ;;  %v1308_v9 = vpop.f32.mrb[35].mxu1  ;;  %v1338_v24 = vmax.f32 %v1282_v2, 0.0  ;;  %v1346_v26 = vmax.f32 %v1314_v3, 0.0 }
 0x2ef   : > { %v1277_v22 = vadd.f32 %v1276_v19, %v2422_v61  ;;  %v1309_v23 = vadd.f32 %v1308_v9, %v2436_v8  ;;  %v1336_v28 = vmax.f32 %v1274_v7, 0.0  ;;  %v1344_v29 = vmax.f32 %v1306_v17, 0.0 }
 0x2f0   : > { %v1339_v10 = vmax.f32 %v1285_v18, 0.0  ;;  %v1347_v27 = vmax.f32 %v1317_v16, 0.0 }
 0x2f1   : > { %v1337_v30 = vmax.f32 %v1277_v22, 0.0  ;;  %v1345_v55 = vmax.f32 %v1309_v23, 0.0 }
 0x2f2   : > { %v1353_v4 = vpack.c.bf16 %v1339_v10, %v1338_v24  ;;  %v1357_v31 = vpack.c.bf16 %v1347_v27, %v1346_v26 }
 0x2f3   : > { %v1352_v33 = vpack.c.bf16 %v1337_v30, %v1336_v28  ;;  %v1356_v34 = vpack.c.bf16 %v1345_v55, %v1344_v29  ;;  %v1858_v15 = vpop.f32.mrb[36].mxu0  ;;  %v1866_v25 = vpop.f32.mrb[36].mxu1 }
 0x2f4   : > { %v1298_v36 = vadd.f32 %v1858_v15, %v2432_v13  ;;  %v1289_v37 = vpop.f32.mrb[37].mxu0  ;;  %v1330_v61 = vadd.f32 %v1866_v25, %v1233_v62  ;;  %1370 = vrot.lane.b32.xlu0 %v1353_v4, %s2019_s20  ;;  %v1321_v8 = vpop.f32.mrb[37].mxu1 }
 0x2f5   : > { %v1290_v38 = vadd.f32 %v1289_v37, %v2428_v35  ;;  %v1859_v40 = vpop.f32.mrb[38].mxu0  ;;  %v1322_v41 = vadd.f32 %v1321_v8, %v1225_v32  ;;  %1368 = vrot.lane.b32.xlu1 %v1352_v33, %s2019_s20  ;;  %v1867_v42 = vpop.f32.mrb[38].mxu1 }
 0x2f6   : > { %v1301_v43 = vadd.f32 %v1859_v40, %v2434_v52  ;;  %v1292_v44 = vpop.f32.mrb[39].mxu0  ;;  %v1333_v45 = vadd.f32 %v1867_v42, %v1236_v63  ;;  %v1324_v46 = vpop.f32.mrb[39].mxu1  ;;  %v1342_v11 = vmax.f32 %v1298_v36, 0.0  ;;  %v1350_v12 = vmax.f32 %v1330_v61, 0.0 }
 0x2f7   : > { %v1293_v13 = vadd.f32 %v1292_v44, %v2430_v39  ;;  %v1325_v47 = vadd.f32 %v1324_v46, %v1228_v14  ;;  %v1340_v35 = vmax.f32 %v1290_v38, 0.0  ;;  %v1348_v32 = vmax.f32 %v1322_v41, 0.0 }
 0x2f8   : > { %v1343_v48 = vmax.f32 %v1301_v43, 0.0  ;;  %v1351_v49 = vmax.f32 %v1333_v45, 0.0  ;;  %1378 = vrot.lane.b32.xlu0 %v1357_v31, %s2019_s20 }
 0x2f9   : > { %v1341_v50 = vmax.f32 %v1293_v13, 0.0  ;;  %v1349_v51 = vmax.f32 %v1325_v47, 0.0  ;;  %1376 = vrot.lane.b32.xlu1 %v1356_v34, %s2019_s20 }
 0x2fa   : > { %v1355_v52 = vpack.c.bf16 %v1343_v48, %v1342_v11  ;;  %v1359_v53 = vpack.c.bf16 %v1351_v49, %v1350_v12 }
 0x2fb   : > { %v1354_v54 = vpack.c.bf16 %v1341_v50, %v1340_v35  ;;  %v1358_v56 = vpack.c.bf16 %v1349_v51, %v1348_v32 }
 0x2fc   : > { %1374 = vrot.lane.b32.xlu0 %v1355_v52, %s2019_s20 }
 0x2fd   : > { %1372 = vrot.lane.b32.xlu1 %v1354_v54, %s2019_s20 }
 0x300   : > { %1382 = vrot.lane.b32.xlu0 %v1359_v53, %s2019_s20 }
 0x301   : > { %1380 = vrot.lane.b32.xlu1 %v1358_v56, %s2019_s20 }
 0x366   : > { %v1371_v39 = vpop.permute.xlu0 %1370 }
 0x367   : > { %v1389_v14 = vsel %vm1384_vm1, 0, %v1371_v39  ;;  %v1369_v57 = vpop.permute.xlu1 %1368 }
 0x368   : > { %v1404_v58 = vsel %vm1402_vm2, %v1389_v14, 0  ;;  %v1387_v59 = vsel %vm1384_vm1, 0, %v1369_v57 }
 0x369   : > { %v1686_v60 = vcombine.low %v1404_v58, %v1404_v58  ;;  %v1687_v62 = vcombine.high %v1404_v58, %v1404_v58  ;;  %v1403_v63 = vsel %vm1402_vm2, %v1387_v59, 0 }
 0x36a   : > { %v1684_v0 = vcombine.low %v1403_v63, %v1403_v63  ;;  %v1685_v1 = vcombine.high %v1403_v63, %v1403_v63  ;;  %v1379_v2 = vpop.permute.xlu0 %1378 }
 0x36b   : > { %1470 = vst.msk [vmem:[%s2460_s24 + $0x8] sm:$0xf] %vm1467_vm3, %v1686_v60  ;;  %1471 = vst.msk [vmem:[%s2460_s24 + $0xc] sm:$0xf] %vm1467_vm3, %v1687_v62  ;;  %v1397_v3 = vsel %vm1384_vm1, 0, %v1379_v2  ;;  %v1377_v5 = vpop.permute.xlu1 %1376 }
 0x36c   : > { %1468 = vst.msk [vmem:[%s2460_s24] sm:$0xf] %vm1467_vm3, %v1684_v0  ;;  %1469 = vst.msk [vmem:[%s2460_s24 + $0x4] sm:$0xf] %vm1467_vm3, %v1685_v1  ;;  %v1408_v6 = vsel %vm1402_vm2, %v1397_v3, 0  ;;  %v1395_v7 = vsel %vm1384_vm1, 0, %v1377_v5 }
 0x36d   : > { %v1694_v17 = vcombine.low %v1408_v6, %v1408_v6  ;;  %v1695_v20 = vcombine.high %v1408_v6, %v1408_v6  ;;  %v1407_v21 = vsel %vm1402_vm2, %v1395_v7, 0 }
 0x36e   : > { %v1692_v18 = vcombine.low %v1407_v21, %v1407_v21  ;;  %v1693_v16 = vcombine.high %v1407_v21, %v1407_v21  ;;  %v1375_v19 = vpop.permute.xlu0 %1374 }
 0x36f   : > { %1478 = vst.msk [vmem:[%s2460_s24 + $0x28] sm:$0xf] %vm1467_vm3, %v1694_v17  ;;  %1479 = vst.msk [vmem:[%s2460_s24 + $0x2c] sm:$0xf] %vm1467_vm3, %v1695_v20  ;;  %v1393_v9 = vsel %vm1384_vm1, 0, %v1375_v19  ;;  %v1373_v22 = vpop.permute.xlu1 %1372 }
 0x370   : > { %1476 = vst.msk [vmem:[%s2460_s24 + $0x20] sm:$0xf] %vm1467_vm3, %v1692_v18  ;;  %1477 = vst.msk [vmem:[%s2460_s24 + $0x24] sm:$0xf] %vm1467_vm3, %v1693_v16  ;;  %v1406_v23 = vsel %vm1402_vm2, %v1393_v9, 0  ;;  %v1391_v24 = vsel %vm1384_vm1, 0, %v1373_v22 }
 0x371   : > { %v1690_v26 = vcombine.low %v1406_v23, %v1406_v23  ;;  %v1691_v10 = vcombine.high %v1406_v23, %v1406_v23  ;;  %v1405_v27 = vsel %vm1402_vm2, %v1391_v24, 0 }
 0x372   : > { %v1688_v28 = vcombine.low %v1405_v27, %v1405_v27  ;;  %v1689_v29 = vcombine.high %v1405_v27, %v1405_v27  ;;  %v1383_v30 = vpop.permute.xlu0 %1382 }
 0x373   : > { %1474 = vst.msk [vmem:[%s2460_s24 + $0x18] sm:$0xf] %vm1467_vm3, %v1690_v26  ;;  %1475 = vst.msk [vmem:[%s2460_s24 + $0x1c] sm:$0xf] %vm1467_vm3, %v1691_v10  ;;  %v1401_v55 = vsel %vm1384_vm1, 0, %v1383_v30  ;;  %v1381_v4 = vpop.permute.xlu1 %1380 }
 0x374   : > { %1472 = vst.msk [vmem:[%s2460_s24 + $0x10] sm:$0xf] %vm1467_vm3, %v1688_v28  ;;  %1473 = vst.msk [vmem:[%s2460_s24 + $0x14] sm:$0xf] %vm1467_vm3, %v1689_v29  ;;  %v1410_v31 = vsel %vm1402_vm2, %v1401_v55, 0  ;;  %v1399_v33 = vsel %vm1384_vm1, 0, %v1381_v4 }
 0x375   : > { %v1698_v34 = vcombine.low %v1410_v31, %v1410_v31  ;;  %v1699_v15 = vcombine.high %v1410_v31, %v1410_v31  ;;  %v1409_v25 = vsel %vm1402_vm2, %v1399_v33, 0 }
 0x376   : > { %v1696_v36 = vcombine.low %v1409_v25, %v1409_v25  ;;  %v1697_v37 = vcombine.high %v1409_v25, %v1409_v25 }
 0x377   : > { %1482 = vst.msk [vmem:[%s2460_s24 + $0x38] sm:$0xf] %vm1467_vm3, %v1698_v34  ;;  %1483 = vst.msk [vmem:[%s2460_s24 + $0x3c] sm:$0xf] %vm1467_vm3, %v1699_v15 }
 0x378   : > { %1480 = vst.msk [vmem:[%s2460_s24 + $0x30] sm:$0xf] %vm1467_vm3, %v1696_v36  ;;  %1481 = vst.msk [vmem:[%s2460_s24 + $0x34] sm:$0xf] %vm1467_vm3, %v1697_v37 }
 0x379 PF: > { %s14_s17 = sadd.s32 1, %s2001_s17   ;;  %s2523_s15 = smov %s1997_s16 }
 0x37a   : > { %p11_p5 = scmp.ge.s32.totalorder %s14_s17, 4   ;;  %s2524_s16 = smov %s2526_s18 }
 0x37c   :  { %13 = sbr.rel (!%p11_p5) target bundleno = 2 (0x2), region = 72 }

// kernel: vgg19_gram_pyramid_forward.9
= control target key start
LH: loop header
LB: loop body
LE: loop exit
PB: predicated region body
PF: predicated region fallthrough
CT: control target
= control target key end

     0   :  { %7 = vsyncpa [#allocation4], 0  ;;  %s989_s0 = inlined_call_operand.vmem [shape: bf16[2,64,64], index: 0, kind: input, shape index: {}]   ;;  %s990_s1 = inlined_call_operand.vmem [shape: bf16[2,128,64], index: 1, kind: input, shape index: {}]   ;;  %s991_s2 = inlined_call_operand.hbm [shape: f32[2,64,128], index: 2, kind: output, shape index: {}]  }
   0x1   :  { %9 = vsyncpa [#allocation4 + $0x1], 0  ;;  %s823_s9 = smov 0   ;;  %s825_s10 = smov 0  }
   0x2   :  { %s827_s11 = smov 0   ;;  %s829_s12 = smov 0  }
   0x3   :  { %s831_s13 = smov 0   ;;  %s833_s14 = smov 0  }
   0x4 LB: > { %s554_s15 = sadd.s32 4294967295, %s803_s14   ;;  %s555_s16 = sadd.s32 4294967294, %s803_s14   ;;  %s803_s14 = sphi %s833_s14, %s15_s14   ;;  %s799_s13 = sphi %s831_s13, %s998_s13   ;;  %s795_s12 = sphi %s829_s12, %s997_s12   ;;  %s791_s11 = sphi %s827_s11, %s996_s11   ;;  %s787_s10 = sphi %s825_s10, %s995_s10   ;;  %s783_s9 = sphi %s823_s9, %s994_s9  }
   0x5   : > { %s27_s17 = sadd.s32 1, %s799_s13  ;;  %s90_s18 = sadd.s32 1, %s791_s11 }
   0x6   : > { %p29_p0 = scmp.ge.s32.totalorder %s27_s17, 2  ;;  %p100_p1 = scmp.ne.s32.totalorder %s791_s11, %s787_s10 }
   0x7   : > { %p101_p2 = scmp.eq.s32.totalorder %s554_s15, 1  ;;  %p106_p3 = scmp.ne.s32.totalorder %s787_s10, %s783_s9 }
   0x8   : > { %s1000_s17 = smov (%p29_p0, %s27_s17), 0  ;;  %p107_p5 = scmp.eq.s32.totalorder %s555_s16, 1 }
   0x9   : > { %p863_p4 = por %p101_p2, %p100_p1  ;;  %s87_s20 = ssub.s32 %s799_s13, %s1000_s17 }
   0xa   : > { %p558_p6 = scmp.ge.s32.totalorder %s803_s14, 1  ;;  %p88_p7 = scmp.eq.s32.totalorder %s87_s20, 0 }
   0xb   : > { %p870_p8 = por %p107_p5, %p106_p3  ;;  %p147_p9 = scmp.lt.s32.totalorder %s803_s14, 3 }
   0xc   : > { %s876_s22 = scalar_select %p88_p7, %s791_s11, %s90_s18  }
   0xd   : > { %p148_p10 = pnand %p558_p6, %p147_p9 }
   0xe   : > { %p180_p11 = scmp.lt.s32.totalorder (!%p148_p10), %s795_s12, 1  ;;  %vm301_vm0 = vcmask (!%p148_p10), 523264   ;;  %s177_s4 = sand.u32 (!%p148_p10), 1, %s787_s10  }
   0xf   : > { %151 = sbr.rel (%p148_p10) target bundleno = 323 (0x143), region = 28  ;;  %s559_s5 = sshll.u32 (!%p148_p10), %s177_s4, 6 }
  0x10   : > { %s587_s6 = sshll.u32 (!%p148_p10), %s795_s12, 10  ;;  %s179_s7 = scalar_lea.vmem (!%p148_p10), [#allocation3], %s559_s5 }
  0x11   : > { %s460_s8 = sshll.u32 (!%p148_p10), %s179_s7, 4  ;;  %s937_s16 = scalar_lea.hbm (!%p148_p10), %s991_s2, %s587_s6  ;;  %s939_s8 = int_to_ptr.vmem [resolvable:$true] %s460_s8 }
  0x12   : > { %s943_s18 = scalar_lea.sflag (!%p148_p10), [#allocation4], %s177_s4  ;;  %s725_s20 = scalar_lea.vmem (!%p148_p10), %s939_s8, 1024 }
  0x13   : > { %p726_p12 = scmp.ne.s32.totalorder (!%p148_p10), %s939_s8, %s725_s20 }
  0x15   : > { %p727_p13 = pnand (!%p148_p10), %p726_p12, %p863_p4 }
  0x16   : > { %s181_s23 = scalar_select %p180_p11, %s795_s12, 1 }
  0x17   : > { %p728_p0 = pneg %p727_p13 }
  0x18   : > { %s586_s24 = sshll.u32 %s181_s23, 6  ;;  %s585_s28 = sshll.u32 %s181_s23, 5 }
  0x19   : > { %s883_s27 = scalar_lea.vmem %s990_s1, %s586_s24  ;;  %s895_s3 = scalar_lea.vmem %s989_s0, %s585_s28 }
  0x1a   : > { %v713_v0 = vld [vmem:[%s883_s27] sm:$0xff]   ;;  %v714_v1 = vld [vmem:[%s883_s27 + $0x8] sm:$0xff]   ;;  %v715_v3 = vld [vmem:[%s883_s27 + $0x10] sm:$0xff]   ;;  %s805_s23 = smov [#allocation3]  }
  0x1b   : > { %640 = vmatprep.subr.msk.bf16.mxu0 %vm301_vm0, %v713_v0  ;;  %641 = vmatprep.subr.msk.bf16.mxu1 %vm301_vm0, %v713_v0  ;;  %v315_v2 = vsel %vm301_vm0, %v713_v0, 0  ;;  %v318_v4 = vsel %vm301_vm0, %v714_v1, 0  ;;  %v721_v5 = vld [vmem:[%s895_s3] sm:$0xff]   ;;  %v722_v6 = vld [vmem:[%s895_s3 + $0x10] sm:$0xff]   ;;  %v321_v7 = vsel %vm301_vm0, %v715_v3, 0  ;;  %v716_v8 = vld [vmem:[%s883_s27 + $0x18] sm:$0xff]  }
  0x1c   : > { %601 = vmatpush3.bf16.xpose.msra.mxu0 %v315_v2  ;;  %632 = vmatpush3.bf16.xpose.msra.mxu1 %v315_v2  ;;  %v324_v9 = vsel %vm301_vm0, %v716_v8, 0  ;;  %v717_v10 = vld [vmem:[%s883_s27 + $0x20] sm:$0xff]   ;;  %v718_v12 = vld [vmem:[%s883_s27 + $0x28] sm:$0xff]   ;;  %v719_v14 = vld [vmem:[%s883_s27 + $0x30] sm:$0xff]   ;;  %s729_s24 = sshll.u32 %s805_s23, 4  ;;  %s730_s24 = int_to_ptr.vmem [resolvable:$false] %s729_s24 }
  0x1d   : > { %642 = vmatprep.subr.msk.bf16.mxu0 %vm301_vm0, %v714_v1  ;;  %643 = vmatprep.subr.msk.bf16.mxu1 %vm301_vm0, %v714_v1  ;;  %v327_v11 = vsel %vm301_vm0, %v717_v10, 0  ;;  %v330_v13 = vsel %vm301_vm0, %v718_v12, 0  ;;  %v333_v15 = vsel %vm301_vm0, %v719_v14, 0  ;;  %v720_v16 = vld [vmem:[%s883_s27 + $0x38] sm:$0xff]   ;;  %v723_v18 = vld [vmem:[%s895_s3 + $0x8] sm:$0xff]   ;;  %s731_s25 = scalar_lea.vmem %s730_s24, 2048  ;;  %p732_p1 = scmp.lt.s32.totalorder %s939_s8, %s730_s24 }
  0x1e   : > { %616 = vmatprep.mubr.msk.bf16.mxu0 %vm301_vm0, %v721_v5  ;;  %620 = vmatprep.mubr.msk.bf16.mxu1 %vm301_vm0, %v722_v6  ;;  %v336_v17 = vsel %vm301_vm0, %v720_v16, 0  ;;  %v724_v19 = vld [vmem:[%s895_s3 + $0x18] sm:$0xff]   ;;  %p733_p2 = scmp.lt.s32.totalorder %s731_s25, %s725_s20 }
  0x20   : > { %p734_p3 = por %p733_p2, %p732_p1 }
  0x22   : > { %p735_p5 = pnand %p734_p3, %p728_p0 }
  0x24   : > { %603 = vmatpush3.bf16.xpose.msra.mxu0 %v318_v4  ;;  %633 = vmatpush3.bf16.xpose.msra.mxu1 %v318_v4 }
  0x25   : > { %644 = vmatprep.subr.msk.bf16.mxu0 %vm301_vm0, %v715_v3  ;;  %645 = vmatprep.subr.msk.bf16.mxu1 %vm301_vm0, %v715_v3 }
  0x2c   : > { %605 = vmatpush3.bf16.xpose.msra.mxu0 %v321_v7  ;;  %634 = vmatpush3.bf16.xpose.msra.mxu1 %v321_v7 }
  0x2d   : > { %646 = vmatprep.subr.msk.bf16.mxu0 %vm301_vm0, %v716_v8  ;;  %647 = vmatprep.subr.msk.bf16.mxu1 %vm301_vm0, %v716_v8 }
  0x34   : > { %607 = vmatpush3.bf16.xpose.msra.mxu0 %v324_v9  ;;  %635 = vmatpush3.bf16.xpose.msra.mxu1 %v324_v9 }
  0x35   : > { %648 = vmatprep.subr.msk.bf16.mxu0 %vm301_vm0, %v717_v10  ;;  %649 = vmatprep.subr.msk.bf16.mxu1 %vm301_vm0, %v717_v10 }
  0x3c   : > { %609 = vmatpush3.bf16.xpose.msra.mxu0 %v327_v11  ;;  %636 = vmatpush3.bf16.xpose.msra.mxu1 %v327_v11 }
  0x3d   : > { %650 = vmatprep.subr.msk.bf16.mxu0 %vm301_vm0, %v718_v12  ;;  %651 = vmatprep.subr.msk.bf16.mxu1 %vm301_vm0, %v718_v12 }
  0x44   : > { %611 = vmatpush3.bf16.xpose.msra.mxu0 %v330_v13  ;;  %637 = vmatpush3.bf16.xpose.msra.mxu1 %v330_v13 }
  0x45   : > { %652 = vmatprep.subr.msk.bf16.mxu0 %vm301_vm0, %v719_v14  ;;  %653 = vmatprep.subr.msk.bf16.mxu1 %vm301_vm0, %v719_v14 }
  0x4c   : > { %613 = vmatpush3.bf16.xpose.msra.mxu0 %v333_v15  ;;  %638 = vmatpush3.bf16.xpose.msra.mxu1 %v333_v15 }
  0x4d   : > { %654 = vmatprep.subr.msk.bf16.mxu0 %vm301_vm0, %v720_v16  ;;  %655 = vmatprep.subr.msk.bf16.mxu1 %vm301_vm0, %v720_v16 }
  0x54   : > { %615 = vmatpush3.bf16.xpose.msra.mxu0 %v336_v17  ;;  %639 = vmatpush3.bf16.xpose.msra.mxu1 %v336_v17 }
  0x5b   : > { %617 = vmatmul.mubr.msk.bf16.vlgmr.msra.gmra.mrb[0].mxu0 %vm301_vm0, %v723_v18  ;;  %621 = vmatmul.mubr.msk.bf16.vlgmr.msra.gmra.mrb[0].mxu1 %vm301_vm0, %v724_v19 }
 0x12e   : > { %v618_v20 = vpop.f32.mrb[0].mxu0  ;;  %v622_v21 = vpop.f32.mrb[0].mxu1 }
 0x12f   : > { %v432_v22 = vmul.f32 0.00390625, %v618_v20  ;;  %v436_v23 = vmul.f32 0.00390625, %v622_v21  ;;  %v372_v24 = vpop.f32.mrb[1].mxu0  ;;  %v388_v25 = vpop.f32.mrb[1].mxu1 }
 0x130   : > { %v430_v26 = vmul.f32 0.00390625, %v372_v24  ;;  %v434_v27 = vmul.f32 0.00390625, %v388_v25  ;;  %v619_v28 = vpop.f32.mrb[2].mxu0  ;;  %v623_v29 = vpop.f32.mrb[2].mxu1 }
 0x131   : > { %440 = vst [vmem:[%s179_s7 + $0x10] sm:$0xff] %v432_v22  ;;  %444 = vst [vmem:[%s179_s7 + $0x30] sm:$0xff] %v436_v23  ;;  %v433_v30 = vmul.f32 0.00390625, %v619_v28  ;;  %v437_v31 = vmul.f32 0.00390625, %v623_v29  ;;  %v375_v32 = vpop.f32.mrb[3].mxu0  ;;  %v391_v33 = vpop.f32.mrb[3].mxu1 }
 0x132   : > { %438 = vst [vmem:[%s179_s7] sm:$0xff] %v430_v26  ;;  %442 = vst [vmem:[%s179_s7 + $0x20] sm:$0xff] %v434_v27  ;;  %v431_v34 = vmul.f32 0.00390625, %v375_v32  ;;  %v435_v35 = vmul.f32 0.00390625, %v391_v33 }
 0x133   : > { %441 = vst [vmem:[%s179_s7 + $0x18] sm:$0xff] %v433_v30  ;;  %445 = vst [vmem:[%s179_s7 + $0x38] sm:$0xff] %v437_v31 }
 0x134   : > { %439 = vst [vmem:[%s179_s7 + $0x8] sm:$0xff] %v431_v34  ;;  %443 = vst [vmem:[%s179_s7 + $0x28] sm:$0xff] %v435_v35 }
 0x135   : > { %738 = shalt.err (!%p735_p5)
}
 0x136   : > { %s739_s26 = scalar_lea.hbm %s937_s16, 1024  ;;  %s743_s29 = scalar_lea.hbm %s991_s2, 2048 }
 0x137   : > { %p740_p6 = scmp.ne.s32.totalorder %s937_s16, %s739_s26  ;;  %p744_p10 = scmp.lt.u32.totalorder %s937_s16, %s991_s2 }
 0x138   : > { %p745_p11 = scmp.lt.u32.totalorder %s743_s29, %s739_s26  ;;  %p747_p13 = scmp.lt.u32.totalorder %s739_s26, %s937_s16 }
 0x139   : > { %p741_p7 = pnand %p740_p6, %p863_p4 }
 0x13a   : > { %p746_p12 = por %p745_p11, %p744_p10 }
 0x13b   : > { %p742_p9 = pneg %p741_p7 }
 0x13c   : > { %p748_p0 = por %p747_p13, %p746_p12 }
 0x13e   : > { %p749_p1 = pnand %p748_p0, %p742_p9 }
 0x140   : > { %752 = shalt.err (!%p749_p1)
}
 0x141   : > { %s806_s4 = smov 128   ;;  %s807_s5 = smov 8  }
 0x142   : > { %656 = dma.vmem_to_hbm [thread:$0]  (%p863_p4), %s939_s8, 1024, %s937_s16, %s943_s18, %s806_s4, %s806_s4, %s807_s5  }
 0x143 PF: > { %p662_p2 = scmp.ge.s32.totalorder %s803_s14, 2  ;;  %s475_s6 = sand.u32 1, %s783_s9  }
 0x144   : > { %s476_s7 = scalar_lea.sflag [#allocation4], %s475_s6 }
 0x145   : > { %p659_p3 = pnand %p662_p2, %p870_p8 }
 0x147   : > { %778 = dma.done.wait (!%p659_p3), %s476_s7, 1024  }
 0x148   : > { %780 = vsyncadd (!%p659_p3), %s476_s7, 4294966272  ;;  %s15_s14 = sadd.s32 1, %s803_s14   ;;  %s994_s9 = smov %s787_s10 }
 0x149   : > { %p12_p5 = scmp.ge.s32.totalorder %s15_s14, 4   ;;  %s995_s10 = smov %s791_s11 }
 0x14a   : > { %s996_s11 = smov %s876_s22  ;;  %s997_s12 = smov %s799_s13 }
 0x14b   : > { %s998_s13 = smov %s1000_s17  ;;  %14 = sbr.rel (!%p12_p5) target bundleno = 4 (0x4), region = 74 }
 0x152   :  { %481 = vsyncpa [#allocation4], 1 }
 0x153   :  { %483 = vsyncpa [#allocation4 + $0x1], 1 }

// kernel: vgg19_gram_pyramid_forward.8
= control target key start
LH: loop header
LB: loop body
LE: loop exit
PB: predicated region body
PF: predicated region fallthrough
CT: control target
= control target key end

     0   :  { %s2997_s15 = smov 0   ;;  %s2999_s16 = smov 0   ;;  %s3939_s0 = inlined_call_operand.vmem [shape: bf16[2,128,96], index: 0, kind: input, shape index: {}]   ;;  %s3940_s1 = inlined_call_operand.vmem [shape: bf16[128,1152], index: 1, kind: input, shape index: {}]   ;;  %s3941_s2 = inlined_call_operand.vmem [shape: f32[128,1], index: 2, kind: input, shape index: {}]   ;;  %s3942_s3 = inlined_call_operand.vmem [shape: bf16[2,64], index: 3, kind: input, shape index: {}]   ;;  %s3943_s4 = inlined_call_operand.vmem [shape: bf16[2,128,64], index: 4, kind: output, shape index: {}]  }
   0x1   :  { %s3001_s17 = smov 0  }
   0x2 LB: > { %s26_s18 = sadd.s32 1, %s2950_s16  ;;  %p2287_p0 = scmp.ge.s32.totalorder %s2954_s17, 1  ;;  %s2954_s17 = sphi %s3001_s17, %s14_s17   ;;  %s2950_s16 = sphi %s2999_s16, %s3945_s16   ;;  %s2946_s15 = sphi %s2997_s15, %s3944_s15  }
   0x3   : > { %p28_p1 = scmp.ge.s32.totalorder %s26_s18, 2  ;;  %p199_p2 = scmp.lt.s32.totalorder %s2954_s17, 3 }
   0x5   : > { %s3947_s18 = smov (%p28_p1, %s26_s18), 0  ;;  %p200_p3 = pnand %p2287_p0, %p199_p2 }
   0x6   : > { %v285_v0 = vld [vmem:[%s3942_s3] sm:$0x1] (!%p200_p3)  ;;  %v289_v1 = vlaneseq (!%p200_p3)  ;;  %p240_p4 = scmp.lt.s32.totalorder (!%p200_p3), %s2946_s15, 1  ;;  %s2956_s25 = smov (!%p200_p3), 127   ;;  %vm2153_vm0 = vcmask (!%p200_p3), 519168  }
   0x7   : > { %203 = sbr.rel (%p200_p3) target bundleno = 889 (0x379), region = 36  ;;  %v315_v2 = vshrl.u32 (!%p200_p3), %v285_v0, 16  ;;  %v287_v3 = vpack.i.b16 (!%p200_p3), %v285_v0, %v285_v0  ;;  %s2957_s26 = smov (!%p200_p3), 15  }
   0x8   : > { %v290_v4 = vshrl.u32 (!%p200_p3), %v289_v1, 7  ;;  %s2958_s27 = smov (!%p200_p3), 7   ;;  %s2959_s28 = smov (!%p200_p3), 9  }
   0x9   : > { %v316_v5 = vpack.i.b16 (!%p200_p3), %v315_v2, %v315_v2  ;;  %s2960_s29 = smov (!%p200_p3), 23   ;;  %s2961_s30 = smov (!%p200_p3), 17  }
   0xa   : > { %v291_v6 = vsub.s32 (!%p200_p3), 0, %v290_v4  ;;  %s2962_s5 = smov (!%p200_p3), 119   ;;  %s2963_s6 = smov (!%p200_p3), 25  }
   0xb   : > { %s2964_s7 = smov (!%p200_p3), 111   ;;  %s2965_s8 = smov (!%p200_p3), 121  }
   0xc   : > { %v292_v7 = vrot.slane (!%p200_p3), %v287_v3, %v291_v6  ;;  %v321_v10 = vrot.slane (!%p200_p3), %v316_v5, %v291_v6  ;;  %s2966_s9 = smov (!%p200_p3), 126   ;;  %s2967_s10 = smov (!%p200_p3), 120  }
   0xd   : > { %s2968_s11 = smov (!%p200_p3), 118   ;;  %s2969_s12 = smov (!%p200_p3), 112  }
   0xe   : > { %s3949_s15 = smov (!%p240_p4, %s2946_s15), 1  ;;  %v2292_v12 = vcombine.low %v292_v7, %v292_v7  ;;  %v2293_v13 = vcombine.low %v321_v10, %v321_v10  ;;  %s2970_s13 = smov 110  }
   0xf   : > { %s2440_s21 = sshll.u32 %s3949_s15, 6 }
  0x10   : > { %s3026_s24 = scalar_lea.vmem %s3939_s0, %s2440_s21  ;;  %344 = vrot.lane.b32.xlu0 %v2292_v12, %s2957_s26 }
  0x11   : > { %v3029_v8 = vld [vmem:[%s3026_s24] sm:$0xf]  ;;  %v3032_v9 = vld [vmem:[%s3026_s24 + $0x4] sm:$0xf]  ;;  %v3038_v14 = vld [vmem:[%s3026_s24 + $0x10] sm:$0xf] }
  0x12   : > { %v2302_v11 = vcombine.low %v3029_v8, %v3032_v9  ;;  %v3041_v15 = vld [vmem:[%s3026_s24 + $0x14] sm:$0xf]  ;;  %v3044_v16 = vld [vmem:[%s3026_s24 + $0x8] sm:$0xf]  ;;  %v3047_v17 = vld [vmem:[%s3026_s24 + $0xc] sm:$0xf] }
  0x13   : > { %v3050_v18 = vld [vmem:[%s3026_s24 + $0x20] sm:$0xf]  ;;  %v3053_v19 = vld [vmem:[%s3026_s24 + $0x24] sm:$0xf]  ;;  %v2304_v20 = vcombine.low %v3038_v14, %v3041_v15  ;;  %v3058_v21 = vld [vmem:[%s3026_s24 + $0x18] sm:$0xf]  ;;  %v2303_v23 = vcombine.low %v3044_v16, %v3047_v17 }
  0x14   : > { %500 = vrot.lane.b32.xlu1 %v2302_v11, %s2956_s25  ;;  %325 = vrot.lane.b32.xlu0 %v2293_v13, %s2959_s28  ;;  %v3061_v22 = vld [vmem:[%s3026_s24 + $0x1c] sm:$0xf]  ;;  %v3066_v24 = vld [vmem:[%s3026_s24 + $0x30] sm:$0xf]  ;;  %v2306_v26 = vcombine.low %v3050_v18, %v3053_v19 }
  0x15   : > { %v3069_v25 = vld [vmem:[%s3026_s24 + $0x34] sm:$0xf]  ;;  %v3075_v27 = vld [vmem:[%s3026_s24 + $0x28] sm:$0xf]  ;;  %v3078_v28 = vld [vmem:[%s3026_s24 + $0x2c] sm:$0xf]  ;;  %v2305_v29 = vcombine.low %v3058_v21, %v3061_v22 }
  0x16   : > { %v3086_v30 = vcombine.low %v3066_v24, %v3069_v25  ;;  %v3089_v31 = vld [vmem:[%s3026_s24 + $0x38] sm:$0xf]  ;;  %v3092_v32 = vld [vmem:[%s3026_s24 + $0x3c] sm:$0xf]  ;;  %v3097_v33 = vcombine.low %v3075_v27, %v3078_v28 }
  0x17   : > { %v3105_v34 = vcombine.low %v3089_v31, %v3092_v32 }
  0x18   : > { %296 = vrot.lane.b32.xlu1 %v2292_v12, %s2958_s27  ;;  %363 = vrot.lane.b32.xlu0 %v2293_v13, %s2961_s30 }
  0x1c   : > { %382 = vrot.lane.b32.xlu1 %v2292_v12, %s2960_s29  ;;  %502 = vrot.lane.b32.xlu0 %v2303_v23, %s2956_s25 }
  0x20   : > { %504 = vrot.lane.b32.xlu1 %v2304_v20, %s2956_s25  ;;  %506 = vrot.lane.b32.xlu0 %v2305_v29, %s2956_s25 }
  0x24   : > { %508 = vrot.lane.b32.xlu1 %v2306_v26, %s2956_s25  ;;  %510 = vrot.lane.b32.xlu0 %v3097_v33, %s2956_s25 }
  0x28   : > { %512 = vrot.lane.b32.xlu1 %v3086_v30, %s2956_s25  ;;  %514 = vrot.lane.b32.xlu0 %v3105_v34, %s2956_s25 }
  0x2c   : > { %628 = vrot.lane.b32.xlu1 %v2302_v11, %s2962_s5  ;;  %756 = vrot.lane.b32.xlu0 %v2302_v11, %s2964_s7 }
  0x30   : > { %401 = vrot.lane.b32.xlu1 %v2293_v13, %s2963_s6  ;;  %630 = vrot.lane.b32.xlu0 %v2303_v23, %s2962_s5 }
  0x34   : > { %758 = vrot.lane.b32.xlu1 %v2303_v23, %s2964_s7  ;;  %632 = vrot.lane.b32.xlu0 %v2304_v20, %s2962_s5 }
  0x38   : > { %760 = vrot.lane.b32.xlu1 %v2304_v20, %s2964_s7  ;;  %634 = vrot.lane.b32.xlu0 %v2305_v29, %s2962_s5 }
  0x3c   : > { %762 = vrot.lane.b32.xlu1 %v2305_v29, %s2964_s7  ;;  %636 = vrot.lane.b32.xlu0 %v2306_v26, %s2962_s5 }
  0x40   : > { %764 = vrot.lane.b32.xlu1 %v2306_v26, %s2964_s7 }
  0x82   : > { %v3119_v36 = vpop.permute.xlu0 %344 }
  0x83   : > { %v349_v46 = vmul.bf16 %v3119_v36, %v3044_v16  ;;  %v350_v47 = vmul.bf16 %v3119_v36, %v3047_v17  ;;  %v347_v54 = vmul.bf16 %v3119_v36, %v3029_v8  ;;  %v348_v55 = vmul.bf16 %v3119_v36, %v3032_v9 }
  0x84   : > { %v353_v56 = vmul.bf16 %v3119_v36, %v3058_v21  ;;  %v354_v57 = vmul.bf16 %v3119_v36, %v3061_v22  ;;  %v351_v1 = vmul.bf16 %v3119_v36, %v3038_v14  ;;  %v352_v2 = vmul.bf16 %v3119_v36, %v3041_v15 }
  0x85   : > { %v2319_v50 = vcombine.low %v349_v46, %v350_v47  ;;  %v2318_v59 = vcombine.low %v347_v54, %v348_v55  ;;  %v357_v3 = vmul.bf16 %v3119_v36, %v3075_v27  ;;  %v358_v4 = vmul.bf16 %v3119_v36, %v3078_v28 }
  0x86   : > { %v501_v35 = vpop.permute.xlu1 %500  ;;  %v3124_v38 = vpop.permute.xlu0 %325  ;;  %v2321_v60 = vcombine.low %v353_v56, %v354_v57  ;;  %v2320_v7 = vcombine.low %v351_v1, %v352_v2  ;;  %v355_v23 = vmul.bf16 %v3119_v36, %v3050_v18  ;;  %v356_v26 = vmul.bf16 %v3119_v36, %v3053_v19 }
  0x87   : > { %1388 = vrot.lane.b32.xlu1 %v501_v35, %s2965_s8  ;;  %v328_v42 = vmul.bf16 %v3124_v38, %v3029_v8  ;;  %v329_v43 = vmul.bf16 %v3124_v38, %v3032_v9  ;;  %v332_v51 = vmul.bf16 %v3124_v38, %v3038_v14  ;;  %v333_v52 = vmul.bf16 %v3124_v38, %v3041_v15 }
  0x88   : > { %v330_v61 = vmul.bf16 %v3124_v38, %v3044_v16  ;;  %v331_v62 = vmul.bf16 %v3124_v38, %v3047_v17  ;;  %v336_v63 = vmul.bf16 %v3124_v38, %v3050_v18  ;;  %v337_v0 = vmul.bf16 %v3124_v38, %v3053_v19 }
  0x89   : > { %v2310_v45 = vcombine.low %v328_v42, %v329_v43  ;;  %v2312_v58 = vcombine.low %v332_v51, %v333_v52  ;;  %v2323_v10 = vcombine.low %v357_v3, %v358_v4  ;;  %v334_v11 = vmul.bf16 %v3124_v38, %v3058_v21 }
  0x8a   : > { %v3122_v37 = vpop.permute.xlu1 %296  ;;  %v3128_v40 = vpop.permute.xlu0 %363  ;;  %v2311_v5 = vcombine.low %v330_v61, %v331_v62  ;;  %v2314_v6 = vcombine.low %v336_v63, %v337_v0  ;;  %v335_v12 = vmul.bf16 %v3124_v38, %v3061_v22  ;;  %v340_v13 = vmul.bf16 %v3124_v38, %v3066_v24 }
  0x8b   : > { %v341_v20 = vmul.bf16 %v3124_v38, %v3069_v25  ;;  %v362_v42 = vmul.bf16 %v3119_v36, %v3092_v32  ;;  %v338_v43 = vmul.bf16 %v3124_v38, %v3075_v27  ;;  %v299_v47 = vmul.bf16 %v3122_v37, %v3029_v8 }
  0x8c   : > { %v2313_v29 = vcombine.low %v334_v11, %v335_v12  ;;  %v360_v52 = vmul.bf16 %v3119_v36, %v3069_v25  ;;  %v302_v54 = vmul.bf16 %v3122_v37, %v3047_v17  ;;  %v342_v55 = vmul.bf16 %v3124_v38, %v3089_v31 }
  0x8d   : > { %v2316_v35 = vcombine.low %v340_v13, %v341_v20  ;;  %v343_v56 = vmul.bf16 %v3124_v38, %v3092_v32  ;;  %v303_v1 = vmul.bf16 %v3122_v37, %v3038_v14  ;;  %v304_v2 = vmul.bf16 %v3122_v37, %v3041_v15 }
  0x8e   : > { %v3126_v39 = vpop.permute.xlu1 %382  ;;  %v503_v44 = vpop.permute.xlu0 %502  ;;  %v369_v12 = vmul.bf16 %v3128_v40, %v3047_v17 }
  0x8f   : > { %1390 = vrot.lane.b32.xlu1 %v503_v44, %s2965_s8  ;;  %v339_v44 = vmul.bf16 %v3124_v38, %v3078_v28  ;;  %v385_v61 = vmul.bf16 %v3126_v39, %v3029_v8  ;;  %v386_v38 = vmul.bf16 %v3126_v39, %v3032_v9  ;;  %v387_v63 = vmul.bf16 %v3126_v39, %v3044_v16 }
  0x90   : > { %v388_v0 = vmul.bf16 %v3126_v39, %v3047_v17  ;;  %v391_v13 = vmul.bf16 %v3126_v39, %v3058_v21  ;;  %v392_v20 = vmul.bf16 %v3126_v39, %v3061_v22 }
  0x91   : > { %v2334_v3 = vcombine.low %v385_v61, %v386_v38  ;;  %v398_v61 = vmul.bf16 %v3126_v39, %v3069_v25 }
  0x92   : > { %v505_v41 = vpop.permute.xlu1 %504  ;;  %v507_v48 = vpop.permute.xlu0 %506  ;;  %v2335_v4 = vcombine.low %v387_v63, %v388_v0  ;;  %v374_v0 = vmul.bf16 %v3128_v40, %v3050_v18 }
  0x93   : > { %1392 = vrot.lane.b32.xlu0 %v505_v41, %s2965_s8  ;;  %556 = vrot.lane.b32.xlu1 %v2310_v45, %s2966_s9  ;;  %v361_v41 = vmul.bf16 %v3119_v36, %v3089_v31  ;;  %v2322_v45 = vcombine.low %v355_v23, %v356_v26  ;;  %v305_v23 = vmul.bf16 %v3122_v37, %v3058_v21 }
  0x94   : > { %v306_v26 = vmul.bf16 %v3122_v37, %v3061_v22 }
  0x95   : > { %v2325_v46 = vcombine.low %v361_v41, %v362_v42  ;;  %v393_v41 = vmul.bf16 %v3126_v39, %v3050_v18  ;;  %v394_v42 = vmul.bf16 %v3126_v39, %v3053_v19 }
  0x96   : > { %v509_v49 = vpop.permute.xlu1 %508  ;;  %v511_v53 = vpop.permute.xlu0 %510 }
  0x97   : > { %1394 = vrot.lane.b32.xlu0 %v507_v48, %s2965_s8  ;;  %614 = vrot.lane.b32.xlu1 %v2319_v50, %s2967_s10  ;;  %v300_v48 = vmul.bf16 %v3122_v37, %v3032_v9  ;;  %v359_v50 = vmul.bf16 %v3119_v36, %v3066_v24  ;;  %v366_v36 = vmul.bf16 %v3128_v40, %v3029_v8 }
  0x99   : > { %v2294_v51 = vcombine.low %v299_v47, %v300_v48  ;;  %v2324_v57 = vcombine.low %v359_v50, %v360_v52  ;;  %v307_v48 = vmul.bf16 %v3122_v37, %v3050_v18  ;;  %v308_v50 = vmul.bf16 %v3122_v37, %v3053_v19 }
  0x9a   : > { %v513_v47 = vpop.permute.xlu1 %512  ;;  %v396_v52 = vmul.bf16 %v3126_v39, %v3078_v28 }
  0x9b   : > { %1396 = vrot.lane.b32.xlu0 %v509_v49, %s2965_s8  ;;  %560 = vrot.lane.b32.xlu1 %v2312_v58, %s2966_s9  ;;  %v2315_v49 = vcombine.low %v338_v43, %v339_v44  ;;  %v2297_v43 = vcombine.low %v305_v23, %v306_v26  ;;  %v2338_v44 = vcombine.low %v393_v41, %v394_v42 }
  0x9c   : > { %v377_v23 = vmul.bf16 %v3128_v40, %v3078_v28 }
  0x9f   : > { %1398 = vrot.lane.b32.xlu0 %v511_v53, %s2965_s8  ;;  %618 = vrot.lane.b32.xlu1 %v2321_v60, %s2967_s10  ;;  %v301_v53 = vmul.bf16 %v3122_v37, %v3044_v16  ;;  %v2317_v60 = vcombine.low %v342_v55, %v343_v56  ;;  %v372_v56 = vmul.bf16 %v3128_v40, %v3058_v21 }
  0xa1   : > { %v2295_v58 = vcombine.low %v301_v53, %v302_v54  ;;  %v3285_v53 = vpop.permute.xlu1 %628  ;;  %v2298_v54 = vcombine.low %v307_v48, %v308_v50  ;;  %v378_v48 = vmul.bf16 %v3128_v40, %v3066_v24 }
  0xa3   : > { %612 = vrot.lane.b32.xlu0 %v2318_v59, %s2967_s10  ;;  %564 = vrot.lane.b32.xlu1 %v2314_v6, %s2966_s9  ;;  %v367_v59 = vmul.bf16 %v3128_v40, %v3032_v9  ;;  %v390_v6 = vmul.bf16 %v3126_v39, %v3041_v15 }
  0xa5   : > { %v2326_v62 = vcombine.low %v366_v36, %v367_v59  ;;  %v310_v59 = vmul.bf16 %v3122_v37, %v3078_v28 }
  0xa7   : > { %558 = vrot.lane.b32.xlu0 %v2311_v5, %s2966_s9  ;;  %622 = vrot.lane.b32.xlu1 %v2323_v10, %s2967_s10  ;;  %v389_v5 = vmul.bf16 %v3126_v39, %v3038_v14  ;;  %v368_v10 = vmul.bf16 %v3128_v40, %v3044_v16 }
  0xa9   : > { %v2336_v11 = vcombine.low %v389_v5, %v390_v6  ;;  %v399_v5 = vmul.bf16 %v3126_v39, %v3089_v31  ;;  %v400_v6 = vmul.bf16 %v3126_v39, %v3092_v32 }
  0xab   : > { %616 = vrot.lane.b32.xlu0 %v2320_v7, %s2967_s10  ;;  %568 = vrot.lane.b32.xlu1 %v2316_v35, %s2966_s9  ;;  %v2296_v7 = vcombine.low %v303_v1, %v304_v2  ;;  %v2337_v35 = vcombine.low %v391_v13, %v392_v20  ;;  %v375_v1 = vmul.bf16 %v3128_v40, %v3053_v19  ;;  %v515_v2 = vpop.permute.xlu0 %514 }
  0xac   : > { %v376_v20 = vmul.bf16 %v3128_v40, %v3075_v27 }
  0xaf   : > { %562 = vrot.lane.b32.xlu0 %v2313_v29, %s2966_s9  ;;  %626 = vrot.lane.b32.xlu1 %v2325_v46, %s2967_s10  ;;  %v2327_v29 = vcombine.low %v368_v10, %v369_v12  ;;  %v371_v46 = vmul.bf16 %v3128_v40, %v3041_v15  ;;  %v2341_v10 = vcombine.low %v399_v5, %v400_v6 }
  0xb0   : > { %v312_v12 = vmul.bf16 %v3122_v37, %v3069_v25 }
  0xb3   : > { %620 = vrot.lane.b32.xlu0 %v2322_v45, %s2967_s10  ;;  %1372 = vrot.lane.b32.xlu1 %v2294_v51, %s2965_s8  ;;  %v370_v45 = vmul.bf16 %v3128_v40, %v3038_v14  ;;  %v395_v51 = vmul.bf16 %v3126_v39, %v3075_v27 }
  0xb5   : > { %v2339_v55 = vcombine.low %v395_v51, %v396_v52 }
  0xb7   : > { %566 = vrot.lane.b32.xlu0 %v2315_v49, %s2966_s9  ;;  %1374 = vrot.lane.b32.xlu1 %v2295_v58, %s2965_s8  ;;  %v2328_v49 = vcombine.low %v370_v45, %v371_v46  ;;  %v309_v58 = vmul.bf16 %v3122_v37, %v3075_v27 }
  0xb9   : > { %v2299_v38 = vcombine.low %v309_v58, %v310_v59 }
  0xbb   : > { %624 = vrot.lane.b32.xlu0 %v2324_v57, %s2967_s10  ;;  %684 = vrot.lane.b32.xlu1 %v2326_v62, %s2968_s11  ;;  %v373_v57 = vmul.bf16 %v3128_v40, %v3061_v22  ;;  %v3301_v62 = vpop.permute.xlu1 %401 }
  0xbd   : > { %v2329_v36 = vcombine.low %v372_v56, %v373_v57 }
  0xbf   : > { %570 = vrot.lane.b32.xlu0 %v2317_v60, %s2966_s9  ;;  %742 = vrot.lane.b32.xlu1 %v2335_v4, %s2969_s12  ;;  %v397_v60 = vmul.bf16 %v3126_v39, %v3066_v24  ;;  %v2330_v4 = vcombine.low %v374_v0, %v375_v1 }
  0xc1   : > { %v2340_v63 = vcombine.low %v397_v60, %v398_v61 }
  0xc3   : > { %740 = vrot.lane.b32.xlu0 %v2334_v3, %s2969_s12  ;;  %744 = vrot.lane.b32.xlu1 %v2336_v11, %s2969_s12  ;;  %v759_v3 = vpop.permute.xlu1 %758  ;;  %v311_v11 = vmul.bf16 %v3122_v37, %v3066_v24 }
  0xc5   : > { %v2300_v39 = vcombine.low %v311_v11, %v312_v12 }
  0xc7   : > { %1376 = vrot.lane.b32.xlu0 %v2296_v7, %s2965_s8  ;;  %746 = vrot.lane.b32.xlu1 %v2337_v35, %s2969_s12  ;;  %v757_v7 = vpop.permute.xlu0 %756  ;;  %v3323_v13 = vpop.permute.xlu1 %760  ;;  %v2331_v35 = vcombine.low %v376_v20, %v377_v23 }
  0xcb   : > { %686 = vrot.lane.b32.xlu0 %v2327_v29, %s2968_s11  ;;  %748 = vrot.lane.b32.xlu1 %v2338_v44, %s2969_s12  ;;  %v3331_v26 = vpop.permute.xlu0 %630  ;;  %v3335_v29 = vpop.permute.xlu1 %762  ;;  %v314_v44 = vmul.bf16 %v3122_v37, %v3092_v32 }
  0xcf   : > { %1378 = vrot.lane.b32.xlu0 %v2297_v43, %s2965_s8  ;;  %766 = vrot.lane.b32.xlu1 %v3097_v33, %s2964_s7  ;;  %v633_v41 = vpop.permute.xlu0 %632  ;;  %v3339_v42 = vpop.permute.xlu1 %764  ;;  %v313_v43 = vmul.bf16 %v3122_v37, %v3089_v31 }
  0xd3   : > { %688 = vrot.lane.b32.xlu0 %v2328_v49, %s2968_s11  ;;  %750 = vrot.lane.b32.xlu1 %v2339_v55, %s2969_s12  ;;  %v3349_v46 = vpop.permute.xlu0 %634 }
  0xd7   : > { %1380 = vrot.lane.b32.xlu0 %v2298_v54, %s2965_s8  ;;  %768 = vrot.lane.b32.xlu1 %v3086_v30, %s2964_s7  ;;  %v3356_v50 = vpop.permute.xlu0 %636 }
  0xdb   : > { %690 = vrot.lane.b32.xlu0 %v2329_v36, %s2968_s11  ;;  %752 = vrot.lane.b32.xlu1 %v2340_v63, %s2969_s12 }
  0xdf   : > { %1382 = vrot.lane.b32.xlu0 %v2299_v38, %s2965_s8  ;;  %770 = vrot.lane.b32.xlu1 %v3105_v34, %s2964_s7  ;;  %s3888_s7 = scalar_lea.vmem %s3943_s4, %s2440_s21 }
  0xe3   : > { %692 = vrot.lane.b32.xlu0 %v2330_v4, %s2968_s11  ;;  %754 = vrot.lane.b32.xlu1 %v2341_v10, %s2969_s12 }
  0xe7   : > { %1400 = vrot.lane.b32.xlu0 %v513_v47, %s2965_s8  ;;  %1484 = vrot.lane.b32.xlu1 %v757_v7, %s2965_s8  ;;  %v2301_v47 = vcombine.low %v313_v43, %v314_v44 }
  0xeb   : > { %1384 = vrot.lane.b32.xlu0 %v2300_v39, %s2965_s8  ;;  %1486 = vrot.lane.b32.xlu1 %v759_v3, %s2965_s8  ;;  %v381_v3 = vmul.bf16 %v3128_v40, %v3092_v32  ;;  %v405_v39 = vmul.bf16 %v3301_v62, %v3032_v9  ;;  %v408_v9 = vmul.bf16 %v3301_v62, %v3038_v14 }
  0xec   : > { %v406_v14 = vmul.bf16 %v3301_v62, %v3044_v16  ;;  %v2830_v16 = vld [vmem:[%s3940_s1 + $0xc] ss:$36 sps:$4 sm:$0xff]  }
  0xed   : > { %1717 = vmatprep.mubr.bf16.mxu1 %v2830_v16 }
  0xef   : > { %694 = vrot.lane.b32.xlu0 %v2331_v35, %s2968_s11  ;;  %1440 = vrot.lane.b32.xlu1 %v633_v41, %s2965_s8 }
  0xf3   : > { %638 = vrot.lane.b32.xlu0 %v3097_v33, %s2962_s5  ;;  %v379_v33 = vmul.bf16 %v3128_v40, %v3069_v25 }
  0xf5   : > { %v2332_v49 = vcombine.low %v378_v48, %v379_v33  ;;  %v411_v33 = vmul.bf16 %v3301_v62, %v3061_v22 }
  0xf7   : > { %1402 = vrot.lane.b32.xlu0 %v515_v2, %s2965_s8  ;;  %v380_v2 = vmul.bf16 %v3128_v40, %v3089_v31  ;;  %v404_v40 = vmul.bf16 %v3301_v62, %v3029_v8 }
  0xf9   : > { %v1389_v45 = vpop.permute.xlu1 %1388  ;;  %v2333_v6 = vcombine.low %v380_v2, %v381_v3  ;;  %v2842_v3 = vld [vmem:[%s3940_s1 + $0x90] ss:$36 sps:$4 sm:$0xff]  }
  0xfa   : > { %2458 = vmatprep.subr.bf16.mxu0 %v1389_v45 }
  0xfb   : > { %1386 = vrot.lane.b32.xlu0 %v2301_v47, %s2965_s8 }
  0xff   : > { %696 = vrot.lane.b32.xlu0 %v2332_v49, %s2968_s11 }
 0x101   : > { %v1391_v51 = vpop.permute.xlu1 %1390 }
 0x105   : > { %v1393_v37 = vpop.permute.xlu0 %1392  ;;  %v557_v54 = vpop.permute.xlu1 %556 }
 0x109   : > { %v1395_v52 = vpop.permute.xlu0 %1394  ;;  %v615_v56 = vpop.permute.xlu1 %614 }
 0x10d   : > { %v1397_v55 = vpop.permute.xlu0 %1396  ;;  %v561_v58 = vpop.permute.xlu1 %560 }
 0x111   : > { %v3359_v57 = vpop.permute.xlu0 %1398  ;;  %v619_v59 = vpop.permute.xlu1 %618 }
 0x115   : > { %v613_v36 = vpop.permute.xlu0 %612  ;;  %v565_v61 = vpop.permute.xlu1 %564 }
 0x116   : > { %1420 = vrot.lane.b32.xlu0 %v613_v36, %s2965_s8 }
 0x119   : > { %v559_v60 = vpop.permute.xlu0 %558  ;;  %v623_v63 = vpop.permute.xlu1 %622 }
 0x11a   : > { %1404 = vrot.lane.b32.xlu0 %v557_v54, %s2965_s8  ;;  %v2833_v54 = vld [vmem:[%s3940_s1 + $0x4] ss:$36 sps:$4 sm:$0xff]  }
 0x11b   : > { %1620 = vmatprep.mubr.bf16.mxu0 %v2833_v54 }
 0x11d   : > { %v617_v38 = vpop.permute.xlu0 %616  ;;  %v569_v1 = vpop.permute.xlu1 %568 }
 0x11e   : > { %1424 = vrot.lane.b32.xlu1 %v617_v38, %s2965_s8  ;;  %1422 = vrot.lane.b32.xlu0 %v615_v56, %s2965_s8  ;;  %v413_v56 = vmul.bf16 %v3301_v62, %v3053_v19  ;;  %v2834_v19 = vld [vmem:[%s3940_s1 + $0x4c] ss:$36 sps:$4 sm:$0xff]  }
 0x11f   : > { %v2836_v38 = vld [vmem:[%s3940_s1 + $0x48] ss:$36 sps:$4 sm:$0xff]  }
 0x121   : > { %v563_v0 = vpop.permute.xlu0 %562  ;;  %v627_v5 = vpop.permute.xlu1 %626 }
 0x122   : > { %1406 = vrot.lane.b32.xlu0 %v559_v60, %s2965_s8  ;;  %1408 = vrot.lane.b32.xlu1 %v561_v58, %s2965_s8 }
 0x125   : > { %v621_v4 = vpop.permute.xlu0 %620  ;;  %v1373_v10 = vpop.permute.xlu1 %1372 }
 0x126   : > { %640 = vrot.lane.b32.xlu0 %v3086_v30, %s2962_s5  ;;  %1426 = vrot.lane.b32.xlu1 %v619_v59, %s2965_s8 }
 0x127   : > { %2459 = vmatpush3.bf16.msra.mxu0 %v1373_v10  ;;  %v2852_v10 = vld [vmem:[%s3940_s1 + $0x124] ss:$36 sps:$4 sm:$0xff]  }
 0x128   : > { %2460 = vmatprep.subr.bf16.mxu0 %v1391_v51 }
 0x129   : > { %v567_v7 = vpop.permute.xlu0 %566  ;;  %v1375_v12 = vpop.permute.xlu1 %1374 }
 0x12a   : > { %698 = vrot.lane.b32.xlu0 %v2333_v6, %s2968_s11  ;;  %1410 = vrot.lane.b32.xlu1 %v563_v0, %s2965_s8  ;;  %v2840_v0 = vld [vmem:[%s3940_s1 + $0x94] ss:$36 sps:$4 sm:$0xff]  }
 0x12b   : > { %2461 = vmatpush3.bf16.msra.mxu0 %v1375_v12  ;;  %v2848_v6 = vld [vmem:[%s3940_s1 + $0xd8] ss:$36 sps:$4 sm:$0xff]  }
 0x12c   : > { %2462 = vmatprep.subr.bf16.mxu0 %v1393_v37 }
 0x12d   : > { %v625_v11 = vpop.permute.xlu0 %624  ;;  %v685_v8 = vpop.permute.xlu1 %684 }
 0x12e   : > { %642 = vrot.lane.b32.xlu0 %v3105_v34, %s2962_s5  ;;  %1428 = vrot.lane.b32.xlu1 %v621_v4, %s2965_s8  ;;  %v2342_v34 = vcombine.low %v404_v40, %v405_v39  ;;  %v2846_v4 = vld [vmem:[%s3940_s1 + $0xdc] ss:$36 sps:$4 sm:$0xff]   ;;  %v2858_v39 = vld [vmem:[%s3940_s1 + $0x16c] ss:$36 sps:$4 sm:$0xff]  }
 0x12f   : > { %v2854_v40 = vld [vmem:[%s3940_s1 + $0x120] ss:$36 sps:$4 sm:$0xff]  }
 0x131   : > { %v571_v30 = vpop.permute.xlu0 %570  ;;  %v743_v43 = vpop.permute.xlu1 %742 }
 0x132   : > { %1436 = vrot.lane.b32.xlu0 %v3285_v53, %s2965_s8  ;;  %1412 = vrot.lane.b32.xlu1 %v565_v61, %s2965_s8 }
 0x135   : > { %v741_v20 = vpop.permute.xlu0 %740  ;;  %v745_v45 = vpop.permute.xlu1 %744 }
 0x136   : > { %1438 = vrot.lane.b32.xlu0 %v3331_v26, %s2965_s8  ;;  %1430 = vrot.lane.b32.xlu1 %v623_v63, %s2965_s8  ;;  %v409_v26 = vmul.bf16 %v3301_v62, %v3041_v15  ;;  %v407_v15 = vmul.bf16 %v3301_v62, %v3047_v17 }
 0x138   : > { %v2344_v41 = vcombine.low %v408_v9, %v409_v26  ;;  %v414_v9 = vmul.bf16 %v3301_v62, %v3075_v27  ;;  %v415_v26 = vmul.bf16 %v3301_v62, %v3078_v28  ;;  %v2866_v27 = vld [vmem:[%s3940_s1 + $0x1b0] ss:$36 sps:$4 sm:$0xff]   ;;  %v416_v28 = vmul.bf16 %v3301_v62, %v3066_v24 }
 0x139   : > { %v1377_v23 = vpop.permute.xlu0 %1376  ;;  %v747_v48 = vpop.permute.xlu1 %746  ;;  %v418_v24 = vmul.bf16 %v3301_v62, %v3089_v31  ;;  %v2878_v31 = vld [vmem:[%s3940_s1 + $0x14] ss:$36 sps:$4 sm:$0xff]  }
 0x13a   : > { %812 = vrot.lane.b32.xlu0 %v2342_v34, %s2970_s13  ;;  %1414 = vrot.lane.b32.xlu1 %v567_v7, %s2965_s8 }
 0x13b   : > { %2463 = vmatpush3.bf16.msra.mxu0 %v1377_v23 }
 0x13c   : > { %2464 = vmatprep.subr.bf16.mxu0 %v1395_v52 }
 0x13d   : > { %v3391_v53 = vpop.permute.xlu0 %686  ;;  %v749_v37 = vpop.permute.xlu1 %748 }
 0x13e   : > { %1488 = vrot.lane.b32.xlu0 %v3323_v13, %s2965_s8  ;;  %1432 = vrot.lane.b32.xlu1 %v625_v11, %s2965_s8 }
 0x141   : > { %v1379_v35 = vpop.permute.xlu0 %1378 }
 0x142   : > { %1442 = vrot.lane.b32.xlu0 %v3349_v46, %s2965_s8  ;;  %1416 = vrot.lane.b32.xlu1 %v569_v1, %s2965_s8  ;;  %v2343_v46 = vcombine.low %v406_v14, %v407_v15 }
 0x143   : > { %2465 = vmatpush3.bf16.msra.mxu0 %v1379_v35  ;;  %v2864_v35 = vld [vmem:[%s3940_s1 + $0x1b4] ss:$36 sps:$4 sm:$0xff]  }
 0x144   : > { %2466 = vmatprep.subr.bf16.mxu0 %v1397_v55  ;;  %v412_v55 = vmul.bf16 %v3301_v62, %v3050_v18  ;;  %v2831_v18 = vld [vmem:[%s3940_s1] ss:$36 sps:$4 sm:$0xff]  }
 0x145   : > { %v689_v13 = vpop.permute.xlu0 %688 }
 0x146   : > { %816 = vrot.lane.b32.xlu0 %v2344_v41, %s2970_s13  ;;  %1434 = vrot.lane.b32.xlu1 %v627_v5, %s2965_s8  ;;  %v2346_v58 = vcombine.low %v412_v55, %v413_v56  ;;  %v2828_v55 = vld [vmem:[%s3940_s1 + $0x8] ss:$36 sps:$4 sm:$0xff]   ;;  %v2837_v56 = vld [vmem:[%s3940_s1 + $0x54] ss:$36 sps:$4 sm:$0xff]  }
 0x149   : > { %v1381_v44 = vpop.permute.xlu0 %1380 }
 0x14a   : > { %1492 = vrot.lane.b32.xlu0 %v3339_v42, %s2965_s8  ;;  %1418 = vrot.lane.b32.xlu1 %v571_v30, %s2965_s8  ;;  %v410_v42 = vmul.bf16 %v3301_v62, %v3058_v21 }
 0x14b   : > { %2467 = vmatpush3.bf16.msra.mxu0 %v1381_v44  ;;  %v417_v44 = vmul.bf16 %v3301_v62, %v3069_v25  ;;  %v419_v25 = vmul.bf16 %v3301_v62, %v3092_v32 }
 0x14c   : > { %2468 = vmatprep.subr.bf16.mxu0 %v3359_v57  ;;  %v2345_v51 = vcombine.low %v410_v42, %v411_v33  ;;  %v2872_v42 = vld [vmem:[%s3940_s1 + $0x1f8] ss:$36 sps:$4 sm:$0xff]  }
 0x14d   : > { %v691_v47 = vpop.permute.xlu0 %690  ;;  %v2348_v16 = vcombine.low %v416_v28, %v417_v44  ;;  %v2349_v33 = vcombine.low %v418_v24, %v419_v25  ;;  %v2882_v24 = vld [vmem:[%s3940_s1 + $0x5c] ss:$36 sps:$4 sm:$0xff]  }
 0x14e   : > { %814 = vrot.lane.b32.xlu1 %v2343_v46, %s2970_s13 }
 0x151   : > { %v1383_v17 = vpop.permute.xlu0 %1382 }
 0x152   : > { %1490 = vrot.lane.b32.xlu1 %v3335_v29, %s2965_s8  ;;  %2469 = vmatpush3.bf16.msra.mxu0 %v1383_v17  ;;  %v767_v29 = vpop.permute.xlu1 %766 }
 0x155   : > { %v693_v49 = vpop.permute.xlu0 %692 }
 0x156   : > { %1444 = vrot.lane.b32.xlu1 %v3356_v50, %s2965_s8  ;;  %v751_v50 = vpop.permute.xlu1 %750 }
 0x159   : > { %v1401_v52 = vpop.permute.xlu0 %1400 }
 0x15a   : > { %818 = vrot.lane.b32.xlu1 %v2345_v51, %s2970_s13  ;;  %2470 = vmatprep.subr.bf16.mxu0 %v1401_v52  ;;  %v769_v59 = vpop.permute.xlu1 %768 }
 0x15d   : > { %v1385_v21 = vpop.permute.xlu0 %1384 }
 0x15e   : > { %2471 = vmatpush3.bf16.msra.mxu0 %v1385_v21  ;;  %1494 = vrot.lane.b32.xlu1 %v767_v29, %s2965_s8  ;;  %v753_v61 = vpop.permute.xlu1 %752 }
 0x161   : > { %v695_v22 = vpop.permute.xlu0 %694 }
 0x162   : > { %1468 = vrot.lane.b32.xlu1 %v741_v20, %s2965_s8  ;;  %v3453_v63 = vpop.permute.xlu1 %770 }
 0x165   : > { %v639_v57 = vpop.permute.xlu0 %638 }
 0x166   : > { %1446 = vrot.lane.b32.xlu0 %v639_v57, %s2965_s8  ;;  %1470 = vrot.lane.b32.xlu1 %v743_v43, %s2965_s8  ;;  %v3462_v2 = vpop.permute.xlu1 %754 }
 0x169   : > { %v1403_v36 = vpop.permute.xlu0 %1402 }
 0x16a   : > { %820 = vrot.lane.b32.xlu0 %v2346_v58, %s2970_s13  ;;  %2472 = vmatprep.subr.bf16.mxu0 %v1403_v36  ;;  %v3471_v5 = vpop.permute.xlu1 %1484  ;;  %v2839_v36 = vld [vmem:[%s3940_s1 + $0x50] ss:$36 sps:$4 sm:$0xff]  }
 0x16b   : > { %1456 = vrot.lane.b32.xlu1 %v689_v13, %s2965_s8  ;;  %v2347_v13 = vcombine.low %v414_v9, %v415_v26  ;;  %v2869_v9 = vld [vmem:[%s3940_s1 + $0x1b8] ss:$36 sps:$4 sm:$0xff]   ;;  %v2873_v26 = vld [vmem:[%s3940_s1 + $0x204] ss:$36 sps:$4 sm:$0xff]  }
 0x16d   : > { %v1387_v60 = vpop.permute.xlu0 %1386 }
 0x16e   : > { %2473 = vmatpush3.bf16.msra.mxu0 %v1387_v60  ;;  %1452 = vrot.lane.b32.xlu0 %v685_v8, %s2965_s8  ;;  %v3477_v7 = vpop.permute.xlu1 %1486  ;;  %v2860_v8 = vld [vmem:[%s3940_s1 + $0x168] ss:$36 sps:$4 sm:$0xff]  }
 0x16f   : > { %1474 = vrot.lane.b32.xlu1 %v747_v48, %s2965_s8 }
 0x171   : > { %1621 = vmatmul.mubr.bf16.vlgmr.msra.gmra.mrb[0].mxu0 %v2831_v18  ;;  %v697_v1 = vpop.permute.xlu0 %696 }
 0x172   : > { %1454 = vrot.lane.b32.xlu0 %v3391_v53, %s2965_s8  ;;  %1628 = vmatprep.mubr.bf16.mxu0 %v2834_v19  ;;  %v3484_v12 = vpop.permute.xlu1 %1440  ;;  %v2845_v19 = vld [vmem:[%s3940_s1 + $0x98] ss:$36 sps:$4 sm:$0xff]  }
 0x173   : > { %1460 = vrot.lane.b32.xlu1 %v693_v49, %s2965_s8 }
 0x176   : > { %1472 = vrot.lane.b32.xlu0 %v745_v45, %s2965_s8  ;;  %v2870_v45 = vld [vmem:[%s3940_s1 + $0x1fc] ss:$36 sps:$4 sm:$0xff]  }
 0x177   : > { %1478 = vrot.lane.b32.xlu1 %v751_v50, %s2965_s8 }
 0x179   : > { %1629 = vmatmul.mubr.bf16.gmra.mrb[4].mxu0 %v2836_v38 }
 0x17a   : > { %1458 = vrot.lane.b32.xlu0 %v691_v47, %s2965_s8  ;;  %1636 = vmatprep.mubr.bf16.mxu0 %v2840_v0 }
 0x17b   : > { %1464 = vrot.lane.b32.xlu1 %v697_v1, %s2965_s8  ;;  %v2851_v1 = vld [vmem:[%s3940_s1 + $0xe0] ss:$36 sps:$4 sm:$0xff]  }
 0x17e   : > { %1476 = vrot.lane.b32.xlu0 %v749_v37, %s2965_s8 }
 0x181   : > { %1637 = vmatmul.mubr.bf16.gmra.mrb[8].mxu0 %v2842_v3  ;;  %v2855_v3 = vld [vmem:[%s3940_s1 + $0x12c] ss:$36 sps:$4 sm:$0xff]  }
 0x182   : > { %1462 = vrot.lane.b32.xlu0 %v695_v22, %s2965_s8  ;;  %1644 = vmatprep.mubr.bf16.mxu0 %v2846_v4 }
 0x186   : > { %1496 = vrot.lane.b32.xlu0 %v769_v59, %s2965_s8  ;;  %v2843_v59 = vld [vmem:[%s3940_s1 + $0x9c] ss:$36 sps:$4 sm:$0xff]  }
 0x188   : > { %v1421_v11 = vpop.permute.xlu0 %1420 }
 0x189   : > { %2522 = vmatprep.subr.bf16.mxu1 %v1421_v11  ;;  %1645 = vmatmul.mubr.bf16.gmra.mrb[12].mxu0 %v2848_v6  ;;  %v2861_v11 = vld [vmem:[%s3940_s1 + $0x174] ss:$36 sps:$4 sm:$0xff]  }
 0x18a   : > { %1480 = vrot.lane.b32.xlu0 %v753_v61, %s2965_s8  ;;  %1652 = vmatprep.mubr.bf16.mxu0 %v2852_v10  ;;  %v2849_v61 = vld [vmem:[%s3940_s1 + $0xe4] ss:$36 sps:$4 sm:$0xff]  }
 0x18b   : > { %v2857_v10 = vld [vmem:[%s3940_s1 + $0x128] ss:$36 sps:$4 sm:$0xff]  }
 0x18c   : > { %v1405_v30 = vpop.permute.xlu0 %1404 }
 0x18d   : > { %2523 = vmatpush3.bf16.msra.mxu1 %v1405_v30 }
 0x190   : > { %v1423_v20 = vpop.permute.xlu0 %1422  ;;  %v1425_v34 = vpop.permute.xlu1 %1424 }
 0x191   : > { %2524 = vmatprep.subr.bf16.mxu1 %v1423_v20  ;;  %1653 = vmatmul.mubr.bf16.gmra.mrb[16].mxu0 %v2854_v40  ;;  %v2863_v20 = vld [vmem:[%s3940_s1 + $0x170] ss:$36 sps:$4 sm:$0xff]  }
 0x192   : > { %1660 = vmatprep.mubr.bf16.mxu0 %v2858_v39 }
 0x194   : > { %v1407_v23 = vpop.permute.xlu0 %1406  ;;  %v1409_v53 = vpop.permute.xlu1 %1408 }
 0x195   : > { %2525 = vmatpush3.bf16.msra.mxu1 %v1407_v23 }
 0x196   : > { %2526 = vmatprep.subr.bf16.mxu1 %v1425_v34  ;;  %v2867_v34 = vld [vmem:[%s3940_s1 + $0x1bc] ss:$36 sps:$4 sm:$0xff]  }
 0x198   : > { %v641_v41 = vpop.permute.xlu0 %640  ;;  %v1427_v43 = vpop.permute.xlu1 %1426 }
 0x199   : > { %1448 = vrot.lane.b32.xlu1 %v641_v41, %s2965_s8  ;;  %2527 = vmatpush3.bf16.msra.mxu1 %v1409_v53 }
 0x19a   : > { %2528 = vmatprep.subr.bf16.mxu1 %v1427_v43  ;;  %1661 = vmatmul.mubr.bf16.gmra.mrb[20].mxu0 %v2860_v8  ;;  %v2875_v43 = vld [vmem:[%s3940_s1 + $0x200] ss:$36 sps:$4 sm:$0xff]  }
 0x19b   : > { %1668 = vmatprep.mubr.bf16.mxu0 %v2864_v35 }
 0x19c   : > { %v699_v14 = vpop.permute.xlu0 %698  ;;  %v1411_v15 = vpop.permute.xlu1 %1410 }
 0x19d   : > { %822 = vrot.lane.b32.xlu1 %v2347_v13, %s2970_s13  ;;  %1466 = vrot.lane.b32.xlu0 %v699_v14, %s2965_s8  ;;  %v2881_v13 = vld [vmem:[%s3940_s1 + $0x1c] ss:$36 sps:$4 sm:$0xff]  }
 0x19e   : > { %2529 = vmatpush3.bf16.msra.mxu1 %v1411_v15 }
 0x1a0   : > { %v643_v46 = vpop.permute.xlu0 %642  ;;  %v1429_v47 = vpop.permute.xlu1 %1428 }
 0x1a1   : > { %1450 = vrot.lane.b32.xlu0 %v643_v46, %s2965_s8  ;;  %1498 = vrot.lane.b32.xlu1 %v3453_v63, %s2965_s8 }
 0x1a2   : > { %2530 = vmatprep.subr.bf16.mxu1 %v1429_v47  ;;  %1669 = vmatmul.mubr.bf16.gmra.mrb[24].mxu0 %v2866_v27 }
 0x1a3   : > { %1676 = vmatprep.mubr.bf16.mxu0 %v2870_v45 }
 0x1a4   : > { %v3522_v48 = vpop.permute.xlu0 %1436  ;;  %v1413_v17 = vpop.permute.xlu1 %1412 }
 0x1a5   : > { %824 = vrot.lane.b32.xlu0 %v2348_v16, %s2970_s13  ;;  %1482 = vrot.lane.b32.xlu1 %v3462_v2, %s2965_s8  ;;  %v2971_v2 = vmov 0   ;;  %v2876_v16 = vld [vmem:[%s3940_s1 + $0x10] ss:$36 sps:$4 sm:$0xff]  }
 0x1a6   : > { %2531 = vmatpush3.bf16.msra.mxu1 %v1413_v17  ;;  %2819 = vset.pattern.permute.xlu1 %v2971_v2  ;;  %v2879_v17 = vld [vmem:[%s3940_s1 + $0x18] ss:$36 sps:$4 sm:$0xff]  }
 0x1a7   : > { %2818 = vset.pattern.permute.xlu0 %v2971_v2  ;;  %v2906_v2 = vld [vmem:[%s3940_s1 + $0x17c] ss:$36 sps:$4 sm:$0xff]  }
 0x1a8   : > { %v3533_v32 = vpop.permute.xlu0 %1438  ;;  %v1431_v62 = vpop.permute.xlu1 %1430 }
 0x1a9   : > { %826 = vrot.lane.b32.xlu1 %v2349_v33, %s2970_s13  ;;  %2532 = vmatprep.subr.bf16.mxu1 %v1431_v62  ;;  %v908_v33 = vld [vmem:[%s3941_s2] sm:$0xff] }
 0x1aa   : > { %1677 = vmatmul.mubr.bf16.gmra.mrb[28].mxu0 %v2872_v42  ;;  %v2885_v42 = vld [vmem:[%s3940_s1 + $0x64] ss:$36 sps:$4 sm:$0xff]  }
 0x1ab   : > { %1814 = vmatprep.mubr.bf16.mxu0 %v2878_v31  ;;  %v2888_v62 = vld [vmem:[%s3940_s1 + $0xa4] ss:$36 sps:$4 sm:$0xff]  }
 0x1ac   : > { %v813_v49 = vpop.permute.xlu0 %812  ;;  %v1415_v37 = vpop.permute.xlu1 %1414 }
 0x1ad   : > { %1500 = vrot.lane.b32.xlu0 %v813_v49, %s2965_s8  ;;  %2533 = vmatpush3.bf16.msra.mxu1 %v1415_v37  ;;  %v2887_v37 = vld [vmem:[%s3940_s1 + $0x60] ss:$36 sps:$4 sm:$0xff]  }
 0x1b0   : > { %v1489_v51 = vpop.permute.xlu0 %1488  ;;  %v1433_v52 = vpop.permute.xlu1 %1432 }
 0x1b1   : > { %2534 = vmatprep.subr.bf16.mxu1 %v1433_v52  ;;  %v2891_v52 = vld [vmem:[%s3940_s1 + $0xac] ss:$36 sps:$4 sm:$0xff]  }
 0x1b4   : > { %v3537_v54 = vpop.permute.xlu0 %1442  ;;  %v1417_v29 = vpop.permute.xlu1 %1416 }
 0x1b5   : > { %2535 = vmatpush3.bf16.msra.mxu1 %v1417_v29  ;;  %v2890_v29 = vld [vmem:[%s3940_s1 + $0xa0] ss:$36 sps:$4 sm:$0xff]  }
 0x1b8   : > { %v817_v21 = vpop.permute.xlu0 %816  ;;  %v1435_v22 = vpop.permute.xlu1 %1434 }
 0x1b9   : > { %1504 = vrot.lane.b32.xlu0 %v817_v21, %s2965_s8  ;;  %2536 = vmatprep.subr.bf16.mxu1 %v1435_v22  ;;  %v910_v21 = vld [vmem:[%s3941_s2 + $0x10] sm:$0xff] }
 0x1ba   : > { %v2894_v22 = vld [vmem:[%s3940_s1 + $0xec] ss:$36 sps:$4 sm:$0xff]  }
 0x1bc   : > { %v1419_v50 = vpop.permute.xlu1 %1418  ;;  %v1493_v63 = vpop.permute.xlu0 %1492 }
 0x1bd   : > { %2537 = vmatpush3.bf16.msra.mxu1 %v1419_v50  ;;  %v913_v50 = vld [vmem:[%s3941_s2 + $0x28] sm:$0xff] }
 0x1be   : > { %2650 = vmatprep.subr.bf16.mxu1 %v3471_v5 }
 0x1c0   : > { %v815_v57 = vpop.permute.xlu1 %814  ;;  %1718 = vmatmul.mubr.bf16.vlgmr.msra.gmra.mrb[0].mxu1 %v2828_v55  ;;  %v2893_v55 = vld [vmem:[%s3940_s1 + $0xa8] ss:$36 sps:$4 sm:$0xff]  }
 0x1c1   : > { %1502 = vrot.lane.b32.xlu1 %v815_v57, %s2965_s8  ;;  %1725 = vmatprep.mubr.bf16.mxu1 %v2837_v56  ;;  %v912_v56 = vld [vmem:[%s3941_s2 + $0x20] sm:$0xff]  ;;  %v2897_v57 = vld [vmem:[%s3940_s1 + $0xf4] ss:$36 sps:$4 sm:$0xff]  }
 0x1c4   : > { %v1491_v58 = vpop.permute.xlu1 %1490 }
 0x1c8   : > { %v1445_v60 = vpop.permute.xlu1 %1444  ;;  %1726 = vmatmul.mubr.bf16.gmra.mrb[4].mxu1 %v2839_v36  ;;  %v2896_v36 = vld [vmem:[%s3940_s1 + $0xe8] ss:$36 sps:$4 sm:$0xff]  }
 0x1c9   : > { %1733 = vmatprep.mubr.bf16.mxu1 %v2843_v59  ;;  %v914_v59 = vld [vmem:[%s3941_s2 + $0x30] sm:$0xff] }
 0x1cc   : > { %v819_v18 = vpop.permute.xlu1 %818 }
 0x1cd   : > { %1506 = vrot.lane.b32.xlu1 %v819_v18, %s2965_s8  ;;  %v917_v18 = vld [vmem:[%s3941_s2 + $0x48] sm:$0xff] }
 0x1d0   : > { %v1495_v38 = vpop.permute.xlu1 %1494  ;;  %1734 = vmatmul.mubr.bf16.gmra.mrb[8].mxu1 %v2845_v19  ;;  %v2899_v19 = vld [vmem:[%s3940_s1 + $0xf0] ss:$36 sps:$4 sm:$0xff]  }
 0x1d1   : > { %1741 = vmatprep.mubr.bf16.mxu1 %v2849_v61  ;;  %v916_v61 = vld [vmem:[%s3941_s2 + $0x40] sm:$0xff] }
 0x1d4   : > { %v1469_v0 = vpop.permute.xlu1 %1468 }
 0x1d5   : > { %2651 = vmatpush3.bf16.msra.mxu1 %v1469_v0  ;;  %v2902_v0 = vld [vmem:[%s3940_s1 + $0x130] ss:$36 sps:$4 sm:$0xff]  }
 0x1d6   : > { %2652 = vmatprep.subr.bf16.mxu1 %v3477_v7 }
 0x1d8   : > { %v1447_v4 = vpop.permute.xlu0 %1446  ;;  %v1471_v5 = vpop.permute.xlu1 %1470  ;;  %1742 = vmatmul.mubr.bf16.gmra.mrb[12].mxu1 %v2851_v1  ;;  %v2903_v1 = vld [vmem:[%s3940_s1 + $0x13c] ss:$36 sps:$4 sm:$0xff]  }
 0x1d9   : > { %2653 = vmatpush3.bf16.msra.mxu1 %v1471_v5  ;;  %1749 = vmatprep.mubr.bf16.mxu1 %v2855_v3  ;;  %v2905_v5 = vld [vmem:[%s3940_s1 + $0x138] ss:$36 sps:$4 sm:$0xff]  }
 0x1da   : > { %2654 = vmatprep.subr.bf16.mxu1 %v1489_v51  ;;  %v909_v51 = vld [vmem:[%s3941_s2 + $0x8] sm:$0xff] }
 0x1dc   : > { %v821_v6 = vpop.permute.xlu0 %820 }
 0x1dd   : > { %1508 = vrot.lane.b32.xlu0 %v821_v6, %s2965_s8  ;;  %v1457_v30 = vpop.permute.xlu1 %1456  ;;  %v921_v6 = vld [vmem:[%s3941_s2 + $0x68] sm:$0xff] }
 0x1e0   : > { %v1453_v40 = vpop.permute.xlu0 %1452  ;;  %1750 = vmatmul.mubr.bf16.gmra.mrb[16].mxu1 %v2857_v10  ;;  %v2909_v10 = vld [vmem:[%s3940_s1 + $0x184] ss:$36 sps:$4 sm:$0xff]  }
 0x1e1   : > { %2586 = vmatprep.subr.bf16.mxu0 %v1453_v40  ;;  %1757 = vmatprep.mubr.bf16.mxu1 %v2861_v11  ;;  %v1475_v7 = vpop.permute.xlu1 %1474  ;;  %v920_v11 = vld [vmem:[%s3941_s2 + $0x60] sm:$0xff]  ;;  %v923_v40 = vld [vmem:[%s3941_s2 + $0x78] sm:$0xff] }
 0x1e2   : > { %2587 = vmatpush3.bf16.msra.mxu0 %v3522_v48 }
 0x1e4   : > { %v1455_v39 = vpop.permute.xlu0 %1454 }
 0x1e5   : > { %2588 = vmatprep.subr.bf16.mxu0 %v1455_v39  ;;  %v1461_v53 = vpop.permute.xlu1 %1460 }
 0x1e6   : > { %2589 = vmatpush3.bf16.msra.mxu0 %v3533_v32  ;;  %v2884_v32 = vld [vmem:[%s3940_s1 + $0x58] ss:$36 sps:$4 sm:$0xff]  }
 0x1e7   : > { %2590 = vmatprep.subr.bf16.mxu0 %v1457_v30  ;;  %v2908_v30 = vld [vmem:[%s3940_s1 + $0x178] ss:$36 sps:$4 sm:$0xff]  }
 0x1e8   : > { %v1473_v23 = vpop.permute.xlu0 %1472  ;;  %1758 = vmatmul.mubr.bf16.gmra.mrb[20].mxu1 %v2863_v20  ;;  %v2911_v20 = vld [vmem:[%s3940_s1 + $0x180] ss:$36 sps:$4 sm:$0xff]  }
 0x1e9   : > { %2655 = vmatpush3.bf16.msra.mxu1 %v1473_v23  ;;  %1765 = vmatprep.mubr.bf16.mxu1 %v2867_v34  ;;  %v1479_v35 = vpop.permute.xlu1 %1478  ;;  %v922_v34 = vld [vmem:[%s3941_s2 + $0x70] sm:$0xff] }
 0x1ea   : > { %2591 = vmatpush3.bf16.msra.mxu0 %v3484_v12  ;;  %2656 = vmatprep.subr.bf16.mxu1 %v1491_v58  ;;  %v915_v58 = vld [vmem:[%s3941_s2 + $0x38] sm:$0xff]  ;;  %v2915_v23 = vld [vmem:[%s3940_s1 + $0x1cc] ss:$36 sps:$4 sm:$0xff]  }
 0x1ec   : > { %v1459_v8 = vpop.permute.xlu0 %1458 }
 0x1ed   : > { %2592 = vmatprep.subr.bf16.mxu0 %v1459_v8  ;;  %2657 = vmatpush3.bf16.msra.mxu1 %v1475_v7  ;;  %v1465_v14 = vpop.permute.xlu1 %1464  ;;  %v2912_v7 = vld [vmem:[%s3940_s1 + $0x1c4] ss:$36 sps:$4 sm:$0xff]   ;;  %v2918_v8 = vld [vmem:[%s3940_s1 + $0x20c] ss:$36 sps:$4 sm:$0xff]  }
 0x1ee   : > { %2593 = vmatpush3.bf16.msra.mxu0 %v3537_v54  ;;  %2658 = vmatprep.subr.bf16.mxu1 %v1493_v63  ;;  %v911_v54 = vld [vmem:[%s3941_s2 + $0x18] sm:$0xff] }
 0x1ef   : > { %2594 = vmatprep.subr.bf16.mxu0 %v1461_v53  ;;  %v2914_v53 = vld [vmem:[%s3940_s1 + $0x1c0] ss:$36 sps:$4 sm:$0xff]  }
 0x1f0   : > { %v1477_v41 = vpop.permute.xlu0 %1476  ;;  %1766 = vmatmul.mubr.bf16.gmra.mrb[24].mxu1 %v2869_v9 }
 0x1f1   : > { %2659 = vmatpush3.bf16.msra.mxu1 %v1477_v41  ;;  %1773 = vmatprep.mubr.bf16.mxu1 %v2873_v26 }
 0x1f2   : > { %2595 = vmatpush3.bf16.msra.mxu0 %v1445_v60  ;;  %2660 = vmatprep.subr.bf16.mxu1 %v1495_v38  ;;  %v2900_v60 = vld [vmem:[%s3940_s1 + $0x134] ss:$36 sps:$4 sm:$0xff]  }
 0x1f3   : > { %v919_v38 = vld [vmem:[%s3941_s2 + $0x58] sm:$0xff] }
 0x1f4   : > { %v1463_v12 = vpop.permute.xlu0 %1462 }
 0x1f5   : > { %2596 = vmatprep.subr.bf16.mxu0 %v1463_v12  ;;  %2661 = vmatpush3.bf16.msra.mxu1 %v1479_v35  ;;  %v2917_v12 = vld [vmem:[%s3940_s1 + $0x1c8] ss:$36 sps:$4 sm:$0xff]  }
 0x1f6   : > { %2597 = vmatpush3.bf16.msra.mxu0 %v1447_v4  ;;  %v918_v4 = vld [vmem:[%s3941_s2 + $0x50] sm:$0xff] }
 0x1f7   : > { %2598 = vmatprep.subr.bf16.mxu0 %v1465_v14 }
 0x1f8   : > { %v1497_v15 = vpop.permute.xlu0 %1496  ;;  %1774 = vmatmul.mubr.bf16.gmra.mrb[28].mxu1 %v2875_v43 }
 0x1f9   : > { %2662 = vmatprep.subr.bf16.mxu1 %v1497_v15  ;;  %1911 = vmatprep.mubr.bf16.mxu1 %v2881_v13  ;;  %v2921_v13 = vld [vmem:[%s3940_s1 + $0x214] ss:$36 sps:$4 sm:$0xff]   ;;  %v2920_v15 = vld [vmem:[%s3940_s1 + $0x208] ss:$36 sps:$4 sm:$0xff]  }
 0x1fc   : > { %v1481_v27 = vpop.permute.xlu0 %1480 }
 0x1fd   : > { %2663 = vmatpush3.bf16.msra.mxu1 %v1481_v27 }
 0x20b   : > { %v1449_v28 = vpop.permute.xlu1 %1448 }
 0x20c   : > { %2599 = vmatpush3.bf16.msra.mxu0 %v1449_v28 }
 0x20f   : > { %v1467_v44 = vpop.permute.xlu0 %1466  ;;  %v823_v45 = vpop.permute.xlu1 %822 }
 0x210   : > { %2600 = vmatprep.subr.bf16.mxu0 %v1467_v44  ;;  %1510 = vrot.lane.b32.xlu1 %v823_v45, %s2965_s8  ;;  %v2924_v44 = vld [vmem:[%s3940_s1 + $0x20] ss:$36 sps:$4 sm:$0xff]  }
 0x213   : > { %v1451_v46 = vpop.permute.xlu0 %1450  ;;  %v1499_v47 = vpop.permute.xlu1 %1498 }
 0x214   : > { %2601 = vmatpush3.bf16.msra.mxu0 %v1451_v46  ;;  %2664 = vmatprep.subr.bf16.mxu1 %v1499_v47 }
 0x217   : > { %v825_v25 = vpop.permute.xlu0 %824  ;;  %v1483_v48 = vpop.permute.xlu1 %1482  ;;  %1815 = vmatmul.mubr.bf16.vlgmr.msra.gmra.mrb[32].mxu0 %v2876_v16  ;;  %v2923_v16 = vld [vmem:[%s3940_s1 + $0x210] ss:$36 sps:$4 sm:$0xff]  }
 0x218   : > { %1512 = vrot.lane.b32.xlu0 %v825_v25, %s2965_s8  ;;  %2665 = vmatpush3.bf16.msra.mxu1 %v1483_v48  ;;  %v2925_v25 = vld [vmem:[%s3940_s1 + $0x140] ss:$36 sps:$4 sm:$0xff]  }
 0x219   : > { %1822 = vmatprep.mubr.bf16.mxu0 %v2882_v24 }
 0x21b   : > { %v827_v31 = vpop.permute.xlu1 %826  ;;  %1912 = vmatmul.mubr.bf16.vlgmr.msra.gmra.mrb[32].mxu1 %v2879_v17 }
 0x21c   : > { %1514 = vrot.lane.b32.xlu1 %v827_v31, %s2965_s8  ;;  %1919 = vmatprep.mubr.bf16.mxu1 %v2885_v42 }
 0x21d   : > { %926 = vperm.xlu0 %2818, %v908_v33  }
 0x21f   : > { %v1501_v49 = vpop.permute.xlu0 %1500  ;;  %1823 = vmatmul.mubr.bf16.gmra.mrb[36].mxu0 %v2884_v32 }
 0x220   : > { %2730 = vmatprep.subr.bf16.mxu0 %v1501_v49  ;;  %2762 = vmatprep.subr.bf16.mxu1 %v1501_v49 }
 0x221   : > { %2731 = vmatpush3.bf16.msra.mxu0 %v1501_v49  ;;  %2770 = vmatpush3.bf16.msra.mxu1 %v1501_v49 }
 0x222   : > { %1830 = vmatprep.mubr.bf16.mxu0 %v2888_v62  ;;  %931 = vperm.xlu1 %2819, %v909_v51  }
 0x223   : > { %1920 = vmatmul.mubr.bf16.gmra.mrb[36].mxu1 %v2887_v37  ;;  %941 = vperm.xlu0 %2818, %v911_v54  }
 0x224   : > { %1927 = vmatprep.mubr.bf16.mxu1 %v2891_v52 }
 0x226   : > { %936 = vperm.xlu1 %2819, %v910_v21  }
 0x227   : > { %1831 = vmatmul.mubr.bf16.gmra.mrb[40].mxu0 %v2890_v29  ;;  %951 = vperm.xlu0 %2818, %v913_v50  }
 0x228   : > { %1838 = vmatprep.mubr.bf16.mxu0 %v2894_v22 }
 0x22a   : > { %946 = vperm.xlu1 %2819, %v912_v56  }
 0x22b   : > { %1928 = vmatmul.mubr.bf16.gmra.mrb[40].mxu1 %v2893_v55  ;;  %961 = vperm.xlu0 %2818, %v915_v58   ;;  %v1505_v3 = vpop.permute.xlu0 %1504 }
 0x22c   : > { %1935 = vmatprep.mubr.bf16.mxu1 %v2897_v57 }
 0x22e   : > { %956 = vperm.xlu1 %2819, %v914_v59  }
 0x22f   : > { %1839 = vmatmul.mubr.bf16.gmra.mrb[44].mxu0 %v2896_v36  ;;  %971 = vperm.xlu0 %2818, %v917_v18  }
 0x230   : > { %1846 = vmatprep.mubr.bf16.mxu0 %v2900_v60 }
 0x232   : > { %966 = vperm.xlu1 %2819, %v916_v61  }
 0x233   : > { %v1503_v63 = vpop.permute.xlu1 %1502  ;;  %1936 = vmatmul.mubr.bf16.gmra.mrb[44].mxu1 %v2899_v19  ;;  %981 = vperm.xlu0 %2818, %v919_v38  }
 0x234   : > { %2732 = vmatprep.subr.bf16.mxu0 %v1503_v63  ;;  %2763 = vmatprep.subr.bf16.mxu1 %v1503_v63 }
 0x235   : > { %2733 = vmatpush3.bf16.msra.mxu0 %v1503_v63  ;;  %2771 = vmatpush3.bf16.msra.mxu1 %v1503_v63 }
 0x236   : > { %2734 = vmatprep.subr.bf16.mxu0 %v1505_v3  ;;  %2764 = vmatprep.subr.bf16.mxu1 %v1505_v3 }
 0x237   : > { %1847 = vmatmul.mubr.bf16.gmra.mrb[48].mxu0 %v2902_v0  ;;  %1943 = vmatprep.mubr.bf16.mxu1 %v2903_v1 }
 0x238   : > { %1854 = vmatprep.mubr.bf16.mxu0 %v2906_v2  ;;  %976 = vperm.xlu1 %2819, %v918_v4  }
 0x239   : > { %2735 = vmatpush3.bf16.msra.mxu0 %v1505_v3  ;;  %2772 = vmatpush3.bf16.msra.mxu1 %v1505_v3 }
 0x23a   : > { %991 = vperm.xlu0 %2818, %v921_v6  }
 0x23b   : > { %1944 = vmatmul.mubr.bf16.gmra.mrb[48].mxu1 %v2905_v5 }
 0x23c   : > { %1951 = vmatprep.mubr.bf16.mxu1 %v2909_v10  ;;  %986 = vperm.xlu1 %2819, %v920_v11  }
 0x23e   : > { %1001 = vperm.xlu0 %2818, %v923_v40  }
 0x23f   : > { %v1507_v39 = vpop.permute.xlu1 %1506  ;;  %1855 = vmatmul.mubr.bf16.gmra.mrb[52].mxu0 %v2908_v30 }
 0x240   : > { %2736 = vmatprep.subr.bf16.mxu0 %v1507_v39  ;;  %2765 = vmatprep.subr.bf16.mxu1 %v1507_v39 }
 0x241   : > { %2737 = vmatpush3.bf16.msra.mxu0 %v1507_v39  ;;  %2773 = vmatpush3.bf16.msra.mxu1 %v1507_v39  ;;  %v2926_v39 = vld [vmem:[%s3940_s1 + $0x68] ss:$36 sps:$4 sm:$0xff]  }
 0x242   : > { %1862 = vmatprep.mubr.bf16.mxu0 %v2912_v7  ;;  %996 = vperm.xlu1 %2819, %v922_v34   ;;  %v2928_v34 = vld [vmem:[%s3940_s1 + $0xb0] ss:$36 sps:$4 sm:$0xff]  }
 0x243   : > { %1952 = vmatmul.mubr.bf16.gmra.mrb[52].mxu1 %v2911_v20  ;;  %v2927_v20 = vld [vmem:[%s3940_s1 + $0x188] ss:$36 sps:$4 sm:$0xff]  }
 0x244   : > { %1959 = vmatprep.mubr.bf16.mxu1 %v2915_v23  ;;  %v2474_v9 = vpop.f32.mrb[0].mxu0  ;;  %v2929_v23 = vld [vmem:[%s3940_s1 + $0x1d0] ss:$36 sps:$4 sm:$0xff]  }
 0x245   : > { %v2475_v26 = vpop.f32.mrb[1].mxu0 }
 0x246   : > { %v3726_v35 = vadd.f32 %v2475_v26, %v2474_v9  ;;  %v2477_v41 = vpop.f32.mrb[2].mxu0 }
 0x247   : > { %1863 = vmatmul.mubr.bf16.gmra.mrb[56].mxu0 %v2914_v53  ;;  %v2478_v43 = vpop.f32.mrb[3].mxu0 }
 0x248   : > { %1870 = vmatprep.mubr.bf16.mxu0 %v2918_v8  ;;  %v3734_v14 = vadd.f32 %v2478_v43, %v2477_v41  ;;  %v2931_v43 = vld [vmem:[%s3940_s1 + $0x218] ss:$36 sps:$4 sm:$0xff]  }
 0x24b   : > { %1960 = vmatmul.mubr.bf16.gmra.mrb[56].mxu1 %v2917_v12  ;;  %v2930_v12 = vld [vmem:[%s3940_s1 + $0xf8] ss:$36 sps:$4 sm:$0xff]  }
 0x24c   : > { %1967 = vmatprep.mubr.bf16.mxu1 %v2921_v13  ;;  %v2480_v27 = vpop.f32.mrb[4].mxu0 }
 0x24d   : > { %v2481_v28 = vpop.f32.mrb[5].mxu0 }
 0x24e   : > { %v3742_v45 = vadd.f32 %v2481_v28, %v2480_v27  ;;  %v2483_v46 = vpop.f32.mrb[6].mxu0 }
 0x24f   : > { %v1509_v47 = vpop.permute.xlu0 %1508  ;;  %1871 = vmatmul.mubr.bf16.gmra.mrb[60].mxu0 %v2920_v15  ;;  %v2484_v24 = vpop.f32.mrb[7].mxu0 }
 0x250   : > { %2738 = vmatprep.subr.bf16.mxu0 %v1509_v47  ;;  %2766 = vmatprep.subr.bf16.mxu1 %v1509_v47  ;;  %v3750_v48 = vadd.f32 %v2484_v24, %v2483_v46 }
 0x251   : > { %2739 = vmatpush3.bf16.msra.mxu0 %v1509_v47  ;;  %2774 = vmatpush3.bf16.msra.mxu1 %v1509_v47 }
 0x252   : > { %2746 = vmatprep.mubr.bf16.mxu0 %v2924_v44 }
 0x253   : > { %1968 = vmatmul.mubr.bf16.gmra.mrb[60].mxu1 %v2923_v16 }
 0x254   : > { %2754 = vmatprep.mubr.bf16.mxu1 %v2925_v25  ;;  %v2486_v17 = vpop.f32.mrb[8].mxu0 }
 0x255   : > { %v2487_v42 = vpop.f32.mrb[9].mxu0 }
 0x256   : > { %v3752_v33 = vadd.f32 %v2487_v42, %v2486_v17  ;;  %v2489_v31 = vpop.f32.mrb[10].mxu0 }
 0x257   : > { %v2490_v32 = vpop.f32.mrb[11].mxu0 }
 0x258   : > { %v3754_v62 = vadd.f32 %v2490_v32, %v2489_v31 }
 0x25c   : > { %v2492_v49 = vpop.f32.mrb[12].mxu0 }
 0x25d   : > { %v2493_v37 = vpop.f32.mrb[13].mxu0 }
 0x25e   : > { %v3756_v51 = vadd.f32 %v2493_v37, %v2492_v49  ;;  %v2495_v52 = vpop.f32.mrb[14].mxu0 }
 0x25f   : > { %v2496_v54 = vpop.f32.mrb[15].mxu0 }
 0x260   : > { %v3758_v29 = vadd.f32 %v2496_v54, %v2495_v52 }
 0x264   : > { %v2498_v21 = vpop.f32.mrb[16].mxu0 }
 0x265   : > { %v2499_v22 = vpop.f32.mrb[17].mxu0 }
 0x266   : > { %v3760_v50 = vadd.f32 %v2499_v22, %v2498_v21  ;;  %v2501_v55 = vpop.f32.mrb[18].mxu0 }
 0x267   : > { %v2502_v56 = vpop.f32.mrb[19].mxu0 }
 0x268   : > { %v3762_v57 = vadd.f32 %v2502_v56, %v2501_v55 }
 0x26d   : > { %v2504_v58 = vpop.f32.mrb[20].mxu0 }
 0x26e   : > { %v2505_v36 = vpop.f32.mrb[21].mxu0 }
 0x26f   : > { %v3764_v59 = vadd.f32 %v2505_v36, %v2504_v58  ;;  %v2507_v60 = vpop.f32.mrb[22].mxu0 }
 0x270   : > { %v2508_v18 = vpop.f32.mrb[23].mxu0 }
 0x271   : > { %v3766_v19 = vadd.f32 %v2508_v18, %v2507_v60 }
 0x275   : > { %v2510_v61 = vpop.f32.mrb[24].mxu0 }
 0x276   : > { %v2511_v38 = vpop.f32.mrb[25].mxu0 }
 0x277   : > { %v3768_v63 = vadd.f32 %v2511_v38, %v2510_v61  ;;  %v2513_v0 = vpop.f32.mrb[26].mxu0 }
 0x278   : > { %v2514_v1 = vpop.f32.mrb[27].mxu0 }
 0x279   : > { %v3770_v2 = vadd.f32 %v2514_v1, %v2513_v0 }
 0x27d   : > { %v2516_v3 = vpop.f32.mrb[28].mxu0 }
 0x27e   : > { %v2517_v4 = vpop.f32.mrb[29].mxu0 }
 0x27f   : > { %v3772_v5 = vadd.f32 %v2517_v4, %v2516_v3  ;;  %v2519_v6 = vpop.f32.mrb[30].mxu0 }
 0x280   : > { %v2520_v10 = vpop.f32.mrb[31].mxu0 }
 0x281   : > { %v3774_v11 = vadd.f32 %v2520_v10, %v2519_v6 }
 0x282   : > { %v1511_v30 = vpop.permute.xlu1 %1510 }
 0x283   : > { %2740 = vmatprep.subr.bf16.mxu0 %v1511_v30  ;;  %2767 = vmatprep.subr.bf16.mxu1 %v1511_v30 }
 0x284   : > { %2741 = vmatpush3.bf16.msra.mxu0 %v1511_v30  ;;  %2775 = vmatpush3.bf16.msra.mxu1 %v1511_v30 }
 0x28a   : > { %v1513_v40 = vpop.permute.xlu0 %1512 }
 0x28b   : > { %2742 = vmatprep.subr.bf16.mxu0 %v1513_v40  ;;  %2768 = vmatprep.subr.bf16.mxu1 %v1513_v40 }
 0x28c   : > { %2743 = vmatpush3.bf16.msra.mxu0 %v1513_v40  ;;  %2776 = vmatpush3.bf16.msra.mxu1 %v1513_v40 }
 0x28e   : > { %v1515_v7 = vpop.permute.xlu1 %1514 }
 0x28f   : > { %2744 = vmatprep.subr.bf16.mxu0 %v1515_v7  ;;  %2769 = vmatprep.subr.bf16.mxu1 %v1515_v7 }
 0x290   : > { %2745 = vmatpush3.bf16.msra.mxu0 %v1515_v7  ;;  %2777 = vmatpush3.bf16.msra.mxu1 %v1515_v7 }
 0x293   : > { %2747 = vmatmul.mubr.bf16.vlgmr.msra.gmra.mrb[64].mxu0 %v2926_v39  ;;  %2755 = vmatmul.mubr.bf16.vlgmr.msra.gmra.mrb[64].mxu1 %v2927_v20  ;;  %v2538_v53 = vpop.f32.mrb[0].mxu1 }
 0x294   : > { %2750 = vmatprep.mubr.bf16.mxu0 %v2928_v34  ;;  %2758 = vmatprep.mubr.bf16.mxu1 %v2929_v23  ;;  %v2539_v8 = vpop.f32.mrb[1].mxu1 }
 0x295   : > { %v2540_v9 = vadd.f32 %v2539_v8, %v2538_v53  ;;  %v2541_v26 = vpop.f32.mrb[2].mxu1 }
 0x296   : > { %v2542_v41 = vpop.f32.mrb[3].mxu1 }
 0x297   : > { %v2543_v13 = vadd.f32 %v2542_v41, %v2541_v26 }
 0x29b   : > { %2751 = vmatmul.mubr.bf16.gmra.mrb[68].mxu0 %v2930_v12  ;;  %2759 = vmatmul.mubr.bf16.gmra.mrb[68].mxu1 %v2931_v43  ;;  %v2544_v15 = vpop.f32.mrb[4].mxu1 }
 0x29c   : > { %v2545_v27 = vpop.f32.mrb[5].mxu1  ;;  %v927_v28 = vpop.permute.xlu0 %926 }
 0x29d   : > { %v2546_v44 = vadd.f32 %v2545_v27, %v2544_v15  ;;  %v2547_v46 = vpop.f32.mrb[6].mxu1  ;;  %v1623_v47 = vadd.f32 %v3726_v35, %v927_v28 }
 0x29e   : > { %v2548_v16 = vpop.f32.mrb[7].mxu1 }
 0x29f   : > { %v2549_v24 = vadd.f32 %v2548_v16, %v2547_v46  ;;  %v3795_v25 = vadd.f32 %v2540_v9, %v1623_v47 }
 0x2a1   : > { %v932_v17 = vpop.permute.xlu1 %931 }
 0x2a2   : > { %v1626_v42 = vadd.f32 %v3734_v14, %v932_v17  ;;  %v942_v31 = vpop.permute.xlu0 %941 }
 0x2a3   : > { %v2550_v32 = vpop.f32.mrb[8].mxu1  ;;  %v1634_v49 = vadd.f32 %v3750_v48, %v942_v31 }
 0x2a4   : > { %v2551_v37 = vpop.f32.mrb[9].mxu1  ;;  %v3799_v52 = vadd.f32 %v2543_v13, %v1626_v42 }
 0x2a5   : > { %v2552_v54 = vadd.f32 %v2551_v37, %v2550_v32  ;;  %v2553_v21 = vpop.f32.mrb[10].mxu1  ;;  %v3801_v22 = vadd.f32 %v2549_v24, %v1634_v49  ;;  %v937_v55 = vpop.permute.xlu1 %936 }
 0x2a6   : > { %v2554_v35 = vpop.f32.mrb[11].mxu1  ;;  %v1631_v56 = vadd.f32 %v3742_v45, %v937_v55  ;;  %v952_v58 = vpop.permute.xlu0 %951 }
 0x2a7   : > { %v2555_v36 = vadd.f32 %v2554_v35, %v2553_v21  ;;  %v1642_v60 = vadd.f32 %v3754_v62, %v952_v58 }
 0x2a8   : > { %v3805_v14 = vadd.f32 %v2546_v44, %v1631_v56 }
 0x2a9   : > { %v3807_v18 = vadd.f32 %v2555_v36, %v1642_v60  ;;  %v947_v48 = vpop.permute.xlu1 %946 }
 0x2aa   : > { %v1639_v61 = vadd.f32 %v3752_v33, %v947_v48  ;;  %v962_v38 = vpop.permute.xlu0 %961 }
 0x2ab   : > { %v2556_v0 = vpop.f32.mrb[12].mxu1  ;;  %v1650_v45 = vadd.f32 %v3758_v29, %v962_v38 }
 0x2ac   : > { %v2557_v1 = vpop.f32.mrb[13].mxu1  ;;  %v3810_v3 = vadd.f32 %v2552_v54, %v1639_v61 }
 0x2ad   : > { %v2558_v4 = vadd.f32 %v2557_v1, %v2556_v0  ;;  %v2559_v6 = vpop.f32.mrb[14].mxu1  ;;  %v957_v10 = vpop.permute.xlu1 %956 }
 0x2ae   : > { %v2560_v30 = vpop.f32.mrb[15].mxu1  ;;  %v1647_v62 = vadd.f32 %v3756_v51, %v957_v10  ;;  %v972_v33 = vpop.permute.xlu0 %971 }
 0x2af   : > { %v2561_v40 = vadd.f32 %v2560_v30, %v2559_v6  ;;  %v1658_v26 = vadd.f32 %v3762_v57, %v972_v33 }
 0x2b0   : > { %v3814_v7 = vadd.f32 %v2558_v4, %v1647_v62 }
 0x2b1   : > { %v3816_v39 = vadd.f32 %v2561_v40, %v1650_v45  ;;  %v967_v20 = vpop.permute.xlu1 %966 }
 0x2b2   : > { %v1655_v23 = vadd.f32 %v3760_v50, %v967_v20  ;;  %v982_v13 = vpop.permute.xlu0 %981 }
 0x2b3   : > { %v2562_v34 = vpop.f32.mrb[16].mxu1  ;;  %v1666_v50 = vadd.f32 %v3766_v19, %v982_v13 }
 0x2b4   : > { %v2563_v53 = vpop.f32.mrb[17].mxu1 }
 0x2b5   : > { %v2564_v8 = vadd.f32 %v2563_v53, %v2562_v34  ;;  %v2565_v9 = vpop.f32.mrb[18].mxu1 }
 0x2b6   : > { %v2566_v29 = vpop.f32.mrb[19].mxu1 }
 0x2b7   : > { %v2567_v41 = vadd.f32 %v2566_v29, %v2565_v9  ;;  %v3820_v12 = vadd.f32 %v2564_v8, %v1655_v23  ;;  %v977_v51 = vpop.permute.xlu1 %976 }
 0x2b8   : > { %v1663_v27 = vadd.f32 %v3764_v59, %v977_v51 }
 0x2b9   : > { %v3822_v43 = vadd.f32 %v2567_v41, %v1658_v26  ;;  %v992_v42 = vpop.permute.xlu0 %991 }
 0x2ba   : > { %v1674_v59 = vadd.f32 %v3770_v2, %v992_v42 }
 0x2bb   : > { %v2568_v15 = vpop.f32.mrb[20].mxu1  ;;  %v987_v57 = vpop.permute.xlu1 %986 }
 0x2bc   : > { %v2569_v28 = vpop.f32.mrb[21].mxu1  ;;  %v1671_v32 = vadd.f32 %v3768_v63, %v987_v57 }
 0x2bd   : > { %v2570_v44 = vadd.f32 %v2569_v28, %v2568_v15  ;;  %v2571_v46 = vpop.f32.mrb[22].mxu1  ;;  %v1002_v58 = vpop.permute.xlu0 %1001 }
 0x2be   : > { %v2572_v47 = vpop.f32.mrb[23].mxu1  ;;  %v1682_v63 = vadd.f32 %v3774_v11, %v1002_v58 }
 0x2bf   : > { %v2573_v16 = vadd.f32 %v2572_v47, %v2571_v46  ;;  %v3826_v24 = vadd.f32 %v2570_v44, %v1663_v27 }
 0x2c1   : > { %v3828_v17 = vadd.f32 %v2573_v16, %v1666_v50  ;;  %v997_v19 = vpop.permute.xlu1 %996 }
 0x2c2   : > { %v1679_v60 = vadd.f32 %v3772_v5, %v997_v19 }
 0x2c3   : > { %v2574_v31 = vpop.f32.mrb[24].mxu1 }
 0x2c4   : > { %v2575_v49 = vpop.f32.mrb[25].mxu1 }
 0x2c5   : > { %v2576_v37 = vadd.f32 %v2575_v49, %v2574_v31  ;;  %v2577_v54 = vpop.f32.mrb[26].mxu1 }
 0x2c6   : > { %v2578_v21 = vpop.f32.mrb[27].mxu1 }
 0x2c7   : > { %v2579_v55 = vadd.f32 %v2578_v21, %v2577_v54  ;;  %v3832_v35 = vadd.f32 %v2576_v37, %v1671_v32 }
 0x2c9   : > { %v3834_v56 = vadd.f32 %v2579_v55, %v1674_v59 }
 0x2cb   : > { %v2580_v36 = vpop.f32.mrb[28].mxu1 }
 0x2cc   : > { %v2581_v48 = vpop.f32.mrb[29].mxu1 }
 0x2cd   : > { %v2582_v61 = vadd.f32 %v2581_v48, %v2580_v36  ;;  %v2583_v38 = vpop.f32.mrb[30].mxu1 }
 0x2ce   : > { %v2584_v0 = vpop.f32.mrb[31].mxu1 }
 0x2cf   : > { %v2585_v1 = vadd.f32 %v2584_v0, %v2583_v38  ;;  %v3838_v4 = vadd.f32 %v2582_v61, %v1679_v60 }
 0x2d1   : > { %v3840_v2 = vadd.f32 %v2585_v1, %v1682_v63 }
 0x2ea   : > { %v2602_v6 = vpop.f32.mrb[32].mxu0 }
 0x2eb   : > { %v2603_v45 = vpop.f32.mrb[33].mxu0 }
 0x2ec   : > { %v2604_v10 = vadd.f32 %v2603_v45, %v2602_v6  ;;  %v2605_v30 = vpop.f32.mrb[34].mxu0 }
 0x2ed   : > { %v2606_v62 = vpop.f32.mrb[35].mxu0 }
 0x2ee   : > { %v1817_v40 = vadd.f32 %v2604_v10, %v3795_v25  ;;  %v2666_v20 = vpop.f32.mrb[32].mxu1  ;;  %v2607_v5 = vadd.f32 %v2606_v62, %v2605_v30 }
 0x2ef   : > { %v2667_v33 = vpop.f32.mrb[33].mxu1 }
 0x2f0   : > { %v1820_v34 = vadd.f32 %v2607_v5, %v3799_v52  ;;  %v2668_v23 = vadd.f32 %v2667_v33, %v2666_v20  ;;  %v2669_v11 = vpop.f32.mrb[34].mxu1 }
 0x2f1   : > { %v2670_v53 = vpop.f32.mrb[35].mxu1 }
 0x2f2   : > { %v2671_v8 = vadd.f32 %v2670_v53, %v2669_v11  ;;  %v2608_v9 = vpop.f32.mrb[36].mxu0  ;;  %v3844_v26 = vadd.f32 %v2668_v23, %v1817_v40 }
 0x2f3   : > { %v2609_v29 = vpop.f32.mrb[37].mxu0 }
 0x2f4   : > { %v2610_v41 = vadd.f32 %v2609_v29, %v2608_v9  ;;  %v2611_v51 = vpop.f32.mrb[38].mxu0  ;;  %v3846_v13 = vadd.f32 %v2671_v8, %v1820_v34 }
 0x2f5   : > { %v2612_v15 = vpop.f32.mrb[39].mxu0 }
 0x2f6   : > { %v2672_v27 = vpop.f32.mrb[36].mxu1  ;;  %v2613_v25 = vadd.f32 %v2612_v15, %v2611_v51  ;;  %v1825_v28 = vadd.f32 %v2610_v41, %v3805_v14 }
 0x2f7   : > { %v2673_v44 = vpop.f32.mrb[37].mxu1 }
 0x2f8   : > { %v1828_v52 = vadd.f32 %v2613_v25, %v3801_v22  ;;  %v2674_v46 = vadd.f32 %v2673_v44, %v2672_v27  ;;  %v2675_v50 = vpop.f32.mrb[38].mxu1 }
 0x2f9   : > { %v2676_v47 = vpop.f32.mrb[39].mxu1 }
 0x2fa   : > { %v2677_v16 = vadd.f32 %v2676_v47, %v2675_v50  ;;  %v2614_v57 = vpop.f32.mrb[40].mxu0  ;;  %v3850_v42 = vadd.f32 %v2674_v46, %v1825_v28 }
 0x2fb   : > { %v2615_v31 = vpop.f32.mrb[41].mxu0 }
 0x2fc   : > { %v2616_v32 = vadd.f32 %v2615_v31, %v2614_v57  ;;  %v2617_v49 = vpop.f32.mrb[42].mxu0  ;;  %v3852_v37 = vadd.f32 %v2677_v16, %v1828_v52 }
 0x2fd   : > { %v2618_v54 = vpop.f32.mrb[43].mxu0 }
 0x2fe   : > { %v2678_v59 = vpop.f32.mrb[40].mxu1  ;;  %v2619_v21 = vadd.f32 %v2618_v54, %v2617_v49  ;;  %v1833_v14 = vadd.f32 %v2616_v32, %v3810_v3 }
 0x2ff   : > { %v2679_v55 = vpop.f32.mrb[41].mxu1 }
 0x300   : > { %v1836_v22 = vadd.f32 %v2619_v21, %v3807_v18  ;;  %v2680_v19 = vadd.f32 %v2679_v55, %v2678_v59  ;;  %v2681_v58 = vpop.f32.mrb[42].mxu1 }
 0x301   : > { %v2682_v36 = vpop.f32.mrb[43].mxu1 }
 0x302   : > { %v2683_v60 = vadd.f32 %v2682_v36, %v2681_v58  ;;  %v2620_v48 = vpop.f32.mrb[44].mxu0  ;;  %v3856_v61 = vadd.f32 %v2680_v19, %v1833_v14 }
 0x303   : > { %v2621_v38 = vpop.f32.mrb[45].mxu0 }
 0x304   : > { %v2622_v63 = vadd.f32 %v2621_v38, %v2620_v48  ;;  %v2623_v0 = vpop.f32.mrb[46].mxu0  ;;  %v3858_v1 = vadd.f32 %v2683_v60, %v1836_v22 }
 0x305   : > { %v2624_v6 = vpop.f32.mrb[47].mxu0 }
 0x306   : > { %v2684_v45 = vpop.f32.mrb[44].mxu1  ;;  %v2625_v10 = vadd.f32 %v2624_v6, %v2623_v0  ;;  %v1841_v3 = vadd.f32 %v2622_v63, %v3814_v7 }
 0x307   : > { %v2685_v30 = vpop.f32.mrb[45].mxu1 }
 0x308   : > { %v1844_v18 = vadd.f32 %v2625_v10, %v3816_v39  ;;  %v2686_v62 = vadd.f32 %v2685_v30, %v2684_v45  ;;  %v2687_v40 = vpop.f32.mrb[46].mxu1 }
 0x309   : > { %v2688_v20 = vpop.f32.mrb[47].mxu1 }
 0x30a   : > { %v2689_v5 = vadd.f32 %v2688_v20, %v2687_v40  ;;  %v2626_v33 = vpop.f32.mrb[48].mxu0  ;;  %v3862_v34 = vadd.f32 %v2686_v62, %v1841_v3 }
 0x30b   : > { %v2627_v23 = vpop.f32.mrb[49].mxu0 }
 0x30c   : > { %v2628_v11 = vadd.f32 %v2627_v23, %v2626_v33  ;;  %v2629_v53 = vpop.f32.mrb[50].mxu0  ;;  %v3864_v8 = vadd.f32 %v2689_v5, %v1844_v18 }
 0x30d   : > { %v2630_v9 = vpop.f32.mrb[51].mxu0 }
 0x30e   : > { %v2690_v29 = vpop.f32.mrb[48].mxu1  ;;  %v2631_v41 = vadd.f32 %v2630_v9, %v2629_v53  ;;  %v1849_v7 = vadd.f32 %v2628_v11, %v3820_v12 }
 0x30f   : > { %v2691_v51 = vpop.f32.mrb[49].mxu1 }
 0x310   : > { %v1852_v39 = vadd.f32 %v2631_v41, %v3822_v43  ;;  %v2692_v15 = vadd.f32 %v2691_v51, %v2690_v29  ;;  %v2693_v27 = vpop.f32.mrb[50].mxu1 }
 0x311   : > { %v2694_v25 = vpop.f32.mrb[51].mxu1 }
 0x312   : > { %v2695_v28 = vadd.f32 %v2694_v25, %v2693_v27  ;;  %v2632_v44 = vpop.f32.mrb[52].mxu0  ;;  %v1946_v52 = vadd.f32 %v2692_v15, %v1849_v7 }
 0x313   : > { %v2633_v46 = vpop.f32.mrb[53].mxu0 }
 0x314   : > { %v2634_v50 = vadd.f32 %v2633_v46, %v2632_v44  ;;  %v2635_v47 = vpop.f32.mrb[54].mxu0  ;;  %v3868_v16 = vadd.f32 %v2695_v28, %v1852_v39 }
 0x315   : > { %v2636_v57 = vpop.f32.mrb[55].mxu0 }
 0x316   : > { %v2696_v31 = vpop.f32.mrb[52].mxu1  ;;  %v2637_v32 = vadd.f32 %v2636_v57, %v2635_v47  ;;  %v1857_v49 = vadd.f32 %v2634_v50, %v3826_v24 }
 0x317   : > { %v2697_v12 = vpop.f32.mrb[53].mxu1 }
 0x318   : > { %v1860_v54 = vadd.f32 %v2637_v32, %v3828_v17  ;;  %v2698_v43 = vadd.f32 %v2697_v12, %v2696_v31  ;;  %v2699_v59 = vpop.f32.mrb[54].mxu1 }
 0x319   : > { %v2700_v21 = vpop.f32.mrb[55].mxu1 }
 0x31a   : > { %v2701_v14 = vadd.f32 %v2700_v21, %v2699_v59  ;;  %v2638_v55 = vpop.f32.mrb[56].mxu0  ;;  %v1954_v22 = vadd.f32 %v2698_v43, %v1857_v49 }
 0x31b   : > { %v2639_v19 = vpop.f32.mrb[57].mxu0 }
 0x31c   : > { %v2640_v58 = vadd.f32 %v2639_v19, %v2638_v55  ;;  %v2641_v36 = vpop.f32.mrb[58].mxu0  ;;  %v1957_v60 = vadd.f32 %v2701_v14, %v1860_v54 }
 0x31d   : > { %v2642_v48 = vpop.f32.mrb[59].mxu0 }
 0x31e   : > { %v2702_v38 = vpop.f32.mrb[56].mxu1  ;;  %v2643_v63 = vadd.f32 %v2642_v48, %v2641_v36  ;;  %v1865_v0 = vadd.f32 %v2640_v58, %v3832_v35 }
 0x31f   : > { %v2703_v6 = vpop.f32.mrb[57].mxu1 }
 0x320   : > { %v1868_v24 = vadd.f32 %v2643_v63, %v3834_v56  ;;  %v2704_v45 = vadd.f32 %v2703_v6, %v2702_v38  ;;  %v2705_v17 = vpop.f32.mrb[58].mxu1 }
 0x321   : > { %v2706_v10 = vpop.f32.mrb[59].mxu1 }
 0x322   : > { %v2707_v3 = vadd.f32 %v2706_v10, %v2705_v17  ;;  %v2644_v30 = vpop.f32.mrb[60].mxu0  ;;  %v3874_v18 = vadd.f32 %v2704_v45, %v1865_v0 }
 0x323   : > { %v2645_v62 = vpop.f32.mrb[61].mxu0 }
 0x324   : > { %v2646_v40 = vadd.f32 %v2645_v62, %v2644_v30  ;;  %v2647_v20 = vpop.f32.mrb[62].mxu0  ;;  %v3876_v5 = vadd.f32 %v2707_v3, %v1868_v24 }
 0x325   : > { %v2648_v33 = vpop.f32.mrb[63].mxu0 }
 0x326   : > { %v2708_v23 = vpop.f32.mrb[60].mxu1  ;;  %v2649_v11 = vadd.f32 %v2648_v33, %v2647_v20  ;;  %v1873_v35 = vadd.f32 %v2646_v40, %v3838_v4 }
 0x327   : > { %v2709_v53 = vpop.f32.mrb[61].mxu1 }
 0x328   : > { %v1876_v56 = vadd.f32 %v2649_v11, %v3840_v2  ;;  %v2710_v9 = vadd.f32 %v2709_v53, %v2708_v23  ;;  %v2711_v29 = vpop.f32.mrb[62].mxu1 }
 0x329   : > { %v2712_v41 = vpop.f32.mrb[63].mxu1 }
 0x32a   : > { %v2713_v7 = vadd.f32 %v2712_v41, %v2711_v29  ;;  %v1970_v51 = vadd.f32 %v2710_v9, %v1873_v35 }
 0x32c   : > { %v1973_v39 = vadd.f32 %v2713_v7, %v1876_v56 }
 0x366   : > { %v2748_v15 = vpop.f32.mrb[64].mxu0  ;;  %v2756_v27 = vpop.f32.mrb[64].mxu1 }
 0x367   : > { %v2019_v25 = vadd.f32 %v2748_v15, %v3850_v42  ;;  %v2051_v28 = vadd.f32 %v2756_v27, %v1954_v22  ;;  %v2010_v44 = vpop.f32.mrb[65].mxu0  ;;  %v2042_v46 = vpop.f32.mrb[65].mxu1 }
 0x368   : > { %v2011_v4 = vadd.f32 %v2010_v44, %v3844_v26  ;;  %v2043_v50 = vadd.f32 %v2042_v46, %v1946_v52  ;;  %v2749_v47 = vpop.f32.mrb[66].mxu0  ;;  %v2757_v2 = vpop.f32.mrb[66].mxu1 }
 0x369   : > { %v2075_v57 = vmax.f32 %v2019_v25, 0.0  ;;  %v2083_v31 = vmax.f32 %v2051_v28, 0.0  ;;  %v2022_v32 = vadd.f32 %v2749_v47, %v3852_v37  ;;  %v2054_v49 = vadd.f32 %v2757_v2, %v1957_v60  ;;  %v2013_v12 = vpop.f32.mrb[67].mxu0  ;;  %v2045_v54 = vpop.f32.mrb[67].mxu1 }
 0x36a   : > { %v2073_v42 = vmax.f32 %v2011_v4, 0.0  ;;  %v2081_v26 = vmax.f32 %v2043_v50, 0.0  ;;  %v2014_v52 = vadd.f32 %v2013_v12, %v3846_v13  ;;  %v2046_v43 = vadd.f32 %v2045_v54, %v3868_v16 }
 0x36b   : > { %v2444_v37 = vpack.c.bf16 %v2075_v57, %v2075_v57  ;;  %v2452_v59 = vpack.c.bf16 %v2083_v31, %v2083_v31  ;;  %v2076_v21 = vmax.f32 %v2022_v32, 0.0  ;;  %v2084_v14 = vmax.f32 %v2054_v49, 0.0 }
 0x36c   : > { %v2442_v55 = vpack.c.bf16 %v2073_v42, %v2073_v42  ;;  %v2450_v22 = vpack.c.bf16 %v2081_v26, %v2081_v26  ;;  %v2074_v19 = vmax.f32 %v2014_v52, 0.0  ;;  %v2082_v58 = vmax.f32 %v2046_v43, 0.0 }
 0x36d   : > { %2156 = vst.msk [vmem:[%s3888_s7 + $0x8] sm:$0xf] %vm2153_vm0, %v2444_v37  ;;  %2164 = vst.msk [vmem:[%s3888_s7 + $0x28] sm:$0xf] %vm2153_vm0, %v2452_v59  ;;  %v2445_v36 = vpack.c.bf16 %v2076_v21, %v2076_v21  ;;  %v2453_v13 = vpack.c.bf16 %v2084_v14, %v2084_v14 }
 0x36e   : > { %2154 = vst.msk [vmem:[%s3888_s7] sm:$0xf] %vm2153_vm0, %v2442_v55  ;;  %2162 = vst.msk [vmem:[%s3888_s7 + $0x20] sm:$0xf] %vm2153_vm0, %v2450_v22  ;;  %v2443_v16 = vpack.c.bf16 %v2074_v19, %v2074_v19  ;;  %v2451_v60 = vpack.c.bf16 %v2082_v58, %v2082_v58  ;;  %v2752_v48 = vpop.f32.mrb[68].mxu0  ;;  %v2760_v38 = vpop.f32.mrb[68].mxu1 }
 0x36f   : > { %2157 = vst.msk [vmem:[%s3888_s7 + $0xc] sm:$0xf] %vm2153_vm0, %v2445_v36  ;;  %2165 = vst.msk [vmem:[%s3888_s7 + $0x2c] sm:$0xf] %vm2153_vm0, %v2453_v13  ;;  %v2035_v63 = vadd.f32 %v2752_v48, %v3862_v34  ;;  %v2067_v0 = vadd.f32 %v2760_v38, %v1970_v51  ;;  %v2026_v6 = vpop.f32.mrb[69].mxu0  ;;  %v2058_v24 = vpop.f32.mrb[69].mxu1 }
 0x370   : > { %2155 = vst.msk [vmem:[%s3888_s7 + $0x4] sm:$0xf] %vm2153_vm0, %v2443_v16  ;;  %2163 = vst.msk [vmem:[%s3888_s7 + $0x24] sm:$0xf] %vm2153_vm0, %v2451_v60  ;;  %v2027_v45 = vadd.f32 %v2026_v6, %v3856_v61  ;;  %v2059_v17 = vadd.f32 %v2058_v24, %v3874_v18  ;;  %v2753_v10 = vpop.f32.mrb[70].mxu0  ;;  %v2761_v3 = vpop.f32.mrb[70].mxu1 }
 0x371   : > { %v2079_v30 = vmax.f32 %v2035_v63, 0.0  ;;  %v2087_v62 = vmax.f32 %v2067_v0, 0.0  ;;  %v2038_v40 = vadd.f32 %v2753_v10, %v3864_v8  ;;  %v2070_v20 = vadd.f32 %v2761_v3, %v1973_v39  ;;  %v2029_v34 = vpop.f32.mrb[71].mxu0  ;;  %v2061_v33 = vpop.f32.mrb[71].mxu1 }
 0x372   : > { %v2077_v23 = vmax.f32 %v2027_v45, 0.0  ;;  %v2085_v11 = vmax.f32 %v2059_v17, 0.0  ;;  %v2030_v35 = vadd.f32 %v2029_v34, %v3858_v1  ;;  %v2062_v61 = vadd.f32 %v2061_v33, %v3876_v5 }
 0x373   : > { %v2448_v18 = vpack.c.bf16 %v2079_v30, %v2079_v30  ;;  %v2456_v53 = vpack.c.bf16 %v2087_v62, %v2087_v62  ;;  %v2080_v56 = vmax.f32 %v2038_v40, 0.0  ;;  %v2088_v8 = vmax.f32 %v2070_v20, 0.0 }
 0x374   : > { %v2446_v9 = vpack.c.bf16 %v2077_v23, %v2077_v23  ;;  %v2454_v29 = vpack.c.bf16 %v2085_v11, %v2085_v11  ;;  %v2078_v41 = vmax.f32 %v2030_v35, 0.0  ;;  %v2086_v7 = vmax.f32 %v2062_v61, 0.0 }
 0x375   : > { %2160 = vst.msk [vmem:[%s3888_s7 + $0x18] sm:$0xf] %vm2153_vm0, %v2448_v18  ;;  %2168 = vst.msk [vmem:[%s3888_s7 + $0x38] sm:$0xf] %vm2153_vm0, %v2456_v53  ;;  %v2449_v51 = vpack.c.bf16 %v2080_v56, %v2080_v56  ;;  %v2457_v1 = vpack.c.bf16 %v2088_v8, %v2088_v8 }
 0x376   : > { %2158 = vst.msk [vmem:[%s3888_s7 + $0x10] sm:$0xf] %vm2153_vm0, %v2446_v9  ;;  %2166 = vst.msk [vmem:[%s3888_s7 + $0x30] sm:$0xf] %vm2153_vm0, %v2454_v29  ;;  %v2447_v5 = vpack.c.bf16 %v2078_v41, %v2078_v41  ;;  %v2455_v39 = vpack.c.bf16 %v2086_v7, %v2086_v7 }
 0x377   : > { %2161 = vst.msk [vmem:[%s3888_s7 + $0x1c] sm:$0xf] %vm2153_vm0, %v2449_v51  ;;  %2169 = vst.msk [vmem:[%s3888_s7 + $0x3c] sm:$0xf] %vm2153_vm0, %v2457_v1 }
 0x378   : > { %2159 = vst.msk [vmem:[%s3888_s7 + $0x14] sm:$0xf] %vm2153_vm0, %v2447_v5  ;;  %2167 = vst.msk [vmem:[%s3888_s7 + $0x34] sm:$0xf] %vm2153_vm0, %v2455_v39 }
 0x379 PF: > { %s14_s17 = sadd.s32 1, %s2954_s17   ;;  %s3944_s15 = smov %s2950_s16 }
 0x37a   : > { %p11_p5 = scmp.ge.s32.totalorder %s14_s17, 4   ;;  %s3945_s16 = smov %s3947_s18 }
 0x37c   :  { %13 = sbr.rel (!%p11_p5) target bundleno = 2 (0x2), region = 72 }

</bundles_post_ra>
